<compile_context>
chip_gen: v6e
topology: v6e:2x2x1
jax: 0.10.0
libtpu: 0.0.40
codegen_flags: <defaults>
</compile_context>

<pallas_src>
import functools

import jax
import jax.numpy as jnp
from jax import lax
from jax.experimental import pallas as pl
from jax.experimental.pallas import tpu as pltpu


def _round_up(v, m):
    return (v + m - 1) // m * m


def _compiler_params(dimension_semantics):
    # Per-generation VMEM budget: query the chip, keep headroom, fall back to
    # a v7x-safe 48 MiB if the query is unavailable.
    try:
        cap = pltpu.get_tpu_info().vmem_capacity_bytes
        limit = min(int(cap * 3 // 4), 100 * 1024 * 1024)
    except Exception:
        limit = 48 * 1024 * 1024
    return pltpu.CompilerParams(dimension_semantics=dimension_semantics,
                                vmem_limit_bytes=limit)


# ---------------------------------------------------------------------------
# Conv3d (stride=1, dilation=1, groups=1, bias=False)
# ---------------------------------------------------------------------------
def _conv3d_kernel(*refs, Td, kd, kh, kw, Wp, Macc, n_planes):
    """One grid step = (batch n, block of Td consecutive output depths).

    refs = [plane_0 .. plane_{n_planes-1}, w, out]
      plane_r : (1, 1, Cin_p, PL) bf16  padded depth plane (db*Td + r),
                channel-first, plane flattened onto lanes (col = h*Wp + w).
      w       : (kd, Cout_p, kh*kw*Cin_p) bf16  resident across the grid.
      out     : (1, Td, Cout_p, Macc) f32  lane-dense conv output block.
    """
    x_refs = refs[:n_planes]
    w_ref = refs[n_planes]
    o_ref = refs[n_planes + 1]

    # Hoisted cast: bf16 -> f32 once per plane (not per tap slice).
    planes = [x_refs[r][0, 0].astype(jnp.float32) for r in range(n_planes)]

    for td in range(Td):
        acc = None
        for i in range(kd):
            plane = planes[td + i]
            # Stack the kh*kw taps along the contraction dim.  Each piece is a
            # shifted (Cin_p, Macc) lane-slice; Cin_p is a multiple of 8, so
            # the sublane concatenation is exactly f32-tile aligned.
            pieces = [plane[:, j * Wp + k: j * Wp + k + Macc]
                      for j in range(kh) for k in range(kw)]
            patch = jnp.concatenate(pieces, axis=0).astype(jnp.bfloat16)
            part = jnp.dot(w_ref[i], patch,
                           preferred_element_type=jnp.float32)  # (Cout_p, Macc)
            acc = part if acc is None else acc + part
        o_ref[0, td] = acc          # contiguous, lane-dense (Cout_p, Macc) store


# ---------------------------------------------------------------------------
# InstanceNorm3d(affine=True) + ReLU, fused, consuming the conv layout
# ---------------------------------------------------------------------------
def _in_relu_kernel(x_ref, g_ref, b_ref, m_ref, o_ref, *, inv_count):
    x = x_ref[0]                               # (Do, CT, Macc) f32
    m = m_ref[...][None]                       # (1, 1, Macc): 1 = valid column
    xm = x * m
    mean = jnp.sum(xm, axis=(0, 2), keepdims=True) * inv_count      # (1, CT, 1)
    xc = (x - mean) * m
    var = jnp.sum(xc * xc, axis=(0, 2), keepdims=True) * inv_count  # biased var
    g = g_ref[...][None]                       # (1, CT, 1)
    b = b_ref[...][None]
    y = (x - mean) * lax.rsqrt(var + 1e-5) * g + b
    o_ref[0] = jnp.maximum(y, 0.0)


# ---------------------------------------------------------------------------
# SingleConv3d forward:  conv (bias=False) -> InstanceNorm(affine) -> ReLU
# ---------------------------------------------------------------------------
def single_conv3d_forward(x, w, gamma, beta, padding=1):
    N, Cin, D, H, W = x.shape
    Cout, Cin2, kd, kh, kw = w.shape
    assert Cin == Cin2
    p = padding
    Dp, Hp, Wp = D + 2 * p, H + 2 * p, W + 2 * p
    Do, Ho, Wo = Dp - kd + 1, Hp - kh + 1, Wp - kw + 1
    Macc = Ho * Wp                              # flat (padded-W) spatial per depth
    tail = (kh - 1) * Wp + (kw - 1)
    PL = Hp * Wp + tail

    Cin_p = _round_up(Cin, 8)
    Cout_p = _round_up(Cout, 8)

    # Output-depth tile: fold kd off the grid and amortise plane re-reads.
    Td = next(t for t in (8, 4, 2, 1) if Do % t == 0)
    n_planes = Td + kd - 1

    # ---- one-time wrapper-side data prep (bf16 activations halve DMA bytes) ----
    xp = jnp.pad(x.astype(jnp.float32),
                 ((0, 0), (0, Cin_p - Cin), (p, p), (p, p), (p, p)))
    xcf = jnp.transpose(xp, (0, 2, 1, 3, 4)).reshape(N, Dp, Cin_p, Hp * Wp)
    xcf = jnp.pad(xcf, ((0, 0), (0, 0), (0, 0), (0, tail))).astype(jnp.bfloat16)

    wp = jnp.pad(w.astype(jnp.float32),
                 ((0, Cout_p - Cout), (0, Cin_p - Cin), (0, 0), (0, 0), (0, 0)))
    wt = jnp.transpose(wp, (2, 0, 3, 4, 1)).reshape(kd, Cout_p, kh * kw * Cin_p)
    wt = wt.astype(jnp.bfloat16)                # columns ordered (j, k, cin)

    conv_kernel = functools.partial(_conv3d_kernel, Td=Td, kd=kd, kh=kh, kw=kw,
                                    Wp=Wp, Macc=Macc, n_planes=n_planes)
    plane_specs = [
        pl.BlockSpec((1, 1, Cin_p, PL),
                     (lambda n, db, r=r: (n, db * Td + r, 0, 0)))
        for r in range(n_planes)
    ]
    w_spec = pl.BlockSpec((kd, Cout_p, kh * kw * Cin_p), lambda n, db: (0, 0, 0))

    y4 = pl.pallas_call(
        conv_kernel,
        out_shape=jax.ShapeDtypeStruct((N, Do, Cout_p, Macc), jnp.float32),
        grid=(N, Do // Td),
        in_specs=plane_specs + [w_spec],
        out_specs=pl.BlockSpec((1, Td, Cout_p, Macc), lambda n, db: (n, db, 0, 0)),
        compiler_params=_compiler_params(("parallel", "parallel")),
    )(*([xcf] * n_planes), wt)

    # ---- fused InstanceNorm(affine) + ReLU directly on the conv layout ----
    CT = 8                                       # channel tile (Cout_p % 8 == 0)
    g = jnp.pad(gamma.astype(jnp.float32), (0, Cout_p - Cout),
                constant_values=1.0).reshape(Cout_p, 1)
    b = jnp.pad(beta.astype(jnp.float32),
                (0, Cout_p - Cout)).reshape(Cout_p, 1)
    col = jnp.arange(Macc, dtype=jnp.int32) % Wp
    mask = (col < Wo).astype(jnp.float32).reshape(1, Macc)   # exclude padded-W cols
    inv_count = 1.0 / float(Do * Ho * Wo)

    in_kernel = functools.partial(_in_relu_kernel, inv_count=inv_count)
    yn = pl.pallas_call(
        in_kernel,
        out_shape=jax.ShapeDtypeStruct((N, Do, Cout_p, Macc), jnp.float32),
        grid=(N, Cout_p // CT),
        in_specs=[pl.BlockSpec((1, Do, CT, Macc), lambda n, c: (n, 0, c, 0)),
                  pl.BlockSpec((CT, 1), lambda n, c: (c, 0)),
                  pl.BlockSpec((CT, 1), lambda n, c: (c, 0)),
                  pl.BlockSpec((1, Macc), lambda n, c: (0, 0))],
        out_specs=pl.BlockSpec((1, Do, CT, Macc), lambda n, c: (n, 0, c, 0)),
        compiler_params=_compiler_params(("parallel", "parallel")),
    )(y4, g, b, mask)

    # ---- final layout only: drop padded channels / padded-W columns -> NCDHW ----
    y = yn.reshape(N, Do, Cout_p, Ho, Wp)[:, :, :Cout, :, :Wo]
    return jnp.transpose(y, (0, 2, 1, 3, 4))     # (N, Cout, Do, Ho, Wo)


# ---------------------------------------------------------------------------
if __name__ == "__main__":
    key = jax.random.PRNGKey(0)
    k1, k2, k3, k4 = jax.random.split(key, 4)

    N, Cin, Cout = 2, 4, 8
    D = H = W = 16
    ksz, pad = 3, 1

    x = jax.random.normal(k1, (N, Cin, D, H, W), jnp.float32)
    w = jax.random.normal(k2, (Cout, Cin, ksz, ksz, ksz), jnp.float32) * 0.1
    gamma = 1.0 + 0.1 * jax.random.normal(k3, (Cout,), jnp.float32)
    beta = 0.1 * jax.random.normal(k4, (Cout,), jnp.float32)

    fwd = jax.jit(functools.partial(single_conv3d_forward, padding=pad))
    y = fwd(x, w, gamma, beta)
    y = jax.block_until_ready(y)

    assert y.shape == (N, Cout, D, H, W)
    assert bool(jnp.all(jnp.isfinite(y)))

    # Pure-JAX f32 reference; Pallas path feeds the MXU bf16, so compare with
    # a loose tolerance.
    ref_conv = lax.conv_general_dilated(
        x, w, window_strides=(1, 1, 1), padding=[(pad, pad)] * 3,
        dimension_numbers=("NCDHW", "OIDHW", "NCDHW"))
    mu = jnp.mean(ref_conv, axis=(2, 3, 4), keepdims=True)
    var = jnp.mean((ref_conv - mu) ** 2, axis=(2, 3, 4), keepdims=True)
    ref = (ref_conv - mu) * lax.rsqrt(var + 1e-5)
    ref = ref * gamma[None, :, None, None, None] + beta[None, :, None, None, None]
    ref = jnp.maximum(ref, 0.0)

    err = float(jnp.max(jnp.abs(y - ref)))
    assert err < 0.15, f"max abs err too large: {err}"

    print("KERNEL_OK")
</pallas_src>

<mosaic_0001>
module attributes {stable_mosaic.version = 11 : i64} {
  func.func @_in_relu_kernel(%arg0: i32, %arg1: i32, %arg2: memref<1x16x8x288xf32, #tpu.memory_space<vmem>>, %arg3: memref<8x1xf32, #tpu.memory_space<vmem>>, %arg4: memref<8x1xf32, #tpu.memory_space<vmem>>, %arg5: memref<1x288xf32, #tpu.memory_space<vmem>>, %arg6: memref<1x16x8x288xf32, #tpu.memory_space<vmem>>) attributes {dimension_semantics = [#tpu.dimension_semantics<parallel>, #tpu.dimension_semantics<parallel>], iteration_bounds = array<i64: 2, 1>, scalar_prefetch = 0 : i64, scratch_operands = 0 : i64, tpu.core_type = #tpu.core_type<tc>, window_params = [{transform_indices = @transform_0, window_bounds = array<i64: 1, 16, 8, 288>}, {transform_indices = @transform_1, window_bounds = array<i64: 8, 1>}, {transform_indices = @transform_2, window_bounds = array<i64: 8, 1>}, {pipeline_mode = #tpu.pipeline_mode<synchronous>, transform_indices = @transform_3, window_bounds = array<i64: 1, 288>}, {transform_indices = @transform_4, window_bounds = array<i64: 1, 16, 8, 288>}]} {
    %c0 = arith.constant 0 : index
    %c0_0 = arith.constant 0 : index
    %c0_1 = arith.constant 0 : index
    %c0_2 = arith.constant 0 : index
    %0 = vector.load %arg2[%c0, %c0_0, %c0_1, %c0_2] : memref<1x16x8x288xf32, #tpu.memory_space<vmem>>, vector<1x16x8x288xf32>
    %1 = vector.shape_cast %0 : vector<1x16x8x288xf32> to vector<16x8x288xf32>
    %c0_3 = arith.constant 0 : index
    %c0_4 = arith.constant 0 : index
    %2 = vector.load %arg5[%c0_3, %c0_4] : memref<1x288xf32, #tpu.memory_space<vmem>>, vector<1x288xf32>
    %3 = vector.shape_cast %2 : vector<1x288xf32> to vector<1x1x288xf32>
    %4 = vector.broadcast %3 : vector<1x1x288xf32> to vector<16x8x288xf32>
    %5 = arith.mulf %1, %4 : vector<16x8x288xf32>
    %cst = arith.constant dense<0.000000e+00> : vector<8xf32>
    %6 = vector.multi_reduction <add>, %5, %cst [0, 2] : vector<16x8x288xf32> to vector<8xf32>
    %7 = vector.shape_cast %6 : vector<8xf32> to vector<1x8x1xf32>
    %cst_5 = arith.constant 2.44140625E-4 : f32
    %8 = vector.broadcast %cst_5 : f32 to vector<1x8x1xf32>
    %9 = arith.mulf %7, %8 : vector<1x8x1xf32>
    %10 = vector.broadcast %9 : vector<1x8x1xf32> to vector<16x8x288xf32>
    %11 = arith.subf %1, %10 : vector<16x8x288xf32>
    %12 = vector.broadcast %3 : vector<1x1x288xf32> to vector<16x8x288xf32>
    %13 = arith.mulf %11, %12 : vector<16x8x288xf32>
    %14 = arith.mulf %13, %13 : vector<16x8x288xf32>
    %cst_6 = arith.constant dense<0.000000e+00> : vector<8xf32>
    %15 = vector.multi_reduction <add>, %14, %cst_6 [0, 2] : vector<16x8x288xf32> to vector<8xf32>
    %16 = vector.shape_cast %15 : vector<8xf32> to vector<1x8x1xf32>
    %cst_7 = arith.constant 2.44140625E-4 : f32
    %17 = vector.broadcast %cst_7 : f32 to vector<1x8x1xf32>
    %18 = arith.mulf %16, %17 : vector<1x8x1xf32>
    %c0_8 = arith.constant 0 : index
    %c0_9 = arith.constant 0 : index
    %19 = vector.load %arg3[%c0_8, %c0_9] : memref<8x1xf32, #tpu.memory_space<vmem>>, vector<8x1xf32>
    %20 = vector.shape_cast %19 : vector<8x1xf32> to vector<1x8x1xf32>
    %c0_10 = arith.constant 0 : index
    %c0_11 = arith.constant 0 : index
    %21 = vector.load %arg4[%c0_10, %c0_11] : memref<8x1xf32, #tpu.memory_space<vmem>>, vector<8x1xf32>
    %22 = vector.shape_cast %21 : vector<8x1xf32> to vector<1x8x1xf32>
    %23 = vector.broadcast %9 : vector<1x8x1xf32> to vector<16x8x288xf32>
    %24 = arith.subf %1, %23 : vector<16x8x288xf32>
    %cst_12 = arith.constant 9.99999974E-6 : f32
    %25 = vector.broadcast %cst_12 : f32 to vector<1x8x1xf32>
    %26 = arith.addf %18, %25 : vector<1x8x1xf32>
    %27 = math.rsqrt %26 : vector<1x8x1xf32>
    %28 = vector.broadcast %27 : vector<1x8x1xf32> to vector<16x8x288xf32>
    %29 = arith.mulf %24, %28 : vector<16x8x288xf32>
    %30 = vector.broadcast %20 : vector<1x8x1xf32> to vector<16x8x288xf32>
    %31 = arith.mulf %29, %30 : vector<16x8x288xf32>
    %32 = vector.broadcast %22 : vector<1x8x1xf32> to vector<16x8x288xf32>
    %33 = arith.addf %31, %32 : vector<16x8x288xf32>
    %cst_13 = arith.constant 0.000000e+00 : f32
    %34 = vector.broadcast %cst_13 : f32 to vector<16x8x288xf32>
    %35 = arith.maximumf %33, %34 : vector<16x8x288xf32>
    %c0_14 = arith.constant 0 : index
    %c0_15 = arith.constant 0 : index
    %c0_16 = arith.constant 0 : index
    %c0_17 = arith.constant 0 : index
    %36 = vector.load %arg6[%c0_14, %c0_15, %c0_16, %c0_17] : memref<1x16x8x288xf32, #tpu.memory_space<vmem>>, vector<1x16x8x288xf32>
    %37 = vector.shape_cast %36 : vector<1x16x8x288xf32> to vector<16x8x288xf32>
    %38 = vector.shape_cast %35 : vector<16x8x288xf32> to vector<1x16x8x288xf32>
    tpu.vector_store %arg6[%c0_14, %c0_15, %c0_16, %c0_17], %38 {strides = array<i32>} : memref<1x16x8x288xf32, #tpu.memory_space<vmem>>, vector<1x16x8x288xf32>,
    return
  }
  func.func @transform_0(%arg0: i32, %arg1: i32) -> (i32, i32, i32, i32) {
    %c0_i32 = arith.constant 0 : i32
    %c0_i32_0 = arith.constant 0 : i32
    %c0_i32_1 = arith.constant 0 : i32
    return %arg0, %c0_i32, %arg1, %c0_i32_0 : i32, i32, i32, i32
  }
  func.func @transform_1(%arg0: i32, %arg1: i32) -> (i32, i32) {
    %c0_i32 = arith.constant 0 : i32
    %c0_i32_0 = arith.constant 0 : i32
    return %arg1, %c0_i32 : i32, i32
  }
  func.func @transform_2(%arg0: i32, %arg1: i32) -> (i32, i32) {
    %c0_i32 = arith.constant 0 : i32
    %c0_i32_0 = arith.constant 0 : i32
    return %arg1, %c0_i32 : i32, i32
  }
  func.func @transform_3(%arg0: i32, %arg1: i32) -> (i32, i32) {
    %c0_i32 = arith.constant 0 : i32
    %c0_i32_0 = arith.constant 0 : i32
    %c0_i32_1 = arith.constant 0 : i32
    return %c0_i32, %c0_i32_0 : i32, i32
  }
  func.func @transform_4(%arg0: i32, %arg1: i32) -> (i32, i32, i32, i32) {
    %c0_i32 = arith.constant 0 : i32
    %c0_i32_0 = arith.constant 0 : i32
    %c0_i32_1 = arith.constant 0 : i32
    return %arg0, %c0_i32, %arg1, %c0_i32_0 : i32, i32, i32, i32
  }
}

module attributes {stable_mosaic.version = 11 : i64} {
  func.func @_conv3d_kernel(%arg0: i32, %arg1: i32, %arg2: memref<1x1x8x362xbf16, #tpu.memory_space<vmem>>, %arg3: memref<1x1x8x362xbf16, #tpu.memory_space<vmem>>, %arg4: memref<1x1x8x362xbf16, #tpu.memory_space<vmem>>, %arg5: memref<1x1x8x362xbf16, #tpu.memory_space<vmem>>, %arg6: memref<1x1x8x362xbf16, #tpu.memory_space<vmem>>, %arg7: memref<1x1x8x362xbf16, #tpu.memory_space<vmem>>, %arg8: memref<1x1x8x362xbf16, #tpu.memory_space<vmem>>, %arg9: memref<1x1x8x362xbf16, #tpu.memory_space<vmem>>, %arg10: memref<1x1x8x362xbf16, #tpu.memory_space<vmem>>, %arg11: memref<1x1x8x362xbf16, #tpu.memory_space<vmem>>, %arg12: memref<3x8x72xbf16, #tpu.memory_space<vmem>>, %arg13: memref<1x8x8x288xf32, #tpu.memory_space<vmem>>) attributes {dimension_semantics = [#tpu.dimension_semantics<parallel>, #tpu.dimension_semantics<parallel>], iteration_bounds = array<i64: 2, 2>, scalar_prefetch = 0 : i64, scratch_operands = 0 : i64, tpu.core_type = #tpu.core_type<tc>, window_params = [{transform_indices = @transform_0, window_bounds = array<i64: 1, 1, 8, 362>}, {transform_indices = @transform_1, window_bounds = array<i64: 1, 1, 8, 362>}, {transform_indices = @transform_2, window_bounds = array<i64: 1, 1, 8, 362>}, {transform_indices = @transform_3, window_bounds = array<i64: 1, 1, 8, 362>}, {transform_indices = @transform_4, window_bounds = array<i64: 1, 1, 8, 362>}, {transform_indices = @transform_5, window_bounds = array<i64: 1, 1, 8, 362>}, {transform_indices = @transform_6, window_bounds = array<i64: 1, 1, 8, 362>}, {transform_indices = @transform_7, window_bounds = array<i64: 1, 1, 8, 362>}, {transform_indices = @transform_8, window_bounds = array<i64: 1, 1, 8, 362>}, {transform_indices = @transform_9, window_bounds = array<i64: 1, 1, 8, 362>}, {pipeline_mode = #tpu.pipeline_mode<synchronous>, transform_indices = @transform_10, window_bounds = array<i64: 3, 8, 72>}, {transform_indices = @transform_11, window_bounds = array<i64: 1, 8, 8, 288>}]} {
    %c0 = arith.constant 0 : index
    %c0_0 = arith.constant 0 : index
    %c0_1 = arith.constant 0 : index
    %c0_2 = arith.constant 0 : index
    %0 = vector.load %arg2[%c0, %c0_0, %c0_1, %c0_2] : memref<1x1x8x362xbf16, #tpu.memory_space<vmem>>, vector<1x1x8x362xbf16>
    %1 = vector.shape_cast %0 : vector<1x1x8x362xbf16> to vector<8x362xbf16>
    %2 = arith.extf %1 : vector<8x362xbf16> to vector<8x362xf32>
    %c0_3 = arith.constant 0 : index
    %c0_4 = arith.constant 0 : index
    %c0_5 = arith.constant 0 : index
    %c0_6 = arith.constant 0 : index
    %3 = vector.load %arg3[%c0_3, %c0_4, %c0_5, %c0_6] : memref<1x1x8x362xbf16, #tpu.memory_space<vmem>>, vector<1x1x8x362xbf16>
    %4 = vector.shape_cast %3 : vector<1x1x8x362xbf16> to vector<8x362xbf16>
    %5 = arith.extf %4 : vector<8x362xbf16> to vector<8x362xf32>
    %c0_7 = arith.constant 0 : index
    %c0_8 = arith.constant 0 : index
    %c0_9 = arith.constant 0 : index
    %c0_10 = arith.constant 0 : index
    %6 = vector.load %arg4[%c0_7, %c0_8, %c0_9, %c0_10] : memref<1x1x8x362xbf16, #tpu.memory_space<vmem>>, vector<1x1x8x362xbf16>
    %7 = vector.shape_cast %6 : vector<1x1x8x362xbf16> to vector<8x362xbf16>
    %8 = arith.extf %7 : vector<8x362xbf16> to vector<8x362xf32>
    %c0_11 = arith.constant 0 : index
    %c0_12 = arith.constant 0 : index
    %c0_13 = arith.constant 0 : index
    %c0_14 = arith.constant 0 : index
    %9 = vector.load %arg5[%c0_11, %c0_12, %c0_13, %c0_14] : memref<1x1x8x362xbf16, #tpu.memory_space<vmem>>, vector<1x1x8x362xbf16>
    %10 = vector.shape_cast %9 : vector<1x1x8x362xbf16> to vector<8x362xbf16>
    %11 = arith.extf %10 : vector<8x362xbf16> to vector<8x362xf32>
    %c0_15 = arith.constant 0 : index
    %c0_16 = arith.constant 0 : index
    %c0_17 = arith.constant 0 : index
    %c0_18 = arith.constant 0 : index
    %12 = vector.load %arg6[%c0_15, %c0_16, %c0_17, %c0_18] : memref<1x1x8x362xbf16, #tpu.memory_space<vmem>>, vector<1x1x8x362xbf16>
    %13 = vector.shape_cast %12 : vector<1x1x8x362xbf16> to vector<8x362xbf16>
    %14 = arith.extf %13 : vector<8x362xbf16> to vector<8x362xf32>
    %c0_19 = arith.constant 0 : index
    %c0_20 = arith.constant 0 : index
    %c0_21 = arith.constant 0 : index
    %c0_22 = arith.constant 0 : index
    %15 = vector.load %arg7[%c0_19, %c0_20, %c0_21, %c0_22] : memref<1x1x8x362xbf16, #tpu.memory_space<vmem>>, vector<1x1x8x362xbf16>
    %16 = vector.shape_cast %15 : vector<1x1x8x362xbf16> to vector<8x362xbf16>
    %17 = arith.extf %16 : vector<8x362xbf16> to vector<8x362xf32>
    %c0_23 = arith.constant 0 : index
    %c0_24 = arith.constant 0 : index
    %c0_25 = arith.constant 0 : index
    %c0_26 = arith.constant 0 : index
    %18 = vector.load %arg8[%c0_23, %c0_24, %c0_25, %c0_26] : memref<1x1x8x362xbf16, #tpu.memory_space<vmem>>, vector<1x1x8x362xbf16>
    %19 = vector.shape_cast %18 : vector<1x1x8x362xbf16> to vector<8x362xbf16>
    %20 = arith.extf %19 : vector<8x362xbf16> to vector<8x362xf32>
    %c0_27 = arith.constant 0 : index
    %c0_28 = arith.constant 0 : index
    %c0_29 = arith.constant 0 : index
    %c0_30 = arith.constant 0 : index
    %21 = vector.load %arg9[%c0_27, %c0_28, %c0_29, %c0_30] : memref<1x1x8x362xbf16, #tpu.memory_space<vmem>>, vector<1x1x8x362xbf16>
    %22 = vector.shape_cast %21 : vector<1x1x8x362xbf16> to vector<8x362xbf16>
    %23 = arith.extf %22 : vector<8x362xbf16> to vector<8x362xf32>
    %c0_31 = arith.constant 0 : index
    %c0_32 = arith.constant 0 : index
    %c0_33 = arith.constant 0 : index
    %c0_34 = arith.constant 0 : index
    %24 = vector.load %arg10[%c0_31, %c0_32, %c0_33, %c0_34] : memref<1x1x8x362xbf16, #tpu.memory_space<vmem>>, vector<1x1x8x362xbf16>
    %25 = vector.shape_cast %24 : vector<1x1x8x362xbf16> to vector<8x362xbf16>
    %26 = arith.extf %25 : vector<8x362xbf16> to vector<8x362xf32>
    %c0_35 = arith.constant 0 : index
    %c0_36 = arith.constant 0 : index
    %c0_37 = arith.constant 0 : index
    %c0_38 = arith.constant 0 : index
    %27 = vector.load %arg11[%c0_35, %c0_36, %c0_37, %c0_38] : memref<1x1x8x362xbf16, #tpu.memory_space<vmem>>, vector<1x1x8x362xbf16>
    %28 = vector.shape_cast %27 : vector<1x1x8x362xbf16> to vector<8x362xbf16>
    %29 = arith.extf %28 : vector<8x362xbf16> to vector<8x362xf32>
    %30 = vector.extract_strided_slice %2 {offsets = [0, 0], sizes = [8, 288], strides = [1, 1]} : vector<8x362xf32> to vector<8x288xf32>
    %31 = vector.extract_strided_slice %2 {offsets = [0, 1], sizes = [8, 288], strides = [1, 1]} : vector<8x362xf32> to vector<8x288xf32>
    %32 = vector.extract_strided_slice %2 {offsets = [0, 2], sizes = [8, 288], strides = [1, 1]} : vector<8x362xf32> to vector<8x288xf32>
    %33 = vector.extract_strided_slice %2 {offsets = [0, 18], sizes = [8, 288], strides = [1, 1]} : vector<8x362xf32> to vector<8x288xf32>
    %34 = vector.extract_strided_slice %2 {offsets = [0, 19], sizes = [8, 288], strides = [1, 1]} : vector<8x362xf32> to vector<8x288xf32>
    %35 = vector.extract_strided_slice %2 {offsets = [0, 20], sizes = [8, 288], strides = [1, 1]} : vector<8x362xf32> to vector<8x288xf32>
    %36 = vector.extract_strided_slice %2 {offsets = [0, 36], sizes = [8, 288], strides = [1, 1]} : vector<8x362xf32> to vector<8x288xf32>
    %37 = vector.extract_strided_slice %2 {offsets = [0, 37], sizes = [8, 288], strides = [1, 1]} : vector<8x362xf32> to vector<8x288xf32>
    %38 = vector.extract_strided_slice %2 {offsets = [0, 38], sizes = [8, 288], strides = [1, 1]} : vector<8x362xf32> to vector<8x288xf32>
    %39 = tpu.concatenate %30, %31, %32, %33, %34, %35, %36, %37, %38 in 0 : vector<8x288xf32>, vector<8x288xf32>, vector<8x288xf32>, vector<8x288xf32>, vector<8x288xf32>, vector<8x288xf32>, vector<8x288xf32>, vector<8x288xf32>, vector<8x288xf32> -> vector<72x288xf32>
    %40 = arith.truncf %39 : vector<72x288xf32> to vector<72x288xbf16>
    %c0_39 = arith.constant 0 : index
    %c0_40 = arith.constant 0 : index
    %c0_41 = arith.constant 0 : index
    %41 = vector.load %arg12[%c0_39, %c0_40, %c0_41] : memref<3x8x72xbf16, #tpu.memory_space<vmem>>, vector<1x8x72xbf16>
    %42 = vector.shape_cast %41 : vector<1x8x72xbf16> to vector<8x72xbf16>
    %cst = arith.constant dense<0.000000e+00> : vector<8x288xf32>
    %43 = tpu.matmul %42, %40, %cst {dimension_numbers = #tpu.dot_dimension_numbers<[1], [0], [0], [1], [0, 0, 1, 1], [], []>} : vector<8x72xbf16>, vector<72x288xbf16>, vector<8x288xf32> -> vector<8x288xf32>
    %44 = vector.extract_strided_slice %5 {offsets = [0, 0], sizes = [8, 288], strides = [1, 1]} : vector<8x362xf32> to vector<8x288xf32>
    %45 = vector.extract_strided_slice %5 {offsets = [0, 1], sizes = [8, 288], strides = [1, 1]} : vector<8x362xf32> to vector<8x288xf32>
    %46 = vector.extract_strided_slice %5 {offsets = [0, 2], sizes = [8, 288], strides = [1, 1]} : vector<8x362xf32> to vector<8x288xf32>
    %47 = vector.extract_strided_slice %5 {offsets = [0, 18], sizes = [8, 288], strides = [1, 1]} : vector<8x362xf32> to vector<8x288xf32>
    %48 = vector.extract_strided_slice %5 {offsets = [0, 19], sizes = [8, 288], strides = [1, 1]} : vector<8x362xf32> to vector<8x288xf32>
    %49 = vector.extract_strided_slice %5 {offsets = [0, 20], sizes = [8, 288], strides = [1, 1]} : vector<8x362xf32> to vector<8x288xf32>
    %50 = vector.extract_strided_slice %5 {offsets = [0, 36], sizes = [8, 288], strides = [1, 1]} : vector<8x362xf32> to vector<8x288xf32>
    %51 = vector.extract_strided_slice %5 {offsets = [0, 37], sizes = [8, 288], strides = [1, 1]} : vector<8x362xf32> to vector<8x288xf32>
    %52 = vector.extract_strided_slice %5 {offsets = [0, 38], sizes = [8, 288], strides = [1, 1]} : vector<8x362xf32> to vector<8x288xf32>
    %53 = tpu.concatenate %44, %45, %46, %47, %48, %49, %50, %51, %52 in 0 : vector<8x288xf32>, vector<8x288xf32>, vector<8x288xf32>, vector<8x288xf32>, vector<8x288xf32>, vector<8x288xf32>, vector<8x288xf32>, vector<8x288xf32>, vector<8x288xf32> -> vector<72x288xf32>
    %54 = arith.truncf %53 : vector<72x288xf32> to vector<72x288xbf16>
    %c1 = arith.constant 1 : index
    %c0_42 = arith.constant 0 : index
    %c0_43 = arith.constant 0 : index
    %55 = vector.load %arg12[%c1, %c0_42, %c0_43] : memref<3x8x72xbf16, #tpu.memory_space<vmem>>, vector<1x8x72xbf16>
    %56 = vector.shape_cast %55 : vector<1x8x72xbf16> to vector<8x72xbf16>
    %cst_44 = arith.constant dense<0.000000e+00> : vector<8x288xf32>
    %57 = tpu.matmul %56, %54, %cst_44 {dimension_numbers = #tpu.dot_dimension_numbers<[1], [0], [0], [1], [0, 0, 1, 1], [], []>} : vector<8x72xbf16>, vector<72x288xbf16>, vector<8x288xf32> -> vector<8x288xf32>
    %58 = arith.addf %43, %57 : vector<8x288xf32>
    %59 = vector.extract_strided_slice %8 {offsets = [0, 0], sizes = [8, 288], strides = [1, 1]} : vector<8x362xf32> to vector<8x288xf32>
    %60 = vector.extract_strided_slice %8 {offsets = [0, 1], sizes = [8, 288], strides = [1, 1]} : vector<8x362xf32> to vector<8x288xf32>
    %61 = vector.extract_strided_slice %8 {offsets = [0, 2], sizes = [8, 288], strides = [1, 1]} : vector<8x362xf32> to vector<8x288xf32>
    %62 = vector.extract_strided_slice %8 {offsets = [0, 18], sizes = [8, 288], strides = [1, 1]} : vector<8x362xf32> to vector<8x288xf32>
    %63 = vector.extract_strided_slice %8 {offsets = [0, 19], sizes = [8, 288], strides = [1, 1]} : vector<8x362xf32> to vector<8x288xf32>
    %64 = vector.extract_strided_slice %8 {offsets = [0, 20], sizes = [8, 288], strides = [1, 1]} : vector<8x362xf32> to vector<8x288xf32>
    %65 = vector.extract_strided_slice %8 {offsets = [0, 36], sizes = [8, 288], strides = [1, 1]} : vector<8x362xf32> to vector<8x288xf32>
    %66 = vector.extract_strided_slice %8 {offsets = [0, 37], sizes = [8, 288], strides = [1, 1]} : vector<8x362xf32> to vector<8x288xf32>
    %67 = vector.extract_strided_slice %8 {offsets = [0, 38], sizes = [8, 288], strides = [1, 1]} : vector<8x362xf32> to vector<8x288xf32>
    %68 = tpu.concatenate %59, %60, %61, %62, %63, %64, %65, %66, %67 in 0 : vector<8x288xf32>, vector<8x288xf32>, vector<8x288xf32>, vector<8x288xf32>, vector<8x288xf32>, vector<8x288xf32>, vector<8x288xf32>, vector<8x288xf32>, vector<8x288xf32> -> vector<72x288xf32>
    %69 = arith.truncf %68 : vector<72x288xf32> to vector<72x288xbf16>
    %c2 = arith.constant 2 : index
    %c0_45 = arith.constant 0 : index
    %c0_46 = arith.constant 0 : index
    %70 = vector.load %arg12[%c2, %c0_45, %c0_46] : memref<3x8x72xbf16, #tpu.memory_space<vmem>>, vector<1x8x72xbf16>
    %71 = vector.shape_cast %70 : vector<1x8x72xbf16> to vector<8x72xbf16>
    %cst_47 = arith.constant dense<0.000000e+00> : vector<8x288xf32>
    %72 = tpu.matmul %71, %69, %cst_47 {dimension_numbers = #tpu.dot_dimension_numbers<[1], [0], [0], [1], [0, 0, 1, 1], [], []>} : vector<8x72xbf16>, vector<72x288xbf16>, vector<8x288xf32> -> vector<8x288xf32>
    %73 = arith.addf %58, %72 : vector<8x288xf32>
    %c0_48 = arith.constant 0 : index
    %c0_49 = arith.constant 0 : index
    %c0_50 = arith.constant 0 : index
    %c0_51 = arith.constant 0 : index
    %74 = vector.load %arg13[%c0_48, %c0_49, %c0_50, %c0_51] : memref<1x8x8x288xf32, #tpu.memory_space<vmem>>, vector<1x1x8x288xf32>
    %75 = vector.shape_cast %74 : vector<1x1x8x288xf32> to vector<8x288xf32>
    %76 = vector.shape_cast %73 : vector<8x288xf32> to vector<1x1x8x288xf32>
    tpu.vector_store %arg13[%c0_48, %c0_49, %c0_50, %c0_51], %76 {strides = array<i32>} : memref<1x8x8x288xf32, #tpu.memory_space<vmem>>, vector<1x1x8x288xf32>,
    %77 = vector.extract_strided_slice %5 {offsets = [0, 0], sizes = [8, 288], strides = [1, 1]} : vector<8x362xf32> to vector<8x288xf32>
    %78 = vector.extract_strided_slice %5 {offsets = [0, 1], sizes = [8, 288], strides = [1, 1]} : vector<8x362xf32> to vector<8x288xf32>
    %79 = vector.extract_strided_slice %5 {offsets = [0, 2], sizes = [8, 288], strides = [1, 1]} : vector<8x362xf32> to vector<8x288xf32>
    %80 = vector.extract_strided_slice %5 {offsets = [0, 18], sizes = [8, 288], strides = [1, 1]} : vector<8x362xf32> to vector<8x288xf32>
    %81 = vector.extract_strided_slice %5 {offsets = [0, 19], sizes = [8, 288], strides = [1, 1]} : vector<8x362xf32> to vector<8x288xf32>
    %82 = vector.extract_strided_slice %5 {offsets = [0, 20], sizes = [8, 288], strides = [1, 1]} : vector<8x362xf32> to vector<8x288xf32>
    %83 = vector.extract_strided_slice %5 {offsets = [0, 36], sizes = [8, 288], strides = [1, 1]} : vector<8x362xf32> to vector<8x288xf32>
    %84 = vector.extract_strided_slice %5 {offsets = [0, 37], sizes = [8, 288], strides = [1, 1]} : vector<8x362xf32> to vector<8x288xf32>
    %85 = vector.extract_strided_slice %5 {offsets = [0, 38], sizes = [8, 288], strides = [1, 1]} : vector<8x362xf32> to vector<8x288xf32>
    %86 = tpu.concatenate %77, %78, %79, %80, %81, %82, %83, %84, %85 in 0 : vector<8x288xf32>, vector<8x288xf32>, vector<8x288xf32>, vector<8x288xf32>, vector<8x288xf32>, vector<8x288xf32>, vector<8x288xf32>, vector<8x288xf32>, vector<8x288xf32> -> vector<72x288xf32>
    %87 = arith.truncf %86 : vector<72x288xf32> to vector<72x288xbf16>
    %c0_52 = arith.constant 0 : index
    %c0_53 = arith.constant 0 : index
    %c0_54 = arith.constant 0 : index
    %88 = vector.load %arg12[%c0_52, %c0_53, %c0_54] : memref<3x8x72xbf16, #tpu.memory_space<vmem>>, vector<1x8x72xbf16>
    %89 = vector.shape_cast %88 : vector<1x8x72xbf16> to vector<8x72xbf16>
    %cst_55 = arith.constant dense<0.000000e+00> : vector<8x288xf32>
    %90 = tpu.matmul %89, %87, %cst_55 {dimension_numbers = #tpu.dot_dimension_numbers<[1], [0], [0], [1], [0, 0, 1, 1], [], []>} : vector<8x72xbf16>, vector<72x288xbf16>, vector<8x288xf32> -> vector<8x288xf32>
    %91 = vector.extract_strided_slice %8 {offsets = [0, 0], sizes = [8, 288], strides = [1, 1]} : vector<8x362xf32> to vector<8x288xf32>
    %92 = vector.extract_strided_slice %8 {offsets = [0, 1], sizes = [8, 288], strides = [1, 1]} : vector<8x362xf32> to vector<8x288xf32>
    %93 = vector.extract_strided_slice %8 {offsets = [0, 2], sizes = [8, 288], strides = [1, 1]} : vector<8x362xf32> to vector<8x288xf32>
    %94 = vector.extract_strided_slice %8 {offsets = [0, 18], sizes = [8, 288], strides = [1, 1]} : vector<8x362xf32> to vector<8x288xf32>
    %95 = vector.extract_strided_slice %8 {offsets = [0, 19], sizes = [8, 288], strides = [1, 1]} : vector<8x362xf32> to vector<8x288xf32>
    %96 = vector.extract_strided_slice %8 {offsets = [0, 20], sizes = [8, 288], strides = [1, 1]} : vector<8x362xf32> to vector<8x288xf32>
    %97 = vector.extract_strided_slice %8 {offsets = [0, 36], sizes = [8, 288], strides = [1, 1]} : vector<8x362xf32> to vector<8x288xf32>
    %98 = vector.extract_strided_slice %8 {offsets = [0, 37], sizes = [8, 288], strides = [1, 1]} : vector<8x362xf32> to vector<8x288xf32>
    %99 = vector.extract_strided_slice %8 {offsets = [0, 38], sizes = [8, 288], strides = [1, 1]} : vector<8x362xf32> to vector<8x288xf32>
    %100 = tpu.concatenate %91, %92, %93, %94, %95, %96, %97, %98, %99 in 0 : vector<8x288xf32>, vector<8x288xf32>, vector<8x288xf32>, vector<8x288xf32>, vector<8x288xf32>, vector<8x288xf32>, vector<8x288xf32>, vector<8x288xf32>, vector<8x288xf32> -> vector<72x288xf32>
    %101 = arith.truncf %100 : vector<72x288xf32> to vector<72x288xbf16>
    %c1_56 = arith.constant 1 : index
    %c0_57 = arith.constant 0 : index
    %c0_58 = arith.constant 0 : index
    %102 = vector.load %arg12[%c1_56, %c0_57, %c0_58] : memref<3x8x72xbf16, #tpu.memory_space<vmem>>, vector<1x8x72xbf16>
    %103 = vector.shape_cast %102 : vector<1x8x72xbf16> to vector<8x72xbf16>
    %cst_59 = arith.constant dense<0.000000e+00> : vector<8x288xf32>
    %104 = tpu.matmul %103, %101, %cst_59 {dimension_numbers = #tpu.dot_dimension_numbers<[1], [0], [0], [1], [0, 0, 1, 1], [], []>} : vector<8x72xbf16>, vector<72x288xbf16>, vector<8x288xf32> -> vector<8x288xf32>
    %105 = arith.addf %90, %104 : vector<8x288xf32>
    %106 = vector.extract_strided_slice %11 {offsets = [0, 0], sizes = [8, 288], strides = [1, 1]} : vector<8x362xf32> to vector<8x288xf32>
    %107 = vector.extract_strided_slice %11 {offsets = [0, 1], sizes = [8, 288], strides = [1, 1]} : vector<8x362xf32> to vector<8x288xf32>
    %108 = vector.extract_strided_slice %11 {offsets = [0, 2], sizes = [8, 288], strides = [1, 1]} : vector<8x362xf32> to vector<8x288xf32>
    %109 = vector.extract_strided_slice %11 {offsets = [0, 18], sizes = [8, 288], strides = [1, 1]} : vector<8x362xf32> to vector<8x288xf32>
    %110 = vector.extract_strided_slice %11 {offsets = [0, 19], sizes = [8, 288], strides = [1, 1]} : vector<8x362xf32> to vector<8x288xf32>
    %111 = vector.extract_strided_slice %11 {offsets = [0, 20], sizes = [8, 288], strides = [1, 1]} : vector<8x362xf32> to vector<8x288xf32>
    %112 = vector.extract_strided_slice %11 {offsets = [0, 36], sizes = [8, 288], strides = [1, 1]} : vector<8x362xf32> to vector<8x288xf32>
    %113 = vector.extract_strided_slice %11 {offsets = [0, 37], sizes = [8, 288], strides = [1, 1]} : vector<8x362xf32> to vector<8x288xf32>
    %114 = vector.extract_strided_slice %11 {offsets = [0, 38], sizes = [8, 288], strides = [1, 1]} : vector<8x362xf32> to vector<8x288xf32>
    %115 = tpu.concatenate %106, %107, %108, %109, %110, %111, %112, %113, %114 in 0 : vector<8x288xf32>, vector<8x288xf32>, vector<8x288xf32>, vector<8x288xf32>, vector<8x288xf32>, vector<8x288xf32>, vector<8x288xf32>, vector<8x288xf32>, vector<8x288xf32> -> vector<72x288xf32>
    %116 = arith.truncf %115 : vector<72x288xf32> to vector<72x288xbf16>
    %c2_60 = arith.constant 2 : index
    %c0_61 = arith.constant 0 : index
    %c0_62 = arith.constant 0 : index
    %117 = vector.load %arg12[%c2_60, %c0_61, %c0_62] : memref<3x8x72xbf16, #tpu.memory_space<vmem>>, vector<1x8x72xbf16>
    %118 = vector.shape_cast %117 : vector<1x8x72xbf16> to vector<8x72xbf16>
    %cst_63 = arith.constant dense<0.000000e+00> : vector<8x288xf32>
    %119 = tpu.matmul %118, %116, %cst_63 {dimension_numbers = #tpu.dot_dimension_numbers<[1], [0], [0], [1], [0, 0, 1, 1], [], []>} : vector<8x72xbf16>, vector<72x288xbf16>, vector<8x288xf32> -> vector<8x288xf32>
    %120 = arith.addf %105, %119 : vector<8x288xf32>
    %c0_64 = arith.constant 0 : index
    %c1_65 = arith.constant 1 : index
    %c0_66 = arith.constant 0 : index
    %c0_67 = arith.constant 0 : index
    %121 = vector.load %arg13[%c0_64, %c1_65, %c0_66, %c0_67] : memref<1x8x8x288xf32, #tpu.memory_space<vmem>>, vector<1x1x8x288xf32>
    %122 = vector.shape_cast %121 : vector<1x1x8x288xf32> to vector<8x288xf32>
    %123 = vector.shape_cast %120 : vector<8x288xf32> to vector<1x1x8x288xf32>
    tpu.vector_store %arg13[%c0_64, %c1_65, %c0_66, %c0_67], %123 {strides = array<i32>} : memref<1x8x8x288xf32, #tpu.memory_space<vmem>>, vector<1x1x8x288xf32>,
    %124 = vector.extract_strided_slice %8 {offsets = [0, 0], sizes = [8, 288], strides = [1, 1]} : vector<8x362xf32> to vector<8x288xf32>
    %125 = vector.extract_strided_slice %8 {offsets = [0, 1], sizes = [8, 288], strides = [1, 1]} : vector<8x362xf32> to vector<8x288xf32>
    %126 = vector.extract_strided_slice %8 {offsets = [0, 2], sizes = [8, 288], strides = [1, 1]} : vector<8x362xf32> to vector<8x288xf32>
    %127 = vector.extract_strided_slice %8 {offsets = [0, 18], sizes = [8, 288], strides = [1, 1]} : vector<8x362xf32> to vector<8x288xf32>
    %128 = vector.extract_strided_slice %8 {offsets = [0, 19], sizes = [8, 288], strides = [1, 1]} : vector<8x362xf32> to vector<8x288xf32>
    %129 = vector.extract_strided_slice %8 {offsets = [0, 20], sizes = [8, 288], strides = [1, 1]} : vector<8x362xf32> to vector<8x288xf32>
    %130 = vector.extract_strided_slice %8 {offsets = [0, 36], sizes = [8, 288], strides = [1, 1]} : vector<8x362xf32> to vector<8x288xf32>
    %131 = vector.extract_strided_slice %8 {offsets = [0, 37], sizes = [8, 288], strides = [1, 1]} : vector<8x362xf32> to vector<8x288xf32>
    %132 = vector.extract_strided_slice %8 {offsets = [0, 38], sizes = [8, 288], strides = [1, 1]} : vector<8x362xf32> to vector<8x288xf32>
    %133 = tpu.concatenate %124, %125, %126, %127, %128, %129, %130, %131, %132 in 0 : vector<8x288xf32>, vector<8x288xf32>, vector<8x288xf32>, vector<8x288xf32>, vector<8x288xf32>, vector<8x288xf32>, vector<8x288xf32>, vector<8x288xf32>, vector<8x288xf32> -> vector<72x288xf32>
    %134 = arith.truncf %133 : vector<72x288xf32> to vector<72x288xbf16>
    %c0_68 = arith.constant 0 : index
    %c0_69 = arith.constant 0 : index
    %c0_70 = arith.constant 0 : index
    %135 = vector.load %arg12[%c0_68, %c0_69, %c0_70] : memref<3x8x72xbf16, #tpu.memory_space<vmem>>, vector<1x8x72xbf16>
    %136 = vector.shape_cast %135 : vector<1x8x72xbf16> to vector<8x72xbf16>
    %cst_71 = arith.constant dense<0.000000e+00> : vector<8x288xf32>
    %137 = tpu.matmul %136, %134, %cst_71 {dimension_numbers = #tpu.dot_dimension_numbers<[1], [0], [0], [1], [0, 0, 1, 1], [], []>} : vector<8x72xbf16>, vector<72x288xbf16>, vector<8x288xf32> -> vector<8x288xf32>
    %138 = vector.extract_strided_slice %11 {offsets = [0, 0], sizes = [8, 288], strides = [1, 1]} : vector<8x362xf32> to vector<8x288xf32>
    %139 = vector.extract_strided_slice %11 {offsets = [0, 1], sizes = [8, 288], strides = [1, 1]} : vector<8x362xf32> to vector<8x288xf32>
    %140 = vector.extract_strided_slice %11 {offsets = [0, 2], sizes = [8, 288], strides = [1, 1]} : vector<8x362xf32> to vector<8x288xf32>
    %141 = vector.extract_strided_slice %11 {offsets = [0, 18], sizes = [8, 288], strides = [1, 1]} : vector<8x362xf32> to vector<8x288xf32>
    %142 = vector.extract_strided_slice %11 {offsets = [0, 19], sizes = [8, 288], strides = [1, 1]} : vector<8x362xf32> to vector<8x288xf32>
    %143 = vector.extract_strided_slice %11 {offsets = [0, 20], sizes = [8, 288], strides = [1, 1]} : vector<8x362xf32> to vector<8x288xf32>
    %144 = vector.extract_strided_slice %11 {offsets = [0, 36], sizes = [8, 288], strides = [1, 1]} : vector<8x362xf32> to vector<8x288xf32>
    %145 = vector.extract_strided_slice %11 {offsets = [0, 37], sizes = [8, 288], strides = [1, 1]} : vector<8x362xf32> to vector<8x288xf32>
    %146 = vector.extract_strided_slice %11 {offsets = [0, 38], sizes = [8, 288], strides = [1, 1]} : vector<8x362xf32> to vector<8x288xf32>
    %147 = tpu.concatenate %138, %139, %140, %141, %142, %143, %144, %145, %146 in 0 : vector<8x288xf32>, vector<8x288xf32>, vector<8x288xf32>, vector<8x288xf32>, vector<8x288xf32>, vector<8x288xf32>, vector<8x288xf32>, vector<8x288xf32>, vector<8x288xf32> -> vector<72x288xf32>
    %148 = arith.truncf %147 : vector<72x288xf32> to vector<72x288xbf16>
    %c1_72 = arith.constant 1 : index
    %c0_73 = arith.constant 0 : index
    %c0_74 = arith.constant 0 : index
    %149 = vector.load %arg12[%c1_72, %c0_73, %c0_74] : memref<3x8x72xbf16, #tpu.memory_space<vmem>>, vector<1x8x72xbf16>
    %150 = vector.shape_cast %149 : vector<1x8x72xbf16> to vector<8x72xbf16>
    %cst_75 = arith.constant dense<0.000000e+00> : vector<8x288xf32>
    %151 = tpu.matmul %150, %148, %cst_75 {dimension_numbers = #tpu.dot_dimension_numbers<[1], [0], [0], [1], [0, 0, 1, 1], [], []>} : vector<8x72xbf16>, vector<72x288xbf16>, vector<8x288xf32> -> vector<8x288xf32>
    %152 = arith.addf %137, %151 : vector<8x288xf32>
    %153 = vector.extract_strided_slice %14 {offsets = [0, 0], sizes = [8, 288], strides = [1, 1]} : vector<8x362xf32> to vector<8x288xf32>
    %154 = vector.extract_strided_slice %14 {offsets = [0, 1], sizes = [8, 288], strides = [1, 1]} : vector<8x362xf32> to vector<8x288xf32>
    %155 = vector.extract_strided_slice %14 {offsets = [0, 2], sizes = [8, 288], strides = [1, 1]} : vector<8x362xf32> to vector<8x288xf32>
    %156 = vector.extract_strided_slice %14 {offsets = [0, 18], sizes = [8, 288], strides = [1, 1]} : vector<8x362xf32> to vector<8x288xf32>
    %157 = vector.extract_strided_slice %14 {offsets = [0, 19], sizes = [8, 288], strides = [1, 1]} : vector<8x362xf32> to vector<8x288xf32>
    %158 = vector.extract_strided_slice %14 {offsets = [0, 20], sizes = [8, 288], strides = [1, 1]} : vector<8x362xf32> to vector<8x288xf32>
    %159 = vector.extract_strided_slice %14 {offsets = [0, 36], sizes = [8, 288], strides = [1, 1]} : vector<8x362xf32> to vector<8x288xf32>
    %160 = vector.extract_strided_slice %14 {offsets = [0, 37], sizes = [8, 288], strides = [1, 1]} : vector<8x362xf32> to vector<8x288xf32>
    %161 = vector.extract_strided_slice %14 {offsets = [0, 38], sizes = [8, 288], strides = [1, 1]} : vector<8x362xf32> to vector<8x288xf32>
    %162 = tpu.concatenate %153, %154, %155, %156, %157, %158, %159, %160, %161 in 0 : vector<8x288xf32>, vector<8x288xf32>, vector<8x288xf32>, vector<8x288xf32>, vector<8x288xf32>, vector<8x288xf32>, vector<8x288xf32>, vector<8x288xf32>, vector<8x288xf32> -> vector<72x288xf32>
    %163 = arith.truncf %162 : vector<72x288xf32> to vector<72x288xbf16>
    %c2_76 = arith.constant 2 : index
    %c0_77 = arith.constant 0 : index
    %c0_78 = arith.constant 0 : index
    %164 = vector.load %arg12[%c2_76, %c0_77, %c0_78] : memref<3x8x72xbf16, #tpu.memory_space<vmem>>, vector<1x8x72xbf16>
    %165 = vector.shape_cast %164 : vector<1x8x72xbf16> to vector<8x72xbf16>
    %cst_79 = arith.constant dense<0.000000e+00> : vector<8x288xf32>
    %166 = tpu.matmul %165, %163, %cst_79 {dimension_numbers = #tpu.dot_dimension_numbers<[1], [0], [0], [1], [0, 0, 1, 1], [], []>} : vector<8x72xbf16>, vector<72x288xbf16>, vector<8x288xf32> -> vector<8x288xf32>
    %167 = arith.addf %152, %166 : vector<8x288xf32>
    %c0_80 = arith.constant 0 : index
    %c2_81 = arith.constant 2 : index
    %c0_82 = arith.constant 0 : index
    %c0_83 = arith.constant 0 : index
    %168 = vector.load %arg13[%c0_80, %c2_81, %c0_82, %c0_83] : memref<1x8x8x288xf32, #tpu.memory_space<vmem>>, vector<1x1x8x288xf32>
    %169 = vector.shape_cast %168 : vector<1x1x8x288xf32> to vector<8x288xf32>
    %170 = vector.shape_cast %167 : vector<8x288xf32> to vector<1x1x8x288xf32>
    tpu.vector_store %arg13[%c0_80, %c2_81, %c0_82, %c0_83], %170 {strides = array<i32>} : memref<1x8x8x288xf32, #tpu.memory_space<vmem>>, vector<1x1x8x288xf32>,
    %171 = vector.extract_strided_slice %11 {offsets = [0, 0], sizes = [8, 288], strides = [1, 1]} : vector<8x362xf32> to vector<8x288xf32>
    %172 = vector.extract_strided_slice %11 {offsets = [0, 1], sizes = [8, 288], strides = [1, 1]} : vector<8x362xf32> to vector<8x288xf32>
    %173 = vector.extract_strided_slice %11 {offsets = [0, 2], sizes = [8, 288], strides = [1, 1]} : vector<8x362xf32> to vector<8x288xf32>
    %174 = vector.extract_strided_slice %11 {offsets = [0, 18], sizes = [8, 288], strides = [1, 1]} : vector<8x362xf32> to vector<8x288xf32>
    %175 = vector.extract_strided_slice %11 {offsets = [0, 19], sizes = [8, 288], strides = [1, 1]} : vector<8x362xf32> to vector<8x288xf32>
    %176 = vector.extract_strided_slice %11 {offsets = [0, 20], sizes = [8, 288], strides = [1, 1]} : vector<8x362xf32> to vector<8x288xf32>
    %177 = vector.extract_strided_slice %11 {offsets = [0, 36], sizes = [8, 288], strides = [1, 1]} : vector<8x362xf32> to vector<8x288xf32>
    %178 = vector.extract_strided_slice %11 {offsets = [0, 37], sizes = [8, 288], strides = [1, 1]} : vector<8x362xf32> to vector<8x288xf32>
    %179 = vector.extract_strided_slice %11 {offsets = [0, 38], sizes = [8, 288], strides = [1, 1]} : vector<8x362xf32> to vector<8x288xf32>
    %180 = tpu.concatenate %171, %172, %173, %174, %175, %176, %177, %178, %179 in 0 : vector<8x288xf32>, vector<8x288xf32>, vector<8x288xf32>, vector<8x288xf32>, vector<8x288xf32>, vector<8x288xf32>, vector<8x288xf32>, vector<8x288xf32>, vector<8x288xf32> -> vector<72x288xf32>
    %181 = arith.truncf %180 : vector<72x288xf32> to vector<72x288xbf16>
    %c0_84 = arith.constant 0 : index
    %c0_85 = arith.constant 0 : index
    %c0_86 = arith.constant 0 : index
    %182 = vector.load %arg12[%c0_84, %c0_85, %c0_86] : memref<3x8x72xbf16, #tpu.memory_space<vmem>>, vector<1x8x72xbf16>
    %183 = vector.shape_cast %182 : vector<1x8x72xbf16> to vector<8x72xbf16>
    %cst_87 = arith.constant dense<0.000000e+00> : vector<8x288xf32>
    %184 = tpu.matmul %183, %181, %cst_87 {dimension_numbers = #tpu.dot_dimension_numbers<[1], [0], [0], [1], [0, 0, 1, 1], [], []>} : vector<8x72xbf16>, vector<72x288xbf16>, vector<8x288xf32> -> vector<8x288xf32>
    %185 = vector.extract_strided_slice %14 {offsets = [0, 0], sizes = [8, 288], strides = [1, 1]} : vector<8x362xf32> to vector<8x288xf32>
    %186 = vector.extract_strided_slice %14 {offsets = [0, 1], sizes = [8, 288], strides = [1, 1]} : vector<8x362xf32> to vector<8x288xf32>
    %187 = vector.extract_strided_slice %14 {offsets = [0, 2], sizes = [8, 288], strides = [1, 1]} : vector<8x362xf32> to vector<8x288xf32>
    %188 = vector.extract_strided_slice %14 {offsets = [0, 18], sizes = [8, 288], strides = [1, 1]} : vector<8x362xf32> to vector<8x288xf32>
    %189 = vector.extract_strided_slice %14 {offsets = [0, 19], sizes = [8, 288], strides = [1, 1]} : vector<8x362xf32> to vector<8x288xf32>
    %190 = vector.extract_strided_slice %14 {offsets = [0, 20], sizes = [8, 288], strides = [1, 1]} : vector<8x362xf32> to vector<8x288xf32>
    %191 = vector.extract_strided_slice %14 {offsets = [0, 36], sizes = [8, 288], strides = [1, 1]} : vector<8x362xf32> to vector<8x288xf32>
    %192 = vector.extract_strided_slice %14 {offsets = [0, 37], sizes = [8, 288], strides = [1, 1]} : vector<8x362xf32> to vector<8x288xf32>
    %193 = vector.extract_strided_slice %14 {offsets = [0, 38], sizes = [8, 288], strides = [1, 1]} : vector<8x362xf32> to vector<8x288xf32>
    %194 = tpu.concatenate %185, %186, %187, %188, %189, %190, %191, %192, %193 in 0 : vector<8x288xf32>, vector<8x288xf32>, vector<8x288xf32>, vector<8x288xf32>, vector<8x288xf32>, vector<8x288xf32>, vector<8x288xf32>, vector<8x288xf32>, vector<8x288xf32> -> vector<72x288xf32>
    %195 = arith.truncf %194 : vector<72x288xf32> to vector<72x288xbf16>
    %c1_88 = arith.constant 1 : index
    %c0_89 = arith.constant 0 : index
    %c0_90 = arith.constant 0 : index
    %196 = vector.load %arg12[%c1_88, %c0_89, %c0_90] : memref<3x8x72xbf16, #tpu.memory_space<vmem>>, vector<1x8x72xbf16>
    %197 = vector.shape_cast %196 : vector<1x8x72xbf16> to vector<8x72xbf16>
    %cst_91 = arith.constant dense<0.000000e+00> : vector<8x288xf32>
    %198 = tpu.matmul %197, %195, %cst_91 {dimension_numbers = #tpu.dot_dimension_numbers<[1], [0], [0], [1], [0, 0, 1, 1], [], []>} : vector<8x72xbf16>, vector<72x288xbf16>, vector<8x288xf32> -> vector<8x288xf32>
    %199 = arith.addf %184, %198 : vector<8x288xf32>
    %200 = vector.extract_strided_slice %17 {offsets = [0, 0], sizes = [8, 288], strides = [1, 1]} : vector<8x362xf32> to vector<8x288xf32>
    %201 = vector.extract_strided_slice %17 {offsets = [0, 1], sizes = [8, 288], strides = [1, 1]} : vector<8x362xf32> to vector<8x288xf32>
    %202 = vector.extract_strided_slice %17 {offsets = [0, 2], sizes = [8, 288], strides = [1, 1]} : vector<8x362xf32> to vector<8x288xf32>
    %203 = vector.extract_strided_slice %17 {offsets = [0, 18], sizes = [8, 288], strides = [1, 1]} : vector<8x362xf32> to vector<8x288xf32>
    %204 = vector.extract_strided_slice %17 {offsets = [0, 19], sizes = [8, 288], strides = [1, 1]} : vector<8x362xf32> to vector<8x288xf32>
    %205 = vector.extract_strided_slice %17 {offsets = [0, 20], sizes = [8, 288], strides = [1, 1]} : vector<8x362xf32> to vector<8x288xf32>
    %206 = vector.extract_strided_slice %17 {offsets = [0, 36], sizes = [8, 288], strides = [1, 1]} : vector<8x362xf32> to vector<8x288xf32>
    %207 = vector.extract_strided_slice %17 {offsets = [0, 37], sizes = [8, 288], strides = [1, 1]} : vector<8x362xf32> to vector<8x288xf32>
    %208 = vector.extract_strided_slice %17 {offsets = [0, 38], sizes = [8, 288], strides = [1, 1]} : vector<8x362xf32> to vector<8x288xf32>
    %209 = tpu.concatenate %200, %201, %202, %203, %204, %205, %206, %207, %208 in 0 : vector<8x288xf32>, vector<8x288xf32>, vector<8x288xf32>, vector<8x288xf32>, vector<8x288xf32>, vector<8x288xf32>, vector<8x288xf32>, vector<8x288xf32>, vector<8x288xf32> -> vector<72x288xf32>
    %210 = arith.truncf %209 : vector<72x288xf32> to vector<72x288xbf16>
    %c2_92 = arith.constant 2 : index
    %c0_93 = arith.constant 0 : index
    %c0_94 = arith.constant 0 : index
    %211 = vector.load %arg12[%c2_92, %c0_93, %c0_94] : memref<3x8x72xbf16, #tpu.memory_space<vmem>>, vector<1x8x72xbf16>
    %212 = vector.shape_cast %211 : vector<1x8x72xbf16> to vector<8x72xbf16>
    %cst_95 = arith.constant dense<0.000000e+00> : vector<8x288xf32>
    %213 = tpu.matmul %212, %210, %cst_95 {dimension_numbers = #tpu.dot_dimension_numbers<[1], [0], [0], [1], [0, 0, 1, 1], [], []>} : vector<8x72xbf16>, vector<72x288xbf16>, vector<8x288xf32> -> vector<8x288xf32>
    %214 = arith.addf %199, %213 : vector<8x288xf32>
    %c0_96 = arith.constant 0 : index
    %c3 = arith.constant 3 : index
    %c0_97 = arith.constant 0 : index
    %c0_98 = arith.constant 0 : index
    %215 = vector.load %arg13[%c0_96, %c3, %c0_97, %c0_98] : memref<1x8x8x288xf32, #tpu.memory_space<vmem>>, vector<1x1x8x288xf32>
    %216 = vector.shape_cast %215 : vector<1x1x8x288xf32> to vector<8x288xf32>
    %217 = vector.shape_cast %214 : vector<8x288xf32> to vector<1x1x8x288xf32>
    tpu.vector_store %arg13[%c0_96, %c3, %c0_97, %c0_98], %217 {strides = array<i32>} : memref<1x8x8x288xf32, #tpu.memory_space<vmem>>, vector<1x1x8x288xf32>,
    %218 = vector.extract_strided_slice %14 {offsets = [0, 0], sizes = [8, 288], strides = [1, 1]} : vector<8x362xf32> to vector<8x288xf32>
    %219 = vector.extract_strided_slice %14 {offsets = [0, 1], sizes = [8, 288], strides = [1, 1]} : vector<8x362xf32> to vector<8x288xf32>
    %220 = vector.extract_strided_slice %14 {offsets = [0, 2], sizes = [8, 288], strides = [1, 1]} : vector<8x362xf32> to vector<8x288xf32>
    %221 = vector.extract_strided_slice %14 {offsets = [0, 18], sizes = [8, 288], strides = [1, 1]} : vector<8x362xf32> to vector<8x288xf32>
    %222 = vector.extract_strided_slice %14 {offsets = [0, 19], sizes = [8, 288], strides = [1, 1]} : vector<8x362xf32> to vector<8x288xf32>
    %223 = vector.extract_strided_slice %14 {offsets = [0, 20], sizes = [8, 288], strides = [1, 1]} : vector<8x362xf32> to vector<8x288xf32>
    %224 = vector.extract_strided_slice %14 {offsets = [0, 36], sizes = [8, 288], strides = [1, 1]} : vector<8x362xf32> to vector<8x288xf32>
    %225 = vector.extract_strided_slice %14 {offsets = [0, 37], sizes = [8, 288], strides = [1, 1]} : vector<8x362xf32> to vector<8x288xf32>
    %226 = vector.extract_strided_slice %14 {offsets = [0, 38], sizes = [8, 288], strides = [1, 1]} : vector<8x362xf32> to vector<8x288xf32>
    %227 = tpu.concatenate %218, %219, %220, %221, %222, %223, %224, %225, %226 in 0 : vector<8x288xf32>, vector<8x288xf32>, vector<8x288xf32>, vector<8x288xf32>, vector<8x288xf32>, vector<8x288xf32>, vector<8x288xf32>, vector<8x288xf32>, vector<8x288xf32> -> vector<72x288xf32>
    %228 = arith.truncf %227 : vector<72x288xf32> to vector<72x288xbf16>
    %c0_99 = arith.constant 0 : index
    %c0_100 = arith.constant 0 : index
    %c0_101 = arith.constant 0 : index
    %229 = vector.load %arg12[%c0_99, %c0_100, %c0_101] : memref<3x8x72xbf16, #tpu.memory_space<vmem>>, vector<1x8x72xbf16>
    %230 = vector.shape_cast %229 : vector<1x8x72xbf16> to vector<8x72xbf16>
    %cst_102 = arith.constant dense<0.000000e+00> : vector<8x288xf32>
    %231 = tpu.matmul %230, %228, %cst_102 {dimension_numbers = #tpu.dot_dimension_numbers<[1], [0], [0], [1], [0, 0, 1, 1], [], []>} : vector<8x72xbf16>, vector<72x288xbf16>, vector<8x288xf32> -> vector<8x288xf32>
    %232 = vector.extract_strided_slice %17 {offsets = [0, 0], sizes = [8, 288], strides = [1, 1]} : vector<8x362xf32> to vector<8x288xf32>
    %233 = vector.extract_strided_slice %17 {offsets = [0, 1], sizes = [8, 288], strides = [1, 1]} : vector<8x362xf32> to vector<8x288xf32>
    %234 = vector.extract_strided_slice %17 {offsets = [0, 2], sizes = [8, 288], strides = [1, 1]} : vector<8x362xf32> to vector<8x288xf32>
    %235 = vector.extract_strided_slice %17 {offsets = [0, 18], sizes = [8, 288], strides = [1, 1]} : vector<8x362xf32> to vector<8x288xf32>
    %236 = vector.extract_strided_slice %17 {offsets = [0, 19], sizes = [8, 288], strides = [1, 1]} : vector<8x362xf32> to vector<8x288xf32>
    %237 = vector.extract_strided_slice %17 {offsets = [0, 20], sizes = [8, 288], strides = [1, 1]} : vector<8x362xf32> to vector<8x288xf32>
    %238 = vector.extract_strided_slice %17 {offsets = [0, 36], sizes = [8, 288], strides = [1, 1]} : vector<8x362xf32> to vector<8x288xf32>
    %239 = vector.extract_strided_slice %17 {offsets = [0, 37], sizes = [8, 288], strides = [1, 1]} : vector<8x362xf32> to vector<8x288xf32>
    %240 = vector.extract_strided_slice %17 {offsets = [0, 38], sizes = [8, 288], strides = [1, 1]} : vector<8x362xf32> to vector<8x288xf32>
    %241 = tpu.concatenate %232, %233, %234, %235, %236, %237, %238, %239, %240 in 0 : vector<8x288xf32>, vector<8x288xf32>, vector<8x288xf32>, vector<8x288xf32>, vector<8x288xf32>, vector<8x288xf32>, vector<8x288xf32>, vector<8x288xf32>, vector<8x288xf32> -> vector<72x288xf32>
    %242 = arith.truncf %241 : vector<72x288xf32> to vector<72x288xbf16>
    %c1_103 = arith.constant 1 : index
    %c0_104 = arith.constant 0 : index
    %c0_105 = arith.constant 0 : index
    %243 = vector.load %arg12[%c1_103, %c0_104, %c0_105] : memref<3x8x72xbf16, #tpu.memory_space<vmem>>, vector<1x8x72xbf16>
    %244 = vector.shape_cast %243 : vector<1x8x72xbf16> to vector<8x72xbf16>
    %cst_106 = arith.constant dense<0.000000e+00> : vector<8x288xf32>
    %245 = tpu.matmul %244, %242, %cst_106 {dimension_numbers = #tpu.dot_dimension_numbers<[1], [0], [0], [1], [0, 0, 1, 1], [], []>} : vector<8x72xbf16>, vector<72x288xbf16>, vector<8x288xf32> -> vector<8x288xf32>
    %246 = arith.addf %231, %245 : vector<8x288xf32>
    %247 = vector.extract_strided_slice %20 {offsets = [0, 0], sizes = [8, 288], strides = [1, 1]} : vector<8x362xf32> to vector<8x288xf32>
    %248 = vector.extract_strided_slice %20 {offsets = [0, 1], sizes = [8, 288], strides = [1, 1]} : vector<8x362xf32> to vector<8x288xf32>
    %249 = vector.extract_strided_slice %20 {offsets = [0, 2], sizes = [8, 288], strides = [1, 1]} : vector<8x362xf32> to vector<8x288xf32>
    %250 = vector.extract_strided_slice %20 {offsets = [0, 18], sizes = [8, 288], strides = [1, 1]} : vector<8x362xf32> to vector<8x288xf32>
    %251 = vector.extract_strided_slice %20 {offsets = [0, 19], sizes = [8, 288], strides = [1, 1]} : vector<8x362xf32> to vector<8x288xf32>
    %252 = vector.extract_strided_slice %20 {offsets = [0, 20], sizes = [8, 288], strides = [1, 1]} : vector<8x362xf32> to vector<8x288xf32>
    %253 = vector.extract_strided_slice %20 {offsets = [0, 36], sizes = [8, 288], strides = [1, 1]} : vector<8x362xf32> to vector<8x288xf32>
    %254 = vector.extract_strided_slice %20 {offsets = [0, 37], sizes = [8, 288], strides = [1, 1]} : vector<8x362xf32> to vector<8x288xf32>
    %255 = vector.extract_strided_slice %20 {offsets = [0, 38], sizes = [8, 288], strides = [1, 1]} : vector<8x362xf32> to vector<8x288xf32>
    %256 = tpu.concatenate %247, %248, %249, %250, %251, %252, %253, %254, %255 in 0 : vector<8x288xf32>, vector<8x288xf32>, vector<8x288xf32>, vector<8x288xf32>, vector<8x288xf32>, vector<8x288xf32>, vector<8x288xf32>, vector<8x288xf32>, vector<8x288xf32> -> vector<72x288xf32>
    %257 = arith.truncf %256 : vector<72x288xf32> to vector<72x288xbf16>
    %c2_107 = arith.constant 2 : index
    %c0_108 = arith.constant 0 : index
    %c0_109 = arith.constant 0 : index
    %258 = vector.load %arg12[%c2_107, %c0_108, %c0_109] : memref<3x8x72xbf16, #tpu.memory_space<vmem>>, vector<1x8x72xbf16>
    %259 = vector.shape_cast %258 : vector<1x8x72xbf16> to vector<8x72xbf16>
    %cst_110 = arith.constant dense<0.000000e+00> : vector<8x288xf32>
    %260 = tpu.matmul %259, %257, %cst_110 {dimension_numbers = #tpu.dot_dimension_numbers<[1], [0], [0], [1], [0, 0, 1, 1], [], []>} : vector<8x72xbf16>, vector<72x288xbf16>, vector<8x288xf32> -> vector<8x288xf32>
    %261 = arith.addf %246, %260 : vector<8x288xf32>
    %c0_111 = arith.constant 0 : index
    %c4 = arith.constant 4 : index
    %c0_112 = arith.constant 0 : index
    %c0_113 = arith.constant 0 : index
    %262 = vector.load %arg13[%c0_111, %c4, %c0_112, %c0_113] : memref<1x8x8x288xf32, #tpu.memory_space<vmem>>, vector<1x1x8x288xf32>
    %263 = vector.shape_cast %262 : vector<1x1x8x288xf32> to vector<8x288xf32>
    %264 = vector.shape_cast %261 : vector<8x288xf32> to vector<1x1x8x288xf32>
    tpu.vector_store %arg13[%c0_111, %c4, %c0_112, %c0_113], %264 {strides = array<i32>} : memref<1x8x8x288xf32, #tpu.memory_space<vmem>>, vector<1x1x8x288xf32>,
    %265 = vector.extract_strided_slice %17 {offsets = [0, 0], sizes = [8, 288], strides = [1, 1]} : vector<8x362xf32> to vector<8x288xf32>
    %266 = vector.extract_strided_slice %17 {offsets = [0, 1], sizes = [8, 288], strides = [1, 1]} : vector<8x362xf32> to vector<8x288xf32>
    %267 = vector.extract_strided_slice %17 {offsets = [0, 2], sizes = [8, 288], strides = [1, 1]} : vector<8x362xf32> to vector<8x288xf32>
    %268 = vector.extract_strided_slice %17 {offsets = [0, 18], sizes = [8, 288], strides = [1, 1]} : vector<8x362xf32> to vector<8x288xf32>
    %269 = vector.extract_strided_slice %17 {offsets = [0, 19], sizes = [8, 288], strides = [1, 1]} : vector<8x362xf32> to vector<8x288xf32>
    %270 = vector.extract_strided_slice %17 {offsets = [0, 20], sizes = [8, 288], strides = [1, 1]} : vector<8x362xf32> to vector<8x288xf32>
    %271 = vector.extract_strided_slice %17 {offsets = [0, 36], sizes = [8, 288], strides = [1, 1]} : vector<8x362xf32> to vector<8x288xf32>
    %272 = vector.extract_strided_slice %17 {offsets = [0, 37], sizes = [8, 288], strides = [1, 1]} : vector<8x362xf32> to vector<8x288xf32>
    %273 = vector.extract_strided_slice %17 {offsets = [0, 38], sizes = [8, 288], strides = [1, 1]} : vector<8x362xf32> to vector<8x288xf32>
    %274 = tpu.concatenate %265, %266, %267, %268, %269, %270, %271, %272, %273 in 0 : vector<8x288xf32>, vector<8x288xf32>, vector<8x288xf32>, vector<8x288xf32>, vector<8x288xf32>, vector<8x288xf32>, vector<8x288xf32>, vector<8x288xf32>, vector<8x288xf32> -> vector<72x288xf32>
    %275 = arith.truncf %274 : vector<72x288xf32> to vector<72x288xbf16>
    %c0_114 = arith.constant 0 : index
    %c0_115 = arith.constant 0 : index
    %c0_116 = arith.constant 0 : index
    %276 = vector.load %arg12[%c0_114, %c0_115, %c0_116] : memref<3x8x72xbf16, #tpu.memory_space<vmem>>, vector<1x8x72xbf16>
    %277 = vector.shape_cast %276 : vector<1x8x72xbf16> to vector<8x72xbf16>
    %cst_117 = arith.constant dense<0.000000e+00> : vector<8x288xf32>
    %278 = tpu.matmul %277, %275, %cst_117 {dimension_numbers = #tpu.dot_dimension_numbers<[1], [0], [0], [1], [0, 0, 1, 1], [], []>} : vector<8x72xbf16>, vector<72x288xbf16>, vector<8x288xf32> -> vector<8x288xf32>
    %279 = vector.extract_strided_slice %20 {offsets = [0, 0], sizes = [8, 288], strides = [1, 1]} : vector<8x362xf32> to vector<8x288xf32>
    %280 = vector.extract_strided_slice %20 {offsets = [0, 1], sizes = [8, 288], strides = [1, 1]} : vector<8x362xf32> to vector<8x288xf32>
    %281 = vector.extract_strided_slice %20 {offsets = [0, 2], sizes = [8, 288], strides = [1, 1]} : vector<8x362xf32> to vector<8x288xf32>
    %282 = vector.extract_strided_slice %20 {offsets = [0, 18], sizes = [8, 288], strides = [1, 1]} : vector<8x362xf32> to vector<8x288xf32>
    %283 = vector.extract_strided_slice %20 {offsets = [0, 19], sizes = [8, 288], strides = [1, 1]} : vector<8x362xf32> to vector<8x288xf32>
    %284 = vector.extract_strided_slice %20 {offsets = [0, 20], sizes = [8, 288], strides = [1, 1]} : vector<8x362xf32> to vector<8x288xf32>
    %285 = vector.extract_strided_slice %20 {offsets = [0, 36], sizes = [8, 288], strides = [1, 1]} : vector<8x362xf32> to vector<8x288xf32>
    %286 = vector.extract_strided_slice %20 {offsets = [0, 37], sizes = [8, 288], strides = [1, 1]} : vector<8x362xf32> to vector<8x288xf32>
    %287 = vector.extract_strided_slice %20 {offsets = [0, 38], sizes = [8, 288], strides = [1, 1]} : vector<8x362xf32> to vector<8x288xf32>
    %288 = tpu.concatenate %279, %280, %281, %282, %283, %284, %285, %286, %287 in 0 : vector<8x288xf32>, vector<8x288xf32>, vector<8x288xf32>, vector<8x288xf32>, vector<8x288xf32>, vector<8x288xf32>, vector<8x288xf32>, vector<8x288xf32>, vector<8x288xf32> -> vector<72x288xf32>
    %289 = arith.truncf %288 : vector<72x288xf32> to vector<72x288xbf16>
    %c1_118 = arith.constant 1 : index
    %c0_119 = arith.constant 0 : index
    %c0_120 = arith.constant 0 : index
    %290 = vector.load %arg12[%c1_118, %c0_119, %c0_120] : memref<3x8x72xbf16, #tpu.memory_space<vmem>>, vector<1x8x72xbf16>
    %291 = vector.shape_cast %290 : vector<1x8x72xbf16> to vector<8x72xbf16>
    %cst_121 = arith.constant dense<0.000000e+00> : vector<8x288xf32>
    %292 = tpu.matmul %291, %289, %cst_121 {dimension_numbers = #tpu.dot_dimension_numbers<[1], [0], [0], [1], [0, 0, 1, 1], [], []>} : vector<8x72xbf16>, vector<72x288xbf16>, vector<8x288xf32> -> vector<8x288xf32>
    %293 = arith.addf %278, %292 : vector<8x288xf32>
    %294 = vector.extract_strided_slice %23 {offsets = [0, 0], sizes = [8, 288], strides = [1, 1]} : vector<8x362xf32> to vector<8x288xf32>
    %295 = vector.extract_strided_slice %23 {offsets = [0, 1], sizes = [8, 288], strides = [1, 1]} : vector<8x362xf32> to vector<8x288xf32>
    %296 = vector.extract_strided_slice %23 {offsets = [0, 2], sizes = [8, 288], strides = [1, 1]} : vector<8x362xf32> to vector<8x288xf32>
    %297 = vector.extract_strided_slice %23 {offsets = [0, 18], sizes = [8, 288], strides = [1, 1]} : vector<8x362xf32> to vector<8x288xf32>
    %298 = vector.extract_strided_slice %23 {offsets = [0, 19], sizes = [8, 288], strides = [1, 1]} : vector<8x362xf32> to vector<8x288xf32>
    %299 = vector.extract_strided_slice %23 {offsets = [0, 20], sizes = [8, 288], strides = [1, 1]} : vector<8x362xf32> to vector<8x288xf32>
    %300 = vector.extract_strided_slice %23 {offsets = [0, 36], sizes = [8, 288], strides = [1, 1]} : vector<8x362xf32> to vector<8x288xf32>
    %301 = vector.extract_strided_slice %23 {offsets = [0, 37], sizes = [8, 288], strides = [1, 1]} : vector<8x362xf32> to vector<8x288xf32>
    %302 = vector.extract_strided_slice %23 {offsets = [0, 38], sizes = [8, 288], strides = [1, 1]} : vector<8x362xf32> to vector<8x288xf32>
    %303 = tpu.concatenate %294, %295, %296, %297, %298, %299, %300, %301, %302 in 0 : vector<8x288xf32>, vector<8x288xf32>, vector<8x288xf32>, vector<8x288xf32>, vector<8x288xf32>, vector<8x288xf32>, vector<8x288xf32>, vector<8x288xf32>, vector<8x288xf32> -> vector<72x288xf32>
    %304 = arith.truncf %303 : vector<72x288xf32> to vector<72x288xbf16>
    %c2_122 = arith.constant 2 : index
    %c0_123 = arith.constant 0 : index
    %c0_124 = arith.constant 0 : index
    %305 = vector.load %arg12[%c2_122, %c0_123, %c0_124] : memref<3x8x72xbf16, #tpu.memory_space<vmem>>, vector<1x8x72xbf16>
    %306 = vector.shape_cast %305 : vector<1x8x72xbf16> to vector<8x72xbf16>
    %cst_125 = arith.constant dense<0.000000e+00> : vector<8x288xf32>
    %307 = tpu.matmul %306, %304, %cst_125 {dimension_numbers = #tpu.dot_dimension_numbers<[1], [0], [0], [1], [0, 0, 1, 1], [], []>} : vector<8x72xbf16>, vector<72x288xbf16>, vector<8x288xf32> -> vector<8x288xf32>
    %308 = arith.addf %293, %307 : vector<8x288xf32>
    %c0_126 = arith.constant 0 : index
    %c5 = arith.constant 5 : index
    %c0_127 = arith.constant 0 : index
    %c0_128 = arith.constant 0 : index
    %309 = vector.load %arg13[%c0_126, %c5, %c0_127, %c0_128] : memref<1x8x8x288xf32, #tpu.memory_space<vmem>>, vector<1x1x8x288xf32>
    %310 = vector.shape_cast %309 : vector<1x1x8x288xf32> to vector<8x288xf32>
    %311 = vector.shape_cast %308 : vector<8x288xf32> to vector<1x1x8x288xf32>
    tpu.vector_store %arg13[%c0_126, %c5, %c0_127, %c0_128], %311 {strides = array<i32>} : memref<1x8x8x288xf32, #tpu.memory_space<vmem>>, vector<1x1x8x288xf32>,
    %312 = vector.extract_strided_slice %20 {offsets = [0, 0], sizes = [8, 288], strides = [1, 1]} : vector<8x362xf32> to vector<8x288xf32>
    %313 = vector.extract_strided_slice %20 {offsets = [0, 1], sizes = [8, 288], strides = [1, 1]} : vector<8x362xf32> to vector<8x288xf32>
    %314 = vector.extract_strided_slice %20 {offsets = [0, 2], sizes = [8, 288], strides = [1, 1]} : vector<8x362xf32> to vector<8x288xf32>
    %315 = vector.extract_strided_slice %20 {offsets = [0, 18], sizes = [8, 288], strides = [1, 1]} : vector<8x362xf32> to vector<8x288xf32>
    %316 = vector.extract_strided_slice %20 {offsets = [0, 19], sizes = [8, 288], strides = [1, 1]} : vector<8x362xf32> to vector<8x288xf32>
    %317 = vector.extract_strided_slice %20 {offsets = [0, 20], sizes = [8, 288], strides = [1, 1]} : vector<8x362xf32> to vector<8x288xf32>
    %318 = vector.extract_strided_slice %20 {offsets = [0, 36], sizes = [8, 288], strides = [1, 1]} : vector<8x362xf32> to vector<8x288xf32>
    %319 = vector.extract_strided_slice %20 {offsets = [0, 37], sizes = [8, 288], strides = [1, 1]} : vector<8x362xf32> to vector<8x288xf32>
    %320 = vector.extract_strided_slice %20 {offsets = [0, 38], sizes = [8, 288], strides = [1, 1]} : vector<8x362xf32> to vector<8x288xf32>
    %321 = tpu.concatenate %312, %313, %314, %315, %316, %317, %318, %319, %320 in 0 : vector<8x288xf32>, vector<8x288xf32>, vector<8x288xf32>, vector<8x288xf32>, vector<8x288xf32>, vector<8x288xf32>, vector<8x288xf32>, vector<8x288xf32>, vector<8x288xf32> -> vector<72x288xf32>
    %322 = arith.truncf %321 : vector<72x288xf32> to vector<72x288xbf16>
    %c0_129 = arith.constant 0 : index
    %c0_130 = arith.constant 0 : index
    %c0_131 = arith.constant 0 : index
    %323 = vector.load %arg12[%c0_129, %c0_130, %c0_131] : memref<3x8x72xbf16, #tpu.memory_space<vmem>>, vector<1x8x72xbf16>
    %324 = vector.shape_cast %323 : vector<1x8x72xbf16> to vector<8x72xbf16>
    %cst_132 = arith.constant dense<0.000000e+00> : vector<8x288xf32>
    %325 = tpu.matmul %324, %322, %cst_132 {dimension_numbers = #tpu.dot_dimension_numbers<[1], [0], [0], [1], [0, 0, 1, 1], [], []>} : vector<8x72xbf16>, vector<72x288xbf16>, vector<8x288xf32> -> vector<8x288xf32>
    %326 = vector.extract_strided_slice %23 {offsets = [0, 0], sizes = [8, 288], strides = [1, 1]} : vector<8x362xf32> to vector<8x288xf32>
    %327 = vector.extract_strided_slice %23 {offsets = [0, 1], sizes = [8, 288], strides = [1, 1]} : vector<8x362xf32> to vector<8x288xf32>
    %328 = vector.extract_strided_slice %23 {offsets = [0, 2], sizes = [8, 288], strides = [1, 1]} : vector<8x362xf32> to vector<8x288xf32>
    %329 = vector.extract_strided_slice %23 {offsets = [0, 18], sizes = [8, 288], strides = [1, 1]} : vector<8x362xf32> to vector<8x288xf32>
    %330 = vector.extract_strided_slice %23 {offsets = [0, 19], sizes = [8, 288], strides = [1, 1]} : vector<8x362xf32> to vector<8x288xf32>
    %331 = vector.extract_strided_slice %23 {offsets = [0, 20], sizes = [8, 288], strides = [1, 1]} : vector<8x362xf32> to vector<8x288xf32>
    %332 = vector.extract_strided_slice %23 {offsets = [0, 36], sizes = [8, 288], strides = [1, 1]} : vector<8x362xf32> to vector<8x288xf32>
    %333 = vector.extract_strided_slice %23 {offsets = [0, 37], sizes = [8, 288], strides = [1, 1]} : vector<8x362xf32> to vector<8x288xf32>
    %334 = vector.extract_strided_slice %23 {offsets = [0, 38], sizes = [8, 288], strides = [1, 1]} : vector<8x362xf32> to vector<8x288xf32>
    %335 = tpu.concatenate %326, %327, %328, %329, %330, %331, %332, %333, %334 in 0 : vector<8x288xf32>, vector<8x288xf32>, vector<8x288xf32>, vector<8x288xf32>, vector<8x288xf32>, vector<8x288xf32>, vector<8x288xf32>, vector<8x288xf32>, vector<8x288xf32> -> vector<72x288xf32>
    %336 = arith.truncf %335 : vector<72x288xf32> to vector<72x288xbf16>
    %c1_133 = arith.constant 1 : index
    %c0_134 = arith.constant 0 : index
    %c0_135 = arith.constant 0 : index
    %337 = vector.load %arg12[%c1_133, %c0_134, %c0_135] : memref<3x8x72xbf16, #tpu.memory_space<vmem>>, vector<1x8x72xbf16>
    %338 = vector.shape_cast %337 : vector<1x8x72xbf16> to vector<8x72xbf16>
    %cst_136 = arith.constant dense<0.000000e+00> : vector<8x288xf32>
    %339 = tpu.matmul %338, %336, %cst_136 {dimension_numbers = #tpu.dot_dimension_numbers<[1], [0], [0], [1], [0, 0, 1, 1], [], []>} : vector<8x72xbf16>, vector<72x288xbf16>, vector<8x288xf32> -> vector<8x288xf32>
    %340 = arith.addf %325, %339 : vector<8x288xf32>
    %341 = vector.extract_strided_slice %26 {offsets = [0, 0], sizes = [8, 288], strides = [1, 1]} : vector<8x362xf32> to vector<8x288xf32>
    %342 = vector.extract_strided_slice %26 {offsets = [0, 1], sizes = [8, 288], strides = [1, 1]} : vector<8x362xf32> to vector<8x288xf32>
    %343 = vector.extract_strided_slice %26 {offsets = [0, 2], sizes = [8, 288], strides = [1, 1]} : vector<8x362xf32> to vector<8x288xf32>
    %344 = vector.extract_strided_slice %26 {offsets = [0, 18], sizes = [8, 288], strides = [1, 1]} : vector<8x362xf32> to vector<8x288xf32>
    %345 = vector.extract_strided_slice %26 {offsets = [0, 19], sizes = [8, 288], strides = [1, 1]} : vector<8x362xf32> to vector<8x288xf32>
    %346 = vector.extract_strided_slice %26 {offsets = [0, 20], sizes = [8, 288], strides = [1, 1]} : vector<8x362xf32> to vector<8x288xf32>
    %347 = vector.extract_strided_slice %26 {offsets = [0, 36], sizes = [8, 288], strides = [1, 1]} : vector<8x362xf32> to vector<8x288xf32>
    %348 = vector.extract_strided_slice %26 {offsets = [0, 37], sizes = [8, 288], strides = [1, 1]} : vector<8x362xf32> to vector<8x288xf32>
    %349 = vector.extract_strided_slice %26 {offsets = [0, 38], sizes = [8, 288], strides = [1, 1]} : vector<8x362xf32> to vector<8x288xf32>
    %350 = tpu.concatenate %341, %342, %343, %344, %345, %346, %347, %348, %349 in 0 : vector<8x288xf32>, vector<8x288xf32>, vector<8x288xf32>, vector<8x288xf32>, vector<8x288xf32>, vector<8x288xf32>, vector<8x288xf32>, vector<8x288xf32>, vector<8x288xf32> -> vector<72x288xf32>
    %351 = arith.truncf %350 : vector<72x288xf32> to vector<72x288xbf16>
    %c2_137 = arith.constant 2 : index
    %c0_138 = arith.constant 0 : index
    %c0_139 = arith.constant 0 : index
    %352 = vector.load %arg12[%c2_137, %c0_138, %c0_139] : memref<3x8x72xbf16, #tpu.memory_space<vmem>>, vector<1x8x72xbf16>
    %353 = vector.shape_cast %352 : vector<1x8x72xbf16> to vector<8x72xbf16>
    %cst_140 = arith.constant dense<0.000000e+00> : vector<8x288xf32>
    %354 = tpu.matmul %353, %351, %cst_140 {dimension_numbers = #tpu.dot_dimension_numbers<[1], [0], [0], [1], [0, 0, 1, 1], [], []>} : vector<8x72xbf16>, vector<72x288xbf16>, vector<8x288xf32> -> vector<8x288xf32>
    %355 = arith.addf %340, %354 : vector<8x288xf32>
    %c0_141 = arith.constant 0 : index
    %c6 = arith.constant 6 : index
    %c0_142 = arith.constant 0 : index
    %c0_143 = arith.constant 0 : index
    %356 = vector.load %arg13[%c0_141, %c6, %c0_142, %c0_143] : memref<1x8x8x288xf32, #tpu.memory_space<vmem>>, vector<1x1x8x288xf32>
    %357 = vector.shape_cast %356 : vector<1x1x8x288xf32> to vector<8x288xf32>
    %358 = vector.shape_cast %355 : vector<8x288xf32> to vector<1x1x8x288xf32>
    tpu.vector_store %arg13[%c0_141, %c6, %c0_142, %c0_143], %358 {strides = array<i32>} : memref<1x8x8x288xf32, #tpu.memory_space<vmem>>, vector<1x1x8x288xf32>,
    %359 = vector.extract_strided_slice %23 {offsets = [0, 0], sizes = [8, 288], strides = [1, 1]} : vector<8x362xf32> to vector<8x288xf32>
    %360 = vector.extract_strided_slice %23 {offsets = [0, 1], sizes = [8, 288], strides = [1, 1]} : vector<8x362xf32> to vector<8x288xf32>
    %361 = vector.extract_strided_slice %23 {offsets = [0, 2], sizes = [8, 288], strides = [1, 1]} : vector<8x362xf32> to vector<8x288xf32>
    %362 = vector.extract_strided_slice %23 {offsets = [0, 18], sizes = [8, 288], strides = [1, 1]} : vector<8x362xf32> to vector<8x288xf32>
    %363 = vector.extract_strided_slice %23 {offsets = [0, 19], sizes = [8, 288], strides = [1, 1]} : vector<8x362xf32> to vector<8x288xf32>
    %364 = vector.extract_strided_slice %23 {offsets = [0, 20], sizes = [8, 288], strides = [1, 1]} : vector<8x362xf32> to vector<8x288xf32>
    %365 = vector.extract_strided_slice %23 {offsets = [0, 36], sizes = [8, 288], strides = [1, 1]} : vector<8x362xf32> to vector<8x288xf32>
    %366 = vector.extract_strided_slice %23 {offsets = [0, 37], sizes = [8, 288], strides = [1, 1]} : vector<8x362xf32> to vector<8x288xf32>
    %367 = vector.extract_strided_slice %23 {offsets = [0, 38], sizes = [8, 288], strides = [1, 1]} : vector<8x362xf32> to vector<8x288xf32>
    %368 = tpu.concatenate %359, %360, %361, %362, %363, %364, %365, %366, %367 in 0 : vector<8x288xf32>, vector<8x288xf32>, vector<8x288xf32>, vector<8x288xf32>, vector<8x288xf32>, vector<8x288xf32>, vector<8x288xf32>, vector<8x288xf32>, vector<8x288xf32> -> vector<72x288xf32>
    %369 = arith.truncf %368 : vector<72x288xf32> to vector<72x288xbf16>
    %c0_144 = arith.constant 0 : index
    %c0_145 = arith.constant 0 : index
    %c0_146 = arith.constant 0 : index
    %370 = vector.load %arg12[%c0_144, %c0_145, %c0_146] : memref<3x8x72xbf16, #tpu.memory_space<vmem>>, vector<1x8x72xbf16>
    %371 = vector.shape_cast %370 : vector<1x8x72xbf16> to vector<8x72xbf16>
    %cst_147 = arith.constant dense<0.000000e+00> : vector<8x288xf32>
    %372 = tpu.matmul %371, %369, %cst_147 {dimension_numbers = #tpu.dot_dimension_numbers<[1], [0], [0], [1], [0, 0, 1, 1], [], []>} : vector<8x72xbf16>, vector<72x288xbf16>, vector<8x288xf32> -> vector<8x288xf32>
    %373 = vector.extract_strided_slice %26 {offsets = [0, 0], sizes = [8, 288], strides = [1, 1]} : vector<8x362xf32> to vector<8x288xf32>
    %374 = vector.extract_strided_slice %26 {offsets = [0, 1], sizes = [8, 288], strides = [1, 1]} : vector<8x362xf32> to vector<8x288xf32>
    %375 = vector.extract_strided_slice %26 {offsets = [0, 2], sizes = [8, 288], strides = [1, 1]} : vector<8x362xf32> to vector<8x288xf32>
    %376 = vector.extract_strided_slice %26 {offsets = [0, 18], sizes = [8, 288], strides = [1, 1]} : vector<8x362xf32> to vector<8x288xf32>
    %377 = vector.extract_strided_slice %26 {offsets = [0, 19], sizes = [8, 288], strides = [1, 1]} : vector<8x362xf32> to vector<8x288xf32>
    %378 = vector.extract_strided_slice %26 {offsets = [0, 20], sizes = [8, 288], strides = [1, 1]} : vector<8x362xf32> to vector<8x288xf32>
    %379 = vector.extract_strided_slice %26 {offsets = [0, 36], sizes = [8, 288], strides = [1, 1]} : vector<8x362xf32> to vector<8x288xf32>
    %380 = vector.extract_strided_slice %26 {offsets = [0, 37], sizes = [8, 288], strides = [1, 1]} : vector<8x362xf32> to vector<8x288xf32>
    %381 = vector.extract_strided_slice %26 {offsets = [0, 38], sizes = [8, 288], strides = [1, 1]} : vector<8x362xf32> to vector<8x288xf32>
    %382 = tpu.concatenate %373, %374, %375, %376, %377, %378, %379, %380, %381 in 0 : vector<8x288xf32>, vector<8x288xf32>, vector<8x288xf32>, vector<8x288xf32>, vector<8x288xf32>, vector<8x288xf32>, vector<8x288xf32>, vector<8x288xf32>, vector<8x288xf32> -> vector<72x288xf32>
    %383 = arith.truncf %382 : vector<72x288xf32> to vector<72x288xbf16>
    %c1_148 = arith.constant 1 : index
    %c0_149 = arith.constant 0 : index
    %c0_150 = arith.constant 0 : index
    %384 = vector.load %arg12[%c1_148, %c0_149, %c0_150] : memref<3x8x72xbf16, #tpu.memory_space<vmem>>, vector<1x8x72xbf16>
    %385 = vector.shape_cast %384 : vector<1x8x72xbf16> to vector<8x72xbf16>
    %cst_151 = arith.constant dense<0.000000e+00> : vector<8x288xf32>
    %386 = tpu.matmul %385, %383, %cst_151 {dimension_numbers = #tpu.dot_dimension_numbers<[1], [0], [0], [1], [0, 0, 1, 1], [], []>} : vector<8x72xbf16>, vector<72x288xbf16>, vector<8x288xf32> -> vector<8x288xf32>
    %387 = arith.addf %372, %386 : vector<8x288xf32>
    %388 = vector.extract_strided_slice %29 {offsets = [0, 0], sizes = [8, 288], strides = [1, 1]} : vector<8x362xf32> to vector<8x288xf32>
    %389 = vector.extract_strided_slice %29 {offsets = [0, 1], sizes = [8, 288], strides = [1, 1]} : vector<8x362xf32> to vector<8x288xf32>
    %390 = vector.extract_strided_slice %29 {offsets = [0, 2], sizes = [8, 288], strides = [1, 1]} : vector<8x362xf32> to vector<8x288xf32>
    %391 = vector.extract_strided_slice %29 {offsets = [0, 18], sizes = [8, 288], strides = [1, 1]} : vector<8x362xf32> to vector<8x288xf32>
    %392 = vector.extract_strided_slice %29 {offsets = [0, 19], sizes = [8, 288], strides = [1, 1]} : vector<8x362xf32> to vector<8x288xf32>
    %393 = vector.extract_strided_slice %29 {offsets = [0, 20], sizes = [8, 288], strides = [1, 1]} : vector<8x362xf32> to vector<8x288xf32>
    %394 = vector.extract_strided_slice %29 {offsets = [0, 36], sizes = [8, 288], strides = [1, 1]} : vector<8x362xf32> to vector<8x288xf32>
    %395 = vector.extract_strided_slice %29 {offsets = [0, 37], sizes = [8, 288], strides = [1, 1]} : vector<8x362xf32> to vector<8x288xf32>
    %396 = vector.extract_strided_slice %29 {offsets = [0, 38], sizes = [8, 288], strides = [1, 1]} : vector<8x362xf32> to vector<8x288xf32>
    %397 = tpu.concatenate %388, %389, %390, %391, %392, %393, %394, %395, %396 in 0 : vector<8x288xf32>, vector<8x288xf32>, vector<8x288xf32>, vector<8x288xf32>, vector<8x288xf32>, vector<8x288xf32>, vector<8x288xf32>, vector<8x288xf32>, vector<8x288xf32> -> vector<72x288xf32>
    %398 = arith.truncf %397 : vector<72x288xf32> to vector<72x288xbf16>
    %c2_152 = arith.constant 2 : index
    %c0_153 = arith.constant 0 : index
    %c0_154 = arith.constant 0 : index
    %399 = vector.load %arg12[%c2_152, %c0_153, %c0_154] : memref<3x8x72xbf16, #tpu.memory_space<vmem>>, vector<1x8x72xbf16>
    %400 = vector.shape_cast %399 : vector<1x8x72xbf16> to vector<8x72xbf16>
    %cst_155 = arith.constant dense<0.000000e+00> : vector<8x288xf32>
    %401 = tpu.matmul %400, %398, %cst_155 {dimension_numbers = #tpu.dot_dimension_numbers<[1], [0], [0], [1], [0, 0, 1, 1], [], []>} : vector<8x72xbf16>, vector<72x288xbf16>, vector<8x288xf32> -> vector<8x288xf32>
    %402 = arith.addf %387, %401 : vector<8x288xf32>
    %c0_156 = arith.constant 0 : index
    %c7 = arith.constant 7 : index
    %c0_157 = arith.constant 0 : index
    %c0_158 = arith.constant 0 : index
    %403 = vector.load %arg13[%c0_156, %c7, %c0_157, %c0_158] : memref<1x8x8x288xf32, #tpu.memory_space<vmem>>, vector<1x1x8x288xf32>
    %404 = vector.shape_cast %403 : vector<1x1x8x288xf32> to vector<8x288xf32>
    %405 = vector.shape_cast %402 : vector<8x288xf32> to vector<1x1x8x288xf32>
    tpu.vector_store %arg13[%c0_156, %c7, %c0_157, %c0_158], %405 {strides = array<i32>} : memref<1x8x8x288xf32, #tpu.memory_space<vmem>>, vector<1x1x8x288xf32>,
    return
  }
  func.func @transform_0(%arg0: i32, %arg1: i32) -> (i32, i32, i32, i32) {
    %c8_i32 = arith.constant 8 : i32
    %0 = arith.muli %arg1, %c8_i32 : i32
    %c0_i32 = arith.constant 0 : i32
    %1 = arith.addi %0, %c0_i32 : i32
    %c0_i32_0 = arith.constant 0 : i32
    %c0_i32_1 = arith.constant 0 : i32
    %c0_i32_2 = arith.constant 0 : i32
    return %arg0, %1, %c0_i32_0, %c0_i32_1 : i32, i32, i32, i32
  }
  func.func @transform_1(%arg0: i32, %arg1: i32) -> (i32, i32, i32, i32) {
    %c8_i32 = arith.constant 8 : i32
    %0 = arith.muli %arg1, %c8_i32 : i32
    %c1_i32 = arith.constant 1 : i32
    %1 = arith.addi %0, %c1_i32 : i32
    %c0_i32 = arith.constant 0 : i32
    %c0_i32_0 = arith.constant 0 : i32
    %c0_i32_1 = arith.constant 0 : i32
    return %arg0, %1, %c0_i32, %c0_i32_0 : i32, i32, i32, i32
  }
  func.func @transform_2(%arg0: i32, %arg1: i32) -> (i32, i32, i32, i32) {
    %c8_i32 = arith.constant 8 : i32
    %0 = arith.muli %arg1, %c8_i32 : i32
    %c2_i32 = arith.constant 2 : i32
    %1 = arith.addi %0, %c2_i32 : i32
    %c0_i32 = arith.constant 0 : i32
    %c0_i32_0 = arith.constant 0 : i32
    %c0_i32_1 = arith.constant 0 : i32
    return %arg0, %1, %c0_i32, %c0_i32_0 : i32, i32, i32, i32
  }
  func.func @transform_3(%arg0: i32, %arg1: i32) -> (i32, i32, i32, i32) {
    %c8_i32 = arith.constant 8 : i32
    %0 = arith.muli %arg1, %c8_i32 : i32
    %c3_i32 = arith.constant 3 : i32
    %1 = arith.addi %0, %c3_i32 : i32
    %c0_i32 = arith.constant 0 : i32
    %c0_i32_0 = arith.constant 0 : i32
    %c0_i32_1 = arith.constant 0 : i32
    return %arg0, %1, %c0_i32, %c0_i32_0 : i32, i32, i32, i32
  }
  func.func @transform_4(%arg0: i32, %arg1: i32) -> (i32, i32, i32, i32) {
    %c8_i32 = arith.constant 8 : i32
    %0 = arith.muli %arg1, %c8_i32 : i32
    %c4_i32 = arith.constant 4 : i32
    %1 = arith.addi %0, %c4_i32 : i32
    %c0_i32 = arith.constant 0 : i32
    %c0_i32_0 = arith.constant 0 : i32
    %c0_i32_1 = arith.constant 0 : i32
    return %arg0, %1, %c0_i32, %c0_i32_0 : i32, i32, i32, i32
  }
  func.func @transform_5(%arg0: i32, %arg1: i32) -> (i32, i32, i32, i32) {
    %c8_i32 = arith.constant 8 : i32
    %0 = arith.muli %arg1, %c8_i32 : i32
    %c5_i32 = arith.constant 5 : i32
    %1 = arith.addi %0, %c5_i32 : i32
    %c0_i32 = arith.constant 0 : i32
    %c0_i32_0 = arith.constant 0 : i32
    %c0_i32_1 = arith.constant 0 : i32
    return %arg0, %1, %c0_i32, %c0_i32_0 : i32, i32, i32, i32
  }
  func.func @transform_6(%arg0: i32, %arg1: i32) -> (i32, i32, i32, i32) {
    %c8_i32 = arith.constant 8 : i32
    %0 = arith.muli %arg1, %c8_i32 : i32
    %c6_i32 = arith.constant 6 : i32
    %1 = arith.addi %0, %c6_i32 : i32
    %c0_i32 = arith.constant 0 : i32
    %c0_i32_0 = arith.constant 0 : i32
    %c0_i32_1 = arith.constant 0 : i32
    return %arg0, %1, %c0_i32, %c0_i32_0 : i32, i32, i32, i32
  }
  func.func @transform_7(%arg0: i32, %arg1: i32) -> (i32, i32, i32, i32) {
    %c8_i32 = arith.constant 8 : i32
    %0 = arith.muli %arg1, %c8_i32 : i32
    %c7_i32 = arith.constant 7 : i32
    %1 = arith.addi %0, %c7_i32 : i32
    %c0_i32 = arith.constant 0 : i32
    %c0_i32_0 = arith.constant 0 : i32
    %c0_i32_1 = arith.constant 0 : i32
    return %arg0, %1, %c0_i32, %c0_i32_0 : i32, i32, i32, i32
  }
  func.func @transform_8(%arg0: i32, %arg1: i32) -> (i32, i32, i32, i32) {
    %c8_i32 = arith.constant 8 : i32
    %0 = arith.muli %arg1, %c8_i32 : i32
    %c8_i32_0 = arith.constant 8 : i32
    %1 = arith.addi %0, %c8_i32_0 : i32
    %c0_i32 = arith.constant 0 : i32
    %c0_i32_1 = arith.constant 0 : i32
    %c0_i32_2 = arith.constant 0 : i32
    return %arg0, %1, %c0_i32, %c0_i32_1 : i32, i32, i32, i32
  }
  func.func @transform_9(%arg0: i32, %arg1: i32) -> (i32, i32, i32, i32) {
    %c8_i32 = arith.constant 8 : i32
    %0 = arith.muli %arg1, %c8_i32 : i32
    %c9_i32 = arith.constant 9 : i32
    %1 = arith.addi %0, %c9_i32 : i32
    %c0_i32 = arith.constant 0 : i32
    %c0_i32_0 = arith.constant 0 : i32
    %c0_i32_1 = arith.constant 0 : i32
    return %arg0, %1, %c0_i32, %c0_i32_0 : i32, i32, i32, i32
  }
  func.func @transform_10(%arg0: i32, %arg1: i32) -> (i32, i32, i32) {
    %c0_i32 = arith.constant 0 : i32
    %c0_i32_0 = arith.constant 0 : i32
    %c0_i32_1 = arith.constant 0 : i32
    %c0_i32_2 = arith.constant 0 : i32
    return %c0_i32, %c0_i32_0, %c0_i32_1 : i32, i32, i32
  }
  func.func @transform_11(%arg0: i32, %arg1: i32) -> (i32, i32, i32, i32) {
    %c0_i32 = arith.constant 0 : i32
    %c0_i32_0 = arith.constant 0 : i32
    %c0_i32_1 = arith.constant 0 : i32
    return %arg0, %arg1, %c0_i32, %c0_i32_0 : i32, i32, i32, i32
  }
}

</mosaic_0001>

<bundles_post_ra>
// kernel: single_conv3d_forward.3
= control target key start
LH: loop header
LB: loop body
LE: loop exit
PB: predicated region body
PF: predicated region fallthrough
CT: control target
= control target key end

     0   :  { %s1126_s15 = smov 0   ;;  %s1128_s16 = smov 0   ;;  %s1991_s0 = inlined_call_operand.vmem [shape: f32[2,16,8,288], index: 0, kind: input, shape index: {}]   ;;  %s1992_s1 = inlined_call_operand.vmem [shape: f32[8,1], index: 1, kind: input, shape index: {}]   ;;  %s1993_s2 = inlined_call_operand.vmem [shape: f32[8,1], index: 2, kind: input, shape index: {}]   ;;  %s1994_s3 = inlined_call_operand.vmem [shape: f32[1,288], index: 3, kind: input, shape index: {}]   ;;  %s1995_s4 = inlined_call_operand.vmem [shape: f32[2,16,8,288], index: 4, kind: output, shape index: {}]  }
   0x1   :  { %s1130_s17 = smov 0  }
   0x2 LB: > { %s26_s18 = sadd.s32 1, %s1094_s16  ;;  %p1041_p0 = scmp.ge.s32.totalorder %s1098_s17, 1  ;;  %s1098_s17 = sphi %s1130_s17, %s14_s17   ;;  %s1094_s16 = sphi %s1128_s16, %s2018_s16   ;;  %s1090_s15 = sphi %s1126_s15, %s2017_s15  }
   0x3   : > { %p28_p1 = scmp.ge.s32.totalorder %s26_s18, 2  ;;  %p200_p2 = scmp.lt.s32.totalorder %s1098_s17, 3 }
   0x5   : > { %s2020_s18 = smov (%p28_p1, %s26_s18), 0  ;;  %p201_p3 = pnand %p1041_p0, %p200_p2 }
   0x7   : > { %204 = sbr.rel (%p201_p3) target bundleno = 574 (0x23e), region = 36 }
   0xc   : > { %p242_p4 = scmp.lt.s32.totalorder %s1090_s15, 1  ;;  %v318_v0 = vlaneseq  ;;  %v316_v2 = vld [vmem:[%s1994_s3] sm:$0x7]  ;;  %vm382_vm0 = vcmask 261120  }
   0xe   : > { %s2022_s15 = smov (!%p242_p4, %s1090_s15), 1  ;;  %v319_v1 = vshrl.u32 %v318_v0, 7 }
   0xf   : > { %s1046_s21 = smul.u32 384, %s2022_s15 }
  0x10   : > { %v320_v3 = vsub.s32 0, %v319_v1  ;;  %v324_v4 = vsub.s32 1, %v319_v1  ;;  %v328_v5 = vsub.s32 2, %v319_v1 }
  0x11   : > { %s1155_s24 = scalar_lea.vmem %s1991_s0, %s1046_s21  ;;  %s1864_s5 = scalar_lea.vmem %s1995_s4, %s1046_s21 }
  0x12   : > { %v1157_v6 = vrot.slane %v316_v2, %v320_v3  ;;  %v1159_v7 = vrot.slane %v316_v2, %v324_v4  ;;  %v1161_v8 = vrot.slane %v316_v2, %v328_v5  ;;  %v1164_v9 = vld [vmem:[%s1155_s24] sm:$0xff]  ;;  %v1167_v10 = vld [vmem:[%s1155_s24 + $0x8] sm:$0xff]  ;;  %v1170_v11 = vld [vmem:[%s1155_s24 + $0x10] sm:$0xff] }
  0x13   : > { %v1173_v12 = vld [vmem:[%s1155_s24 + $0x18] sm:$0xff]  ;;  %v1176_v13 = vld [vmem:[%s1155_s24 + $0x28] sm:$0xff]  ;;  %v1185_v17 = vld [vmem:[%s1155_s24 + $0x20] sm:$0xff] }
  0x14   : > { %v333_v14 = vmul.f32 %v1157_v6, %v1164_v9  ;;  %v334_v15 = vmul.f32 %v1159_v7, %v1167_v10  ;;  %v335_v16 = vmul.f32 %v1161_v8, %v1170_v11  ;;  %v336_v18 = vmul.f32 %v1157_v6, %v1173_v12  ;;  %v1195_v24 = vld [vmem:[%s1155_s24 + $0x30] sm:$0xff]  ;;  %v1198_v25 = vld [vmem:[%s1155_s24 + $0x40] sm:$0xff]  ;;  %v1201_v27 = vld [vmem:[%s1155_s24 + $0x38] sm:$0xff] }
  0x15   : > { %v338_v20 = vmul.f32 %v1161_v8, %v1176_v13  ;;  %v337_v22 = vmul.f32 %v1159_v7, %v1185_v17  ;;  %v339_v29 = vmul.f32 %v1157_v6, %v1195_v24  ;;  %v341_v31 = vmul.f32 %v1161_v8, %v1198_v25  ;;  %v1211_v34 = vld [vmem:[%s1155_s24 + $0x48] sm:$0xff]  ;;  %v1214_v35 = vld [vmem:[%s1155_s24 + $0x58] sm:$0xff]  ;;  %v1217_v37 = vld [vmem:[%s1155_s24 + $0x50] sm:$0xff] }
  0x16   : > { %v381_v19 = vadd.f32 %v334_v15, %v333_v14  ;;  %v383_v21 = vsel %vm382_vm0, %v335_v16, 0.0  ;;  %v340_v32 = vmul.f32 %v1159_v7, %v1201_v27  ;;  %v342_v39 = vmul.f32 %v1157_v6, %v1211_v34  ;;  %v1227_v44 = vld [vmem:[%s1155_s24 + $0x60] sm:$0xff]  ;;  %v1230_v45 = vld [vmem:[%s1155_s24 + $0x70] sm:$0xff]  ;;  %v1233_v47 = vld [vmem:[%s1155_s24 + $0x68] sm:$0xff] }
  0x17   : > { %v387_v28 = vsel %vm382_vm0, %v338_v20, 0.0  ;;  %v391_v38 = vsel %vm382_vm0, %v341_v31, 0.0  ;;  %v344_v41 = vmul.f32 %v1161_v8, %v1214_v35  ;;  %v343_v42 = vmul.f32 %v1159_v7, %v1217_v37  ;;  %v1243_v54 = vld [vmem:[%s1155_s24 + $0x78] sm:$0xff]  ;;  %v1246_v55 = vld [vmem:[%s1155_s24 + $0x88] sm:$0xff]  ;;  %v1249_v57 = vld [vmem:[%s1155_s24 + $0x80] sm:$0xff] }
  0x18   : > { %v384_v23 = vadd.f32 %v383_v21, %v381_v19  ;;  %v345_v49 = vmul.f32 %v1157_v6, %v1227_v44  ;;  %v347_v51 = vmul.f32 %v1161_v8, %v1230_v45  ;;  %v346_v52 = vmul.f32 %v1159_v7, %v1233_v47  ;;  %v1259_v0 = vld [vmem:[%s1155_s24 + $0x90] sm:$0xff]  ;;  %v1262_v1 = vld [vmem:[%s1155_s24 + $0xa0] sm:$0xff]  ;;  %v1265_v3 = vld [vmem:[%s1155_s24 + $0x98] sm:$0xff] }
  0x19   : > { %v395_v48 = vsel %vm382_vm0, %v344_v41, 0.0  ;;  %v348_v59 = vmul.f32 %v1157_v6, %v1243_v54  ;;  %v350_v61 = vmul.f32 %v1161_v8, %v1246_v55  ;;  %v349_v62 = vmul.f32 %v1159_v7, %v1249_v57  ;;  %v1275_v19 = vld [vmem:[%s1155_s24 + $0xa8] sm:$0xff]  ;;  %v1278_v20 = vld [vmem:[%s1155_s24 + $0xb8] sm:$0xff] }
  0x1a   : > { %v385_v26 = vadd.f32 %v384_v23, %v336_v18  ;;  %v399_v58 = vsel %vm382_vm0, %v347_v51, 0.0  ;;  %v351_v5 = vmul.f32 %v1157_v6, %v1259_v0  ;;  %v353_v15 = vmul.f32 %v1161_v8, %v1262_v1  ;;  %v1313_v51 = vld [vmem:[%s1155_s24 + $0xe0] sm:$0xff] }
  0x1b   : > { %v403_v4 = vsel %vm382_vm0, %v350_v61, 0.0  ;;  %v352_v16 = vmul.f32 %v1159_v7, %v1265_v3  ;;  %v1323_v61 = vld [vmem:[%s1155_s24 + $0xf0] sm:$0xff] }
  0x1c   : > { %v386_v30 = vadd.f32 %v385_v26, %v337_v22  ;;  %v1281_v22 = vld [vmem:[%s1155_s24 + $0xb0] sm:$0xff]  ;;  %v407_v23 = vsel %vm382_vm0, %v353_v15, 0.0  ;;  %v354_v26 = vmul.f32 %v1157_v6, %v1275_v19 }
  0x1e   : > { %v388_v33 = vadd.f32 %v387_v28, %v386_v30  ;;  %v355_v30 = vmul.f32 %v1159_v7, %v1281_v22 }
  0x20   : > { %v389_v36 = vadd.f32 %v388_v33, %v339_v29  ;;  %v356_v29 = vmul.f32 %v1161_v8, %v1278_v20  ;;  %v1294_v33 = vld [vmem:[%s1155_s24 + $0xd0] sm:$0xff] }
  0x22   : > { %v390_v40 = vadd.f32 %v389_v36, %v340_v32  ;;  %v1291_v32 = vld [vmem:[%s1155_s24 + $0xc0] sm:$0xff] }
  0x24   : > { %v392_v43 = vadd.f32 %v391_v38, %v390_v40  ;;  %v1297_v38 = vld [vmem:[%s1155_s24 + $0xc8] sm:$0xff]  ;;  %v357_v40 = vmul.f32 %v1157_v6, %v1291_v32 }
  0x26   : > { %v393_v46 = vadd.f32 %v392_v43, %v342_v39  ;;  %v411_v39 = vsel %vm382_vm0, %v356_v29, 0.0  ;;  %v358_v43 = vmul.f32 %v1159_v7, %v1297_v38 }
  0x28   : > { %v394_v50 = vadd.f32 %v393_v46, %v343_v42  ;;  %v359_v42 = vmul.f32 %v1161_v8, %v1294_v33 }
  0x2a   : > { %v396_v53 = vadd.f32 %v395_v48, %v394_v50  ;;  %v1307_v48 = vld [vmem:[%s1155_s24 + $0xd8] sm:$0xff] }
  0x2c   : > { %v397_v56 = vadd.f32 %v396_v53, %v345_v49  ;;  %v1310_v49 = vld [vmem:[%s1155_s24 + $0xe8] sm:$0xff]  ;;  %v360_v53 = vmul.f32 %v1157_v6, %v1307_v48 }
  0x2e   : > { %v398_v60 = vadd.f32 %v397_v56, %v346_v52  ;;  %v415_v52 = vsel %vm382_vm0, %v359_v42, 0.0  ;;  %v1358_v42 = vld [vmem:[%s1155_s24 + $0x130] sm:$0xff] }
  0x30   : > { %v400_v63 = vadd.f32 %v399_v58, %v398_v60  ;;  %v362_v58 = vmul.f32 %v1161_v8, %v1310_v49 }
  0x32   : > { %v401_v2 = vadd.f32 %v400_v63, %v348_v59  ;;  %v361_v59 = vmul.f32 %v1159_v7, %v1313_v51 }
  0x34   : > { %v402_v14 = vadd.f32 %v401_v2, %v349_v62  ;;  %v1326_v62 = vld [vmem:[%s1155_s24 + $0x100] sm:$0xff]  ;;  %v1329_v2 = vld [vmem:[%s1155_s24 + $0xf8] sm:$0xff] }
  0x35   : > { %v365_v15 = vmul.f32 %v1161_v8, %v1326_v62 }
  0x36   : > { %v404_v18 = vadd.f32 %v403_v4, %v402_v14  ;;  %v419_v4 = vsel %vm382_vm0, %v362_v58, 0.0 }
  0x37   : > { %v423_v29 = vsel %vm382_vm0, %v365_v15, 0.0 }
  0x38   : > { %v405_v21 = vadd.f32 %v404_v18, %v351_v5  ;;  %v363_v5 = vmul.f32 %v1157_v6, %v1323_v61 }
  0x3a   : > { %v406_v28 = vadd.f32 %v405_v21, %v352_v16  ;;  %v364_v16 = vmul.f32 %v1159_v7, %v1329_v2  ;;  %v1339_v21 = vld [vmem:[%s1155_s24 + $0x108] sm:$0xff] }
  0x3c   : > { %v408_v31 = vadd.f32 %v407_v23, %v406_v28  ;;  %v1342_v23 = vld [vmem:[%s1155_s24 + $0x118] sm:$0xff]  ;;  %v1345_v28 = vld [vmem:[%s1155_s24 + $0x110] sm:$0xff] }
  0x3e   : > { %v409_v36 = vadd.f32 %v408_v31, %v354_v26 }
  0x40   : > { %v410_v41 = vadd.f32 %v409_v36, %v355_v30  ;;  %v366_v30 = vmul.f32 %v1157_v6, %v1339_v21  ;;  %v368_v36 = vmul.f32 %v1161_v8, %v1342_v23 }
  0x42   : > { %v412_v46 = vadd.f32 %v411_v39, %v410_v41  ;;  %v367_v39 = vmul.f32 %v1159_v7, %v1345_v28  ;;  %v1355_v41 = vld [vmem:[%s1155_s24 + $0x120] sm:$0xff] }
  0x44   : > { %v413_v50 = vadd.f32 %v412_v46, %v357_v40  ;;  %v1361_v46 = vld [vmem:[%s1155_s24 + $0x128] sm:$0xff] }
  0x45   : > { %v370_v58 = vmul.f32 %v1159_v7, %v1361_v46 }
  0x46   : > { %v414_v56 = vadd.f32 %v413_v50, %v358_v43  ;;  %v427_v50 = vsel %vm382_vm0, %v368_v36, 0.0 }
  0x48   : > { %v416_v60 = vadd.f32 %v415_v52, %v414_v56  ;;  %v369_v52 = vmul.f32 %v1157_v6, %v1355_v41  ;;  %v371_v56 = vmul.f32 %v1161_v8, %v1358_v42 }
  0x4a   : > { %v417_v63 = vadd.f32 %v416_v60, %v360_v53  ;;  %v1371_v60 = vld [vmem:[%s1155_s24 + $0x138] sm:$0xff] }
  0x4b   : > { %v372_v15 = vmul.f32 %v1157_v6, %v1371_v60 }
  0x4c   : > { %v418_v14 = vadd.f32 %v417_v63, %v361_v59  ;;  %v1374_v63 = vld [vmem:[%s1155_s24 + $0x148] sm:$0xff] }
  0x4e   : > { %v420_v18 = vadd.f32 %v419_v4, %v418_v14  ;;  %v431_v14 = vsel %vm382_vm0, %v371_v56, 0.0 }
  0x50   : > { %v421_v26 = vadd.f32 %v420_v18, %v363_v5  ;;  %v1377_v5 = vld [vmem:[%s1155_s24 + $0x140] sm:$0xff]  ;;  %v374_v18 = vmul.f32 %v1161_v8, %v1374_v63 }
  0x52   : > { %v422_v31 = vadd.f32 %v421_v26, %v364_v16  ;;  %v373_v26 = vmul.f32 %v1159_v7, %v1377_v5 }
  0x54   : > { %v424_v40 = vadd.f32 %v423_v29, %v422_v31  ;;  %v1390_v31 = vld [vmem:[%s1155_s24 + $0x160] sm:$0xff] }
  0x55   : > { %2003 = vst [vmem:[#allocation2_spill] sm:$0xff] %v1390_v31 }
  0x56   : > { %v425_v43 = vadd.f32 %v424_v40, %v366_v30  ;;  %v1387_v30 = vld [vmem:[%s1155_s24 + $0x150] sm:$0xff]  ;;  %v435_v40 = vsel %vm382_vm0, %v374_v18, 0.0 }
  0x58   : > { %v426_v53 = vadd.f32 %v425_v43, %v367_v39  ;;  %v1393_v39 = vld [vmem:[%s1155_s24 + $0x158] sm:$0xff]  ;;  %v375_v43 = vmul.f32 %v1157_v6, %v1387_v30 }
  0x59   : > { %2004 = vst [vmem:[#allocation3_spill] sm:$0xff] %v1393_v39 }
  0x5a   : > { %v428_v59 = vadd.f32 %v427_v50, %v426_v53  ;;  %v376_v53 = vmul.f32 %v1159_v7, %v1393_v39 }
  0x5c   : > { %v429_v4 = vadd.f32 %v428_v59, %v369_v52  ;;  %v377_v52 = vmul.f32 %v1161_v8, %v1390_v31  ;;  %v1406_v59 = vld [vmem:[%s1155_s24 + $0x178] sm:$0xff] }
  0x5e   : > { %v430_v16 = vadd.f32 %v429_v4, %v370_v58  ;;  %v1403_v58 = vld [vmem:[%s1155_s24 + $0x168] sm:$0xff] }
  0x60   : > { %v432_v29 = vadd.f32 %v431_v14, %v430_v16  ;;  %v1409_v14 = vld [vmem:[%s1155_s24 + $0x170] sm:$0xff]  ;;  %v378_v16 = vmul.f32 %v1157_v6, %v1403_v58 }
  0x62   : > { %v433_v36 = vadd.f32 %v432_v29, %v372_v15  ;;  %v439_v15 = vsel %vm382_vm0, %v377_v52, 0.0  ;;  %v379_v29 = vmul.f32 %v1159_v7, %v1409_v14 }
  0x64   : > { %v434_v50 = vadd.f32 %v433_v36, %v373_v26  ;;  %v380_v26 = vmul.f32 %v1161_v8, %v1406_v59 }
  0x66   : > { %v436_v56 = vadd.f32 %v435_v40, %v434_v50  ;;  %v443_v50 = vsel %vm382_vm0, %v380_v26, 0.0 }
  0x68   : > { %v437_v4 = vadd.f32 %v436_v56, %v375_v43 }
  0x6a   : > { %v438_v18 = vadd.f32 %v437_v4, %v376_v53 }
  0x6c   : > { %v440_v36 = vadd.f32 %v439_v15, %v438_v18 }
  0x6e   : > { %v441_v40 = vadd.f32 %v440_v36, %v378_v16 }
  0x70   : > { %v442_v39 = vadd.f32 %v441_v40, %v379_v29 }
  0x72   : > { %v444_v43 = vadd.f32 %v443_v50, %v442_v39 }
  0x74   : > { %445 = vadd.xlane.f32.xlu0 %v444_v43 }
  0xfd   : > { %v446_v56 = vpop.xlane.xlu0 %445 }
  0xfe   : > { %v1419_v31 = vmul.f32 0.00024414063, %v446_v56 }
 0x100   : > { %v1423_v52 = vsub.f32 %v1164_v9, %v1419_v31  ;;  %v1427_v53 = vsub.f32 %v1167_v10, %v1419_v31  ;;  %v1431_v4 = vsub.f32 %v1170_v11, %v1419_v31  ;;  %v1441_v9 = vsub.f32 %v1173_v12, %v1419_v31 }
 0x101   : > { %v1445_v10 = vsub.f32 %v1176_v13, %v1419_v31  ;;  %v1449_v11 = vsub.f32 %v1185_v17, %v1419_v31  ;;  %v1457_v12 = vsub.f32 %v1195_v24, %v1419_v31  ;;  %v1464_v43 = vsub.f32 %v1198_v25, %v1419_v31  ;;  %v658_v24 = vld [vmem:[%s1992_s1] sm:$0xff] }
 0x102   : > { %v496_v15 = vmul.f32 %v1423_v52, %v1157_v6  ;;  %v497_v39 = vmul.f32 %v1427_v53, %v1159_v7  ;;  %v498_v16 = vmul.f32 %v1431_v4, %v1161_v8  ;;  %v499_v36 = vmul.f32 %v1441_v9, %v1157_v6 }
 0x103   : > { %2005 = vst [vmem:[#allocation4_spill] sm:$0xff] %v1445_v10  ;;  %v501_v40 = vmul.f32 %v1445_v10, %v1161_v8  ;;  %v500_v13 = vmul.f32 %v1449_v11, %v1159_v7  ;;  %2006 = vst [vmem:[#allocation5_spill] sm:$0xff] %v1464_v43  ;;  %v1468_v56 = vsub.f32 %v1201_v27, %v1419_v31  ;;  %v1100_v10 = vmov 0  }
 0x104   : > { %v544_v18 = vmul.f32 %v496_v15, %v496_v15  ;;  %v545_v26 = vmul.f32 %v497_v39, %v497_v39  ;;  %v546_v29 = vmul.f32 %v498_v16, %v498_v16  ;;  %v547_v15 = vmul.f32 %v499_v36, %v499_v36  ;;  %1072 = vset.pattern.permute.xlu1 %v1100_v10 }
 0x105   : > { %v549_v16 = vmul.f32 %v501_v40, %v501_v40  ;;  %v504_v25 = vmul.f32 %v1464_v43, %v1161_v8  ;;  %1073 = vset.pattern.permute.xlu0 %v1100_v10  ;;  %v1479_v27 = vsub.f32 %v1211_v34, %v1419_v31  ;;  %v503_v36 = vmul.f32 %v1468_v56, %v1159_v7 }
 0x106   : > { %v592_v50 = vadd.f32 %v545_v26, %v544_v18  ;;  %v593_v17 = vsel %vm382_vm0, %v546_v29, 0.0  ;;  %v502_v18 = vmul.f32 %v1457_v12, %v1157_v6  ;;  %v548_v26 = vmul.f32 %v500_v13, %v500_v13  ;;  %712 = vperm.xlu1 %1072, %v658_v24  }
 0x107   : > { %v597_v13 = vsel %vm382_vm0, %v549_v16, 0.0  ;;  %v1493_v10 = vsub.f32 %v1217_v37, %v1419_v31  ;;  %v505_v24 = vmul.f32 %v1479_v27, %v1157_v6  ;;  %v1501_v16 = vsub.f32 %v1227_v44, %v1419_v31 }
 0x108   : > { %v594_v39 = vadd.f32 %v593_v17, %v592_v50  ;;  %v1485_v50 = vsub.f32 %v1214_v35, %v1419_v31  ;;  %v659_v17 = vld [vmem:[%s1993_s2] sm:$0xff]  ;;  %v550_v34 = vmul.f32 %v502_v18, %v502_v18  ;;  %v1507_v18 = vsub.f32 %v1230_v45, %v1419_v31 }
 0x109   : > { %v506_v37 = vmul.f32 %v1493_v10, %v1159_v7  ;;  %v508_v44 = vmul.f32 %v1501_v16, %v1157_v6  ;;  %v1520_v45 = vsub.f32 %v1243_v54, %v1419_v31 }
 0x10a   : > { %v595_v29 = vadd.f32 %v594_v39, %v547_v15  ;;  %v552_v39 = vmul.f32 %v504_v25, %v504_v25  ;;  %765 = vperm.xlu1 %1072, %v659_v17   ;;  %v507_v35 = vmul.f32 %v1485_v50, %v1161_v8 }
 0x10b   : > { %v511_v54 = vmul.f32 %v1520_v45, %v1157_v6 }
 0x10c   : > { %v596_v40 = vadd.f32 %v595_v29, %v548_v26  ;;  %v551_v26 = vmul.f32 %v503_v36, %v503_v36  ;;  %v601_v25 = vsel %vm382_vm0, %v552_v39, 0.0  ;;  %v1512_v36 = vsub.f32 %v1233_v47, %v1419_v31 }
 0x10d   : > { %v555_v17 = vmul.f32 %v507_v35, %v507_v35  ;;  %v556_v35 = vmul.f32 %v508_v44, %v508_v44  ;;  %v1545_v44 = vsub.f32 %v1262_v1, %v1419_v31  ;;  %v1558_v1 = vsub.f32 %v1275_v19, %v1419_v31 }
 0x10e   : > { %v598_v15 = vadd.f32 %v597_v13, %v596_v40  ;;  %v553_v40 = vmul.f32 %v505_v24, %v505_v24  ;;  %v509_v39 = vmul.f32 %v1512_v36, %v1159_v7 }
 0x10f   : > { %v605_v24 = vsel %vm382_vm0, %v555_v17, 0.0  ;;  %v517_v19 = vmul.f32 %v1558_v1, %v1157_v6 }
 0x110   : > { %v599_v29 = vadd.f32 %v598_v15, %v550_v34  ;;  %v554_v34 = vmul.f32 %v506_v37, %v506_v37 }
 0x112   : > { %v600_v43 = vadd.f32 %v599_v29, %v551_v26  ;;  %v510_v26 = vmul.f32 %v1507_v18, %v1161_v8  ;;  %v1531_v29 = vsub.f32 %v1249_v57, %v1419_v31 }
 0x114   : > { %v602_v13 = vadd.f32 %v601_v25, %v600_v43  ;;  %v1526_v43 = vsub.f32 %v1246_v55, %v1419_v31  ;;  %v558_v25 = vmul.f32 %v510_v26, %v510_v26  ;;  %v1539_v55 = vsub.f32 %v1259_v0, %v1419_v31 }
 0x115   : > { %v512_v17 = vmul.f32 %v1531_v29, %v1159_v7  ;;  %v1550_v26 = vsub.f32 %v1265_v3, %v1419_v31 }
 0x116   : > { %v603_v15 = vadd.f32 %v602_v13, %v553_v40  ;;  %v557_v40 = vmul.f32 %v509_v39, %v509_v39  ;;  %v559_v39 = vmul.f32 %v511_v54, %v511_v54  ;;  %v514_v0 = vmul.f32 %v1539_v55, %v1157_v6 }
 0x117   : > { %v1564_v54 = vsub.f32 %v1278_v20, %v1419_v31  ;;  %v1577_v20 = vsub.f32 %v1291_v32, %v1419_v31 }
 0x118   : > { %v604_v47 = vadd.f32 %v603_v15, %v554_v34  ;;  %v513_v34 = vmul.f32 %v1526_v43, %v1161_v8  ;;  %v609_v15 = vsel %vm382_vm0, %v558_v25, 0.0  ;;  %v515_v25 = vmul.f32 %v1550_v26, %v1159_v7 }
 0x119   : > { %v520_v32 = vmul.f32 %v1577_v20, %v1157_v6 }
 0x11a   : > { %v606_v37 = vadd.f32 %v605_v24, %v604_v47  ;;  %v561_v24 = vmul.f32 %v513_v34, %v513_v34  ;;  %v1569_v34 = vsub.f32 %v1281_v22, %v1419_v31 }
 0x11c   : > { %v607_v13 = vadd.f32 %v606_v37, %v556_v35  ;;  %v560_v35 = vmul.f32 %v512_v17, %v512_v17  ;;  %v562_v17 = vmul.f32 %v514_v0, %v514_v0  ;;  %v1583_v0 = vsub.f32 %v1294_v33, %v1419_v31 }
 0x11d   : > { %v1596_v33 = vsub.f32 %v1307_v48, %v1419_v31 }
 0x11e   : > { %v608_v57 = vadd.f32 %v607_v13, %v557_v40  ;;  %v516_v40 = vmul.f32 %v1545_v44, %v1161_v8  ;;  %v613_v13 = vsel %vm382_vm0, %v561_v24, 0.0  ;;  %v518_v24 = vmul.f32 %v1569_v34, %v1159_v7 }
 0x11f   : > { %v523_v48 = vmul.f32 %v1596_v33, %v1157_v6 }
 0x120   : > { %v610_v47 = vadd.f32 %v609_v15, %v608_v57  ;;  %v564_v15 = vmul.f32 %v516_v40, %v516_v40  ;;  %v1588_v40 = vsub.f32 %v1297_v38, %v1419_v31 }
 0x122   : > { %v611_v37 = vadd.f32 %v610_v47, %v559_v39  ;;  %v563_v39 = vmul.f32 %v515_v25, %v515_v25  ;;  %v565_v25 = vmul.f32 %v517_v19, %v517_v19  ;;  %v1602_v19 = vsub.f32 %v1310_v49, %v1419_v31 }
 0x123   : > { %v1615_v49 = vsub.f32 %v1323_v61, %v1419_v31 }
 0x124   : > { %v612_v3 = vadd.f32 %v611_v37, %v560_v35  ;;  %v519_v35 = vmul.f32 %v1564_v54, %v1161_v8  ;;  %v617_v37 = vsel %vm382_vm0, %v564_v15, 0.0  ;;  %v521_v15 = vmul.f32 %v1588_v40, %v1159_v7 }
 0x125   : > { %v526_v61 = vmul.f32 %v1615_v49, %v1157_v6 }
 0x126   : > { %v614_v57 = vadd.f32 %v613_v13, %v612_v3  ;;  %v567_v13 = vmul.f32 %v519_v35, %v519_v35  ;;  %v1607_v35 = vsub.f32 %v1313_v51, %v1419_v31 }
 0x128   : > { %v615_v47 = vadd.f32 %v614_v57, %v562_v17  ;;  %v566_v17 = vmul.f32 %v518_v24, %v518_v24  ;;  %v568_v24 = vmul.f32 %v520_v32, %v520_v32  ;;  %v1621_v32 = vsub.f32 %v1326_v62, %v1419_v31 }
 0x129   : > { %v1634_v62 = vsub.f32 %v1339_v21, %v1419_v31 }
 0x12a   : > { %v616_v22 = vadd.f32 %v615_v47, %v563_v39  ;;  %v522_v39 = vmul.f32 %v1583_v0, %v1161_v8  ;;  %v621_v47 = vsel %vm382_vm0, %v567_v13, 0.0  ;;  %v524_v13 = vmul.f32 %v1607_v35, %v1159_v7 }
 0x12b   : > { %v529_v21 = vmul.f32 %v1634_v62, %v1157_v6 }
 0x12c   : > { %v618_v3 = vadd.f32 %v617_v37, %v616_v22  ;;  %v570_v37 = vmul.f32 %v522_v39, %v522_v39  ;;  %v1626_v39 = vsub.f32 %v1329_v2, %v1419_v31 }
 0x12e   : > { %v619_v57 = vadd.f32 %v618_v3, %v565_v25  ;;  %v569_v25 = vmul.f32 %v521_v15, %v521_v15  ;;  %v571_v15 = vmul.f32 %v523_v48, %v523_v48  ;;  %v1640_v48 = vsub.f32 %v1342_v23, %v1419_v31 }
 0x12f   : > { %v1653_v23 = vsub.f32 %v1355_v41, %v1419_v31 }
 0x130   : > { %v620_v38 = vadd.f32 %v619_v57, %v566_v17  ;;  %v525_v17 = vmul.f32 %v1602_v19, %v1161_v8  ;;  %v625_v57 = vsel %vm382_vm0, %v570_v37, 0.0  ;;  %v527_v37 = vmul.f32 %v1626_v39, %v1159_v7 }
 0x131   : > { %v532_v41 = vmul.f32 %v1653_v23, %v1157_v6 }
 0x132   : > { %v622_v22 = vadd.f32 %v621_v47, %v620_v38  ;;  %v573_v47 = vmul.f32 %v525_v17, %v525_v17  ;;  %v1645_v17 = vsub.f32 %v1345_v28, %v1419_v31 }
 0x134   : > { %v623_v3 = vadd.f32 %v622_v22, %v568_v24  ;;  %v572_v24 = vmul.f32 %v524_v13, %v524_v13  ;;  %v574_v13 = vmul.f32 %v526_v61, %v526_v61  ;;  %v1659_v61 = vsub.f32 %v1358_v42, %v1419_v31 }
 0x135   : > { %v1672_v42 = vsub.f32 %v1371_v60, %v1419_v31 }
 0x136   : > { %v624_v51 = vadd.f32 %v623_v3, %v569_v25  ;;  %v528_v25 = vmul.f32 %v1621_v32, %v1161_v8  ;;  %v629_v3 = vsel %vm382_vm0, %v573_v47, 0.0  ;;  %v530_v47 = vmul.f32 %v1645_v17, %v1159_v7 }
 0x137   : > { %2007 = vst [vmem:[#allocation6_spill] sm:$0xff] %v1672_v42  ;;  %v535_v60 = vmul.f32 %v1672_v42, %v1157_v6 }
 0x138   : > { %v626_v38 = vadd.f32 %v625_v57, %v624_v51  ;;  %v576_v57 = vmul.f32 %v528_v25, %v528_v25  ;;  %v1664_v25 = vsub.f32 %v1361_v46, %v1419_v31 }
 0x13a   : > { %v627_v22 = vadd.f32 %v626_v38, %v571_v15  ;;  %v575_v15 = vmul.f32 %v527_v37, %v527_v37  ;;  %v577_v37 = vmul.f32 %v529_v21, %v529_v21  ;;  %v1678_v21 = vsub.f32 %v1374_v63, %v1419_v31 }
 0x13b   : > { %v1691_v63 = vsub.f32 %v1387_v30, %v1419_v31 }
 0x13c   : > { %v628_v2 = vadd.f32 %v627_v22, %v572_v24  ;;  %v531_v24 = vmul.f32 %v1640_v48, %v1161_v8  ;;  %v633_v22 = vsel %vm382_vm0, %v576_v57, 0.0  ;;  %v533_v57 = vmul.f32 %v1664_v25, %v1159_v7  ;;  %2008 = vst [vmem:[#allocation7_spill] sm:$0xff] %v1678_v21 }
 0x13d   : > { %v538_v30 = vmul.f32 %v1691_v63, %v1157_v6 }
 0x13e   : > { %v630_v51 = vadd.f32 %v629_v3, %v628_v2  ;;  %v579_v3 = vmul.f32 %v531_v24, %v531_v24  ;;  %v1683_v24 = vsub.f32 %v1377_v5, %v1419_v31 }
 0x140   : > { %v631_v38 = vadd.f32 %v630_v51, %v574_v13  ;;  %v578_v13 = vmul.f32 %v530_v47, %v530_v47  ;;  %v580_v47 = vmul.f32 %v532_v41, %v532_v41  ;;  %v2009_v41 = vld [vmem:[#allocation2_spill] sm:$0xff] }
 0x142   : > { %v632_v28 = vadd.f32 %v631_v38, %v575_v15  ;;  %v534_v15 = vmul.f32 %v1659_v61, %v1161_v8  ;;  %v637_v38 = vsel %vm382_vm0, %v579_v3, 0.0  ;;  %v536_v3 = vmul.f32 %v1683_v24, %v1159_v7 }
 0x144   : > { %v634_v2 = vadd.f32 %v633_v22, %v632_v28  ;;  %v582_v22 = vmul.f32 %v534_v15, %v534_v15 }
 0x146   : > { %v635_v51 = vadd.f32 %v634_v2, %v577_v37  ;;  %v581_v37 = vmul.f32 %v533_v57, %v533_v57  ;;  %v641_v15 = vsel %vm382_vm0, %v582_v22, 0.0  ;;  %v2011_v57 = vld [vmem:[#allocation3_spill] sm:$0xff] }
 0x148   : > { %v636_v46 = vadd.f32 %v635_v51, %v578_v13  ;;  %v537_v13 = vmul.f32 %v1678_v21, %v1161_v8  ;;  %v1697_v51 = vsub.f32 %v2009_v41, %v1419_v31  ;;  %v584_v21 = vmul.f32 %v536_v3, %v536_v3 }
 0x149   : > { %v1721_v3 = vsub.f32 %v1409_v14, %v1419_v31 }
 0x14a   : > { %v638_v28 = vadd.f32 %v637_v38, %v636_v46  ;;  %2010 = vst [vmem:[#allocation2_spill] sm:$0xff] %v1697_v51  ;;  %v1702_v46 = vsub.f32 %v2011_v57, %v1419_v31  ;;  %v583_v38 = vmul.f32 %v535_v60, %v535_v60  ;;  %v1716_v60 = vsub.f32 %v1406_v59, %v1419_v31 }
 0x14b   : > { %v542_v59 = vmul.f32 %v1721_v3, %v1159_v7 }
 0x14c   : > { %v639_v2 = vadd.f32 %v638_v28, %v580_v47  ;;  %v585_v28 = vmul.f32 %v537_v13, %v537_v13  ;;  %v539_v22 = vmul.f32 %v1702_v46, %v1159_v7 }
 0x14e   : > { %v640_v5 = vadd.f32 %v639_v2, %v581_v37  ;;  %v540_v37 = vmul.f32 %v1697_v51, %v1161_v8  ;;  %v1710_v2 = vsub.f32 %v1403_v58, %v1419_v31  ;;  %v645_v13 = vsel %vm382_vm0, %v585_v28, 0.0 }
 0x150   : > { %v642_v47 = vadd.f32 %v641_v15, %v640_v5  ;;  %v586_v5 = vmul.f32 %v538_v30, %v538_v30  ;;  %v588_v57 = vmul.f32 %v540_v37, %v540_v37  ;;  %v541_v58 = vmul.f32 %v1710_v2, %v1157_v6 }
 0x151   : > { %v590_v30 = vmul.f32 %v542_v59, %v542_v59 }
 0x152   : > { %v643_v42 = vadd.f32 %v642_v47, %v583_v38  ;;  %v587_v38 = vmul.f32 %v539_v22, %v539_v22  ;;  %v649_v28 = vsel %vm382_vm0, %v588_v57, 0.0  ;;  %v589_v51 = vmul.f32 %v541_v58, %v541_v58 }
 0x154   : > { %v644_v41 = vadd.f32 %v643_v42, %v584_v21  ;;  %v543_v42 = vmul.f32 %v1716_v60, %v1161_v8 }
 0x156   : > { %v646_v15 = vadd.f32 %v645_v13, %v644_v41  ;;  %v591_v14 = vmul.f32 %v543_v42, %v543_v42 }
 0x158   : > { %v647_v47 = vadd.f32 %v646_v15, %v586_v5  ;;  %v653_v13 = vsel %vm382_vm0, %v591_v14, 0.0 }
 0x15a   : > { %v648_v21 = vadd.f32 %v647_v47, %v587_v38  ;;  %v2012_v47 = vld [vmem:[#allocation4_spill] sm:$0xff] }
 0x15c   : > { %v650_v31 = vadd.f32 %v649_v28, %v648_v21  ;;  %v2013_v28 = vld [vmem:[#allocation5_spill] sm:$0xff] }
 0x15e   : > { %v651_v41 = vadd.f32 %v650_v31, %v589_v51 }
 0x160   : > { %v652_v37 = vadd.f32 %v651_v41, %v590_v30 }
 0x162   : > { %v654_v6 = vadd.f32 %v653_v13, %v652_v37  ;;  %v2014_v37 = vld [vmem:[#allocation6_spill] sm:$0xff]  ;;  %v2015_v13 = vld [vmem:[#allocation7_spill] sm:$0xff] }
 0x164   : > { %655 = vadd.xlane.f32.xlu0 %v654_v6 }
 0x181   : > { %v713_v6 = vpop.permute.xlu1 %712 }
 0x1ed   : > { %v656_v22 = vpop.xlane.xlu0 %655 }
 0x1ee   : > { %v657_v5 = vmul.f32 0.00024414063, %v656_v22 }
 0x1f0   : > { %v660_v15 = vadd.f32 1e-05, %v657_v5 }
 0x1f2   : > { %1074 = vrsqrt.f32 %v660_v15 }
 0x1ff   : > { %v1075_v8 = vpop.eup %1074 }
 0x200   : > { %v662_v7 = vmul.f32 %v1075_v8, %v1423_v52  ;;  %v663_v38 = vmul.f32 %v1075_v8, %v1427_v53  ;;  %v664_v57 = vmul.f32 %v1075_v8, %v1431_v4  ;;  %v665_v58 = vmul.f32 %v1075_v8, %v1441_v9 }
 0x201   : > { %v666_v51 = vmul.f32 %v1075_v8, %v1449_v11  ;;  %v667_v42 = vmul.f32 %v1075_v8, %v2012_v47  ;;  %v668_v59 = vmul.f32 %v1075_v8, %v1457_v12  ;;  %v669_v21 = vmul.f32 %v1075_v8, %v1468_v56 }
 0x202   : > { %v670_v31 = vmul.f32 %v1075_v8, %v2013_v28  ;;  %v671_v14 = vmul.f32 %v1075_v8, %v1479_v27  ;;  %v672_v52 = vmul.f32 %v1075_v8, %v1493_v10  ;;  %v673_v53 = vmul.f32 %v1075_v8, %v1485_v50 }
 0x203   : > { %v674_v4 = vmul.f32 %v1075_v8, %v1501_v16  ;;  %v675_v9 = vmul.f32 %v1075_v8, %v1512_v36  ;;  %v676_v11 = vmul.f32 %v1075_v8, %v1507_v18  ;;  %v677_v30 = vmul.f32 %v1075_v8, %v1520_v45 }
 0x204   : > { %v678_v12 = vmul.f32 %v1075_v8, %v1531_v29  ;;  %v679_v56 = vmul.f32 %v1075_v8, %v1526_v43  ;;  %v680_v41 = vmul.f32 %v1075_v8, %v1539_v55  ;;  %v681_v27 = vmul.f32 %v1075_v8, %v1550_v26 }
 0x205   : > { %v682_v10 = vmul.f32 %v1075_v8, %v1545_v44  ;;  %v683_v50 = vmul.f32 %v1075_v8, %v1558_v1  ;;  %v684_v16 = vmul.f32 %v1075_v8, %v1569_v34  ;;  %v685_v36 = vmul.f32 %v1075_v8, %v1564_v54 }
 0x206   : > { %v686_v18 = vmul.f32 %v1075_v8, %v1577_v20  ;;  %v687_v45 = vmul.f32 %v1075_v8, %v1588_v40  ;;  %v688_v29 = vmul.f32 %v1075_v8, %v1583_v0  ;;  %v689_v43 = vmul.f32 %v1075_v8, %v1596_v33 }
 0x207   : > { %v690_v55 = vmul.f32 %v1075_v8, %v1607_v35  ;;  %v691_v26 = vmul.f32 %v1075_v8, %v1602_v19  ;;  %v692_v44 = vmul.f32 %v1075_v8, %v1615_v49  ;;  %v693_v1 = vmul.f32 %v1075_v8, %v1626_v39 }
 0x208   : > { %v694_v34 = vmul.f32 %v1075_v8, %v1621_v32  ;;  %v695_v54 = vmul.f32 %v1075_v8, %v1634_v62  ;;  %v696_v20 = vmul.f32 %v1075_v8, %v1645_v17  ;;  %v697_v40 = vmul.f32 %v1075_v8, %v1640_v48  ;;  %v2016_v17 = vld [vmem:[#allocation2_spill] sm:$0xff] }
 0x209   : > { %v698_v0 = vmul.f32 %v1075_v8, %v1653_v23  ;;  %v699_v33 = vmul.f32 %v1075_v8, %v1664_v25  ;;  %v700_v35 = vmul.f32 %v1075_v8, %v1659_v61  ;;  %v701_v19 = vmul.f32 %v1075_v8, %v2014_v37 }
 0x20a   : > { %v702_v49 = vmul.f32 %v1075_v8, %v1683_v24  ;;  %v703_v39 = vmul.f32 %v1075_v8, %v2015_v13  ;;  %v704_v32 = vmul.f32 %v1075_v8, %v1691_v63  ;;  %v705_v62 = vmul.f32 %v1075_v8, %v1702_v46 }
 0x20b   : > { %v706_v22 = vmul.f32 %v1075_v8, %v2016_v17  ;;  %v707_v48 = vmul.f32 %v1075_v8, %v1710_v2  ;;  %v708_v23 = vmul.f32 %v1075_v8, %v1721_v3  ;;  %v709_v25 = vmul.f32 %v1075_v8, %v1716_v60 }
 0x20c   : > { %v715_v61 = vmul.f32 %v713_v6, %v662_v7  ;;  %v716_v5 = vmul.f32 %v713_v6, %v663_v38  ;;  %v717_v15 = vmul.f32 %v713_v6, %v664_v57  ;;  %v718_v47 = vmul.f32 %v713_v6, %v665_v58 }
 0x20d   : > { %v719_v24 = vmul.f32 %v713_v6, %v666_v51  ;;  %v720_v28 = vmul.f32 %v713_v6, %v667_v42  ;;  %v721_v37 = vmul.f32 %v713_v6, %v668_v59  ;;  %v722_v13 = vmul.f32 %v713_v6, %v669_v21 }
 0x20e   : > { %v723_v63 = vmul.f32 %v713_v6, %v670_v31  ;;  %v724_v46 = vmul.f32 %v713_v6, %v671_v14  ;;  %v725_v17 = vmul.f32 %v713_v6, %v672_v52  ;;  %v726_v2 = vmul.f32 %v713_v6, %v673_v53 }
 0x20f   : > { %v727_v3 = vmul.f32 %v713_v6, %v674_v4  ;;  %v728_v8 = vmul.f32 %v713_v6, %v675_v9  ;;  %v729_v60 = vmul.f32 %v713_v6, %v676_v11  ;;  %v730_v7 = vmul.f32 %v713_v6, %v677_v30 }
 0x210   : > { %v731_v38 = vmul.f32 %v713_v6, %v678_v12  ;;  %v732_v57 = vmul.f32 %v713_v6, %v679_v56  ;;  %v733_v58 = vmul.f32 %v713_v6, %v680_v41  ;;  %v734_v51 = vmul.f32 %v713_v6, %v681_v27 }
 0x211   : > { %v735_v42 = vmul.f32 %v713_v6, %v682_v10  ;;  %v736_v59 = vmul.f32 %v713_v6, %v683_v50  ;;  %v737_v21 = vmul.f32 %v713_v6, %v684_v16  ;;  %v738_v31 = vmul.f32 %v713_v6, %v685_v36 }
 0x212   : > { %v739_v14 = vmul.f32 %v713_v6, %v686_v18  ;;  %v740_v52 = vmul.f32 %v713_v6, %v687_v45  ;;  %v741_v53 = vmul.f32 %v713_v6, %v688_v29  ;;  %v742_v4 = vmul.f32 %v713_v6, %v689_v43 }
 0x213   : > { %v743_v9 = vmul.f32 %v713_v6, %v690_v55  ;;  %v744_v11 = vmul.f32 %v713_v6, %v691_v26  ;;  %v745_v30 = vmul.f32 %v713_v6, %v692_v44  ;;  %v746_v12 = vmul.f32 %v713_v6, %v693_v1  ;;  %v766_v26 = vpop.permute.xlu1 %765 }
 0x214   : > { %v747_v56 = vmul.f32 %v713_v6, %v694_v34  ;;  %v748_v41 = vmul.f32 %v713_v6, %v695_v54  ;;  %v749_v27 = vmul.f32 %v713_v6, %v696_v20  ;;  %v750_v10 = vmul.f32 %v713_v6, %v697_v40 }
 0x215   : > { %v751_v50 = vmul.f32 %v713_v6, %v698_v0  ;;  %v752_v16 = vmul.f32 %v713_v6, %v699_v33  ;;  %v753_v36 = vmul.f32 %v713_v6, %v700_v35  ;;  %v754_v18 = vmul.f32 %v713_v6, %v701_v19 }
 0x216   : > { %v755_v45 = vmul.f32 %v713_v6, %v702_v49  ;;  %v756_v29 = vmul.f32 %v713_v6, %v703_v39  ;;  %v757_v43 = vmul.f32 %v713_v6, %v704_v32  ;;  %v758_v55 = vmul.f32 %v713_v6, %v705_v62 }
 0x217   : > { %v759_v44 = vmul.f32 %v713_v6, %v706_v22  ;;  %v760_v1 = vmul.f32 %v713_v6, %v707_v48  ;;  %v761_v34 = vmul.f32 %v713_v6, %v708_v23  ;;  %v762_v54 = vmul.f32 %v713_v6, %v709_v25 }
 0x218   : > { %v768_v20 = vadd.f32 %v766_v26, %v715_v61  ;;  %v769_v40 = vadd.f32 %v766_v26, %v716_v5  ;;  %v770_v0 = vadd.f32 %v766_v26, %v717_v15  ;;  %v771_v33 = vadd.f32 %v766_v26, %v718_v47 }
 0x219   : > { %v1779_v35 = vadd.f32 %v766_v26, %v719_v24  ;;  %v1781_v19 = vadd.f32 %v766_v26, %v720_v28  ;;  %v1783_v49 = vadd.f32 %v766_v26, %v721_v37  ;;  %v1785_v39 = vadd.f32 %v766_v26, %v722_v13 }
 0x21a   : > { %v1787_v32 = vadd.f32 %v766_v26, %v723_v63  ;;  %v1789_v62 = vadd.f32 %v766_v26, %v724_v46  ;;  %v1791_v22 = vadd.f32 %v766_v26, %v725_v17  ;;  %v1793_v48 = vadd.f32 %v766_v26, %v726_v2 }
 0x21b   : > { %v1795_v6 = vadd.f32 %v766_v26, %v727_v3  ;;  %v1797_v23 = vadd.f32 %v766_v26, %v728_v8  ;;  %v1799_v25 = vadd.f32 %v766_v26, %v729_v60  ;;  %v1801_v61 = vadd.f32 %v766_v26, %v730_v7 }
 0x21c   : > { %v1803_v5 = vadd.f32 %v766_v26, %v731_v38  ;;  %v1805_v15 = vadd.f32 %v766_v26, %v732_v57  ;;  %v1807_v47 = vadd.f32 %v766_v26, %v733_v58  ;;  %v1809_v24 = vadd.f32 %v766_v26, %v734_v51 }
 0x21d   : > { %v1811_v28 = vadd.f32 %v766_v26, %v735_v42  ;;  %v1813_v37 = vadd.f32 %v766_v26, %v736_v59  ;;  %v1815_v13 = vadd.f32 %v766_v26, %v737_v21  ;;  %v1817_v63 = vadd.f32 %v766_v26, %v738_v31 }
 0x21e   : > { %v1819_v46 = vadd.f32 %v766_v26, %v739_v14  ;;  %v1821_v17 = vadd.f32 %v766_v26, %v740_v52  ;;  %v1823_v2 = vadd.f32 %v766_v26, %v741_v53  ;;  %v1825_v3 = vadd.f32 %v766_v26, %v742_v4 }
 0x21f   : > { %v1827_v8 = vadd.f32 %v766_v26, %v743_v9  ;;  %v1829_v60 = vadd.f32 %v766_v26, %v744_v11  ;;  %v1831_v7 = vadd.f32 %v766_v26, %v745_v30  ;;  %v1833_v38 = vadd.f32 %v766_v26, %v746_v12 }
 0x220   : > { %v1835_v57 = vadd.f32 %v766_v26, %v747_v56  ;;  %v1837_v58 = vadd.f32 %v766_v26, %v748_v41  ;;  %v1839_v51 = vadd.f32 %v766_v26, %v749_v27  ;;  %v1841_v42 = vadd.f32 %v766_v26, %v750_v10 }
 0x221   : > { %v1843_v59 = vadd.f32 %v766_v26, %v751_v50  ;;  %v1845_v21 = vadd.f32 %v766_v26, %v752_v16  ;;  %v1847_v31 = vadd.f32 %v766_v26, %v753_v36  ;;  %v1849_v14 = vadd.f32 %v766_v26, %v754_v18 }
 0x222   : > { %v1851_v52 = vadd.f32 %v766_v26, %v755_v45  ;;  %v1853_v53 = vadd.f32 %v766_v26, %v756_v29  ;;  %v1855_v4 = vadd.f32 %v766_v26, %v757_v43  ;;  %v1857_v9 = vadd.f32 %v766_v26, %v758_v55 }
 0x223   : > { %v1866_v11 = vadd.f32 %v766_v26, %v759_v44  ;;  %v1868_v30 = vadd.f32 %v766_v26, %v760_v1  ;;  %v1870_v12 = vadd.f32 %v766_v26, %v761_v34  ;;  %v1872_v56 = vadd.f32 %v766_v26, %v762_v54 }
 0x224   : > { %v816_v41 = vmax.f32 %v768_v20, 0.0  ;;  %v817_v27 = vmax.f32 %v769_v40, 0.0  ;;  %v818_v10 = vmax.f32 %v770_v0, 0.0  ;;  %v819_v50 = vmax.f32 %v771_v33, 0.0 }
 0x225   : > { %v820_v16 = vmax.f32 %v1779_v35, 0.0  ;;  %v821_v36 = vmax.f32 %v1781_v19, 0.0  ;;  %v822_v18 = vmax.f32 %v1783_v49, 0.0  ;;  %v823_v45 = vmax.f32 %v1785_v39, 0.0 }
 0x226   : > { %v824_v29 = vmax.f32 %v1787_v32, 0.0  ;;  %v825_v43 = vmax.f32 %v1789_v62, 0.0  ;;  %v826_v55 = vmax.f32 %v1791_v22, 0.0  ;;  %v827_v26 = vmax.f32 %v1793_v48, 0.0  ;;  %864 = vst [vmem:[%s1864_s5] sm:$0xff] %v816_v41  ;;  %865 = vst [vmem:[%s1864_s5 + $0x8] sm:$0xff] %v817_v27 }
 0x227   : > { %866 = vst.msk [vmem:[%s1864_s5 + $0x10] sm:$0xff] %vm382_vm0, %v818_v10  ;;  %867 = vst [vmem:[%s1864_s5 + $0x18] sm:$0xff] %v819_v50  ;;  %v828_v44 = vmax.f32 %v1795_v6, 0.0  ;;  %v829_v1 = vmax.f32 %v1797_v23, 0.0  ;;  %v830_v34 = vmax.f32 %v1799_v25, 0.0  ;;  %v831_v54 = vmax.f32 %v1801_v61, 0.0 }
 0x228   : > { %868 = vst [vmem:[%s1864_s5 + $0x20] sm:$0xff] %v820_v16  ;;  %869 = vst.msk [vmem:[%s1864_s5 + $0x28] sm:$0xff] %vm382_vm0, %v821_v36  ;;  %v832_v20 = vmax.f32 %v1803_v5, 0.0  ;;  %v833_v40 = vmax.f32 %v1805_v15, 0.0  ;;  %v834_v0 = vmax.f32 %v1807_v47, 0.0  ;;  %v835_v33 = vmax.f32 %v1809_v24, 0.0 }
 0x229   : > { %870 = vst [vmem:[%s1864_s5 + $0x30] sm:$0xff] %v822_v18  ;;  %871 = vst [vmem:[%s1864_s5 + $0x38] sm:$0xff] %v823_v45  ;;  %v836_v35 = vmax.f32 %v1811_v28, 0.0  ;;  %v837_v19 = vmax.f32 %v1813_v37, 0.0  ;;  %v838_v49 = vmax.f32 %v1815_v13, 0.0  ;;  %v839_v39 = vmax.f32 %v1817_v63, 0.0 }
 0x22a   : > { %872 = vst.msk [vmem:[%s1864_s5 + $0x40] sm:$0xff] %vm382_vm0, %v824_v29  ;;  %873 = vst [vmem:[%s1864_s5 + $0x48] sm:$0xff] %v825_v43  ;;  %v840_v32 = vmax.f32 %v1819_v46, 0.0  ;;  %v841_v62 = vmax.f32 %v1821_v17, 0.0  ;;  %v842_v22 = vmax.f32 %v1823_v2, 0.0  ;;  %v843_v48 = vmax.f32 %v1825_v3, 0.0 }
 0x22b   : > { %874 = vst [vmem:[%s1864_s5 + $0x50] sm:$0xff] %v826_v55  ;;  %875 = vst.msk [vmem:[%s1864_s5 + $0x58] sm:$0xff] %vm382_vm0, %v827_v26  ;;  %v844_v6 = vmax.f32 %v1827_v8, 0.0  ;;  %v845_v23 = vmax.f32 %v1829_v60, 0.0  ;;  %v846_v25 = vmax.f32 %v1831_v7, 0.0  ;;  %v847_v61 = vmax.f32 %v1833_v38, 0.0 }
 0x22c   : > { %876 = vst [vmem:[%s1864_s5 + $0x60] sm:$0xff] %v828_v44  ;;  %877 = vst [vmem:[%s1864_s5 + $0x68] sm:$0xff] %v829_v1  ;;  %v848_v5 = vmax.f32 %v1835_v57, 0.0  ;;  %v849_v15 = vmax.f32 %v1837_v58, 0.0  ;;  %v850_v47 = vmax.f32 %v1839_v51, 0.0  ;;  %v851_v24 = vmax.f32 %v1841_v42, 0.0 }
 0x22d   : > { %878 = vst.msk [vmem:[%s1864_s5 + $0x70] sm:$0xff] %vm382_vm0, %v830_v34  ;;  %879 = vst [vmem:[%s1864_s5 + $0x78] sm:$0xff] %v831_v54  ;;  %v852_v28 = vmax.f32 %v1843_v59, 0.0  ;;  %v853_v37 = vmax.f32 %v1845_v21, 0.0  ;;  %v854_v13 = vmax.f32 %v1847_v31, 0.0  ;;  %v855_v63 = vmax.f32 %v1849_v14, 0.0 }
 0x22e   : > { %880 = vst [vmem:[%s1864_s5 + $0x80] sm:$0xff] %v832_v20  ;;  %881 = vst.msk [vmem:[%s1864_s5 + $0x88] sm:$0xff] %vm382_vm0, %v833_v40  ;;  %v856_v46 = vmax.f32 %v1851_v52, 0.0  ;;  %v857_v17 = vmax.f32 %v1853_v53, 0.0  ;;  %v858_v2 = vmax.f32 %v1855_v4, 0.0  ;;  %v859_v3 = vmax.f32 %v1857_v9, 0.0 }
 0x22f   : > { %882 = vst [vmem:[%s1864_s5 + $0x90] sm:$0xff] %v834_v0  ;;  %883 = vst [vmem:[%s1864_s5 + $0x98] sm:$0xff] %v835_v33  ;;  %v860_v8 = vmax.f32 %v1866_v11, 0.0  ;;  %v861_v60 = vmax.f32 %v1868_v30, 0.0  ;;  %v862_v7 = vmax.f32 %v1870_v12, 0.0  ;;  %v863_v38 = vmax.f32 %v1872_v56, 0.0 }
 0x230   : > { %884 = vst.msk [vmem:[%s1864_s5 + $0xa0] sm:$0xff] %vm382_vm0, %v836_v35  ;;  %885 = vst [vmem:[%s1864_s5 + $0xa8] sm:$0xff] %v837_v19 }
 0x231   : > { %886 = vst [vmem:[%s1864_s5 + $0xb0] sm:$0xff] %v838_v49  ;;  %887 = vst.msk [vmem:[%s1864_s5 + $0xb8] sm:$0xff] %vm382_vm0, %v839_v39 }
 0x232   : > { %888 = vst [vmem:[%s1864_s5 + $0xc0] sm:$0xff] %v840_v32  ;;  %889 = vst [vmem:[%s1864_s5 + $0xc8] sm:$0xff] %v841_v62 }
 0x233   : > { %890 = vst.msk [vmem:[%s1864_s5 + $0xd0] sm:$0xff] %vm382_vm0, %v842_v22  ;;  %891 = vst [vmem:[%s1864_s5 + $0xd8] sm:$0xff] %v843_v48 }
 0x234   : > { %892 = vst [vmem:[%s1864_s5 + $0xe0] sm:$0xff] %v844_v6  ;;  %893 = vst.msk [vmem:[%s1864_s5 + $0xe8] sm:$0xff] %vm382_vm0, %v845_v23 }
 0x235   : > { %894 = vst [vmem:[%s1864_s5 + $0xf0] sm:$0xff] %v846_v25  ;;  %895 = vst [vmem:[%s1864_s5 + $0xf8] sm:$0xff] %v847_v61 }
 0x236   : > { %896 = vst.msk [vmem:[%s1864_s5 + $0x100] sm:$0xff] %vm382_vm0, %v848_v5  ;;  %897 = vst [vmem:[%s1864_s5 + $0x108] sm:$0xff] %v849_v15 }
 0x237   : > { %898 = vst [vmem:[%s1864_s5 + $0x110] sm:$0xff] %v850_v47  ;;  %899 = vst.msk [vmem:[%s1864_s5 + $0x118] sm:$0xff] %vm382_vm0, %v851_v24 }
 0x238   : > { %900 = vst [vmem:[%s1864_s5 + $0x120] sm:$0xff] %v852_v28  ;;  %901 = vst [vmem:[%s1864_s5 + $0x128] sm:$0xff] %v853_v37 }
 0x239   : > { %902 = vst.msk [vmem:[%s1864_s5 + $0x130] sm:$0xff] %vm382_vm0, %v854_v13  ;;  %903 = vst [vmem:[%s1864_s5 + $0x138] sm:$0xff] %v855_v63 }
 0x23a   : > { %904 = vst [vmem:[%s1864_s5 + $0x140] sm:$0xff] %v856_v46  ;;  %905 = vst.msk [vmem:[%s1864_s5 + $0x148] sm:$0xff] %vm382_vm0, %v857_v17 }
 0x23b   : > { %906 = vst [vmem:[%s1864_s5 + $0x150] sm:$0xff] %v858_v2  ;;  %907 = vst [vmem:[%s1864_s5 + $0x158] sm:$0xff] %v859_v3 }
 0x23c   : > { %908 = vst.msk [vmem:[%s1864_s5 + $0x160] sm:$0xff] %vm382_vm0, %v860_v8  ;;  %909 = vst [vmem:[%s1864_s5 + $0x168] sm:$0xff] %v861_v60 }
 0x23d   : > { %910 = vst [vmem:[%s1864_s5 + $0x170] sm:$0xff] %v862_v7  ;;  %911 = vst.msk [vmem:[%s1864_s5 + $0x178] sm:$0xff] %vm382_vm0, %v863_v38 }
 0x23e PF: > { %s14_s17 = sadd.s32 1, %s1098_s17   ;;  %s2017_s15 = smov %s1094_s16 }
 0x23f   : > { %p11_p5 = scmp.ge.s32.totalorder %s14_s17, 4   ;;  %s2018_s16 = smov %s2020_s18 }
 0x241   :  { %13 = sbr.rel (!%p11_p5) target bundleno = 2 (0x2), region = 72 }

// kernel: single_conv3d_forward.2
= control target key start
LH: loop header
LB: loop body
LE: loop exit
PB: predicated region body
PF: predicated region fallthrough
CT: control target
= control target key end

     0   :  { %s5715_s17 = smov 0   ;;  %s5717_s18 = smov 0   ;;  %s7674_s0 = inlined_call_operand.vmem [shape: bf16[2,18,8,362], index: 0, kind: input, shape index: {}, may-alias: {0,1,2,3,4,5,6,7,8,9}]   ;;  %s7675_s1 = inlined_call_operand.vmem [shape: bf16[2,18,8,362], index: 1, kind: input, shape index: {}, may-alias: {0,1,2,3,4,5,6,7,8,9}]   ;;  %s7676_s2 = inlined_call_operand.vmem [shape: bf16[2,18,8,362], index: 2, kind: input, shape index: {}, may-alias: {0,1,2,3,4,5,6,7,8,9}]   ;;  %s7677_s3 = inlined_call_operand.vmem [shape: bf16[2,18,8,362], index: 3, kind: input, shape index: {}, may-alias: {0,1,2,3,4,5,6,7,8,9}]   ;;  %s7678_s4 = inlined_call_operand.vmem [shape: bf16[2,18,8,362], index: 4, kind: input, shape index: {}, may-alias: {0,1,2,3,4,5,6,7,8,9}]   ;;  %s7679_s5 = inlined_call_operand.vmem [shape: bf16[2,18,8,362], index: 5, kind: input, shape index: {}, may-alias: {0,1,2,3,4,5,6,7,8,9}]   ;;  %s7680_s6 = inlined_call_operand.vmem [shape: bf16[2,18,8,362], index: 6, kind: input, shape index: {}, may-alias: {0,1,2,3,4,5,6,7,8,9}]   ;;  %s7681_s7 = inlined_call_operand.vmem [shape: bf16[2,18,8,362], index: 7, kind: input, shape index: {}, may-alias: {0,1,2,3,4,5,6,7,8,9}]   ;;  %s7682_s8 = inlined_call_operand.vmem [shape: bf16[2,18,8,362], index: 8, kind: input, shape index: {}, may-alias: {0,1,2,3,4,5,6,7,8,9}]   ;;  %s7683_s9 = inlined_call_operand.vmem [shape: bf16[2,18,8,362], index: 9, kind: input, shape index: {}, may-alias: {0,1,2,3,4,5,6,7,8,9}]   ;;  %s7684_s10 = inlined_call_operand.vmem [shape: bf16[3,8,72], index: 10, kind: input, shape index: {}]   ;;  %s7685_s11 = inlined_call_operand.vmem [shape: f32[2,16,8,288], index: 11, kind: output, shape index: {}]  }
   0x1   :  { %7707 = sst [smem:[#allocation5_spill]] %s7674_s0  ;;  %s5719_s19 = smov 0  }
   0x2   :  { %7708 = sst [smem:[#allocation6_spill]] %s7675_s1  ;;  %s5721_s20 = smov 0  }
   0x3   :  { %7709 = sst [smem:[#allocation7_spill]] %s7676_s2  ;;  %s5723_s21 = smov 0  }
   0x4   :  { %7710 = sst [smem:[#allocation8_spill]] %s7677_s3 }
   0x5 LB: > { %s30_s22 = sadd.s32 1, %s5634_s19  ;;  %s33_s23 = sadd.s32 1, %s5638_s20  ;;  %s5642_s21 = sphi %s5723_s21, %s21_s21   ;;  %s5638_s20 = sphi %s5721_s20, %s7734_s20   ;;  %s5634_s19 = sphi %s5719_s19, %s7733_s19   ;;  %s5630_s18 = sphi %s5717_s18, %s7732_s18   ;;  %s5626_s17 = sphi %s5715_s17, %s7731_s17  }
   0x6   : > { %p31_p0 = scmp.ge.s32.totalorder %s30_s22, 2  ;;  %p4486_p1 = scmp.ge.s32.totalorder %s5642_s21, 1 }
   0x7   : > { %p577_p2 = scmp.lt.s32.totalorder %s5642_s21, 5 }
   0x8   : > { %s7736_s22 = smov (%p31_p0, %s30_s22), 0  ;;  %s7738_s23 = smov (!%p31_p0, %s33_s23), %s5638_s20 }
   0x9   : > { %p578_p3 = pnand %p4486_p1, %p577_p2  ;;  %p35_p4 = scmp.ge.s32.totalorder %s7738_s23, 2 }
   0xb   : > { %s7740_s23 = smov (%p35_p4, %s7738_s23), 0  ;;  %581 = sbr.rel (%p578_p3) target bundleno = 850 (0x352), region = 64 }
  0x10   : > { %s5745_s24 = sshll.u32 %s5626_s17, 3  ;;  %p727_p5 = scmp.lt.s32.totalorder %s5630_s18, 1  ;;  %v5646_v7 = vmov 0.0   ;;  %vm5652_vm0 = vmmov 0   ;;  %v7702_v16 = vmov 0   ;;  %vm1009_vm1 = vcmask 736256  }
  0x11   : > { %s738_s25 = sadd.s32 1, %s5745_s24  ;;  %p729_p7 = scmp.lt.s32.totalorder %s5745_s24, 17  ;;  %4764 = vmatprep.subr.bf16.mxu1 %v5646_v7  ;;  %4774 = vmatprep.mubr.msk.bf16.mxu1 %vm5652_vm0, %v5646_v7  ;;  %vm985_vm2 = vcmask 752640   ;;  %vm997_vm3 = vcmask 744448   ;;  %vm1143_vm4 = vcmask 1043456   ;;  %vm973_vm5 = vcmask 883712  }
  0x12   : > { %s7742_s18 = smov (!%p727_p5, %s5630_s18), 1  ;;  %p741_p6 = scmp.lt.s32.totalorder %s738_s25, 17  ;;  %1185 = vmatprep.mubr.bf16.mxu0 %v7702_v16  ;;  %vm961_vm6 = vcmask 891904   ;;  %vm949_vm7 = vcmask 900096   ;;  %vm937_vm8 = vcmask 1031168   ;;  %vm925_vm9 = vcmask 1039360  }
  0x13   : > { %s5751_s26 = smul.u32 54, %s7742_s18  ;;  %s7711_s1 = sld [smem:[#allocation6_spill]]  ;;  %vm1139_vm10 = vcmask 588800   ;;  %vm1533_vm11 = vcmask 261120  }
  0x14   : > { %s7744_s25 = smov (!%p741_p6, %s738_s25), 17  ;;  %s7692_s16 = smov 92  }
  0x15   : > { %s5102_s27 = smul.u32 3, %s7744_s25  ;;  %s7696_s17 = smov 90  }
  0x16   : > { %s730_s14 = scalar_select %p729_p7, %s5745_s24, 17 }
  0x17   : > { %s745_s28 = sadd.s32 %s5102_s27, %s5751_s26  ;;  %s7712_s0 = sld [smem:[#allocation5_spill]] }
  0x18   : > { %s4490_s29 = sshll.u32 %s745_s28, 2  ;;  %s5100_s15 = smul.u32 3, %s730_s14 }
  0x19   : > { %s747_s13 = scalar_lea.vmem %s7711_s1, %s4490_s29  ;;  %s7694_s12 = smov 91  }
  0x1a   : > { %v871_v0 = vld [vmem:[%s747_s13] sm:$0xff]  ;;  %v872_v1 = vld [vmem:[%s747_s13 + $0x8] sm:$0xf]  ;;  %s733_s25 = sadd.s32 %s5751_s26, %s5100_s15  ;;  %s7688_s13 = smov 108  }
  0x1b   : > { %v5758_v2 = vunpack.c.h.bf16 %v871_v0  ;;  %v5760_v3 = vunpack.c.l.bf16 %v872_v1  ;;  %v5762_v4 = vunpack.c.l.bf16 %v871_v0  ;;  %s4488_s27 = sshll.u32 %s733_s25, 2  ;;  %s7700_s14 = smov 109  }
  0x1c   : > { %s751_s15 = sadd.s32 2, %s5745_s24  ;;  %s7686_s25 = smov 110  }
  0x1d   : > { %v5174_v5 = vpack.i.bf16 %v5760_v3, %v5758_v2  ;;  %v5164_v6 = vpack.i.bf16 %v5758_v2, %v5762_v4  ;;  %s735_s30 = scalar_lea.vmem %s7712_s0, %s4488_s27  ;;  %p754_p8 = scmp.lt.s32.totalorder %s751_s15, 17 }
  0x1e   : > { %v866_v8 = vld [vmem:[%s735_s30] sm:$0xff]  ;;  %v867_v13 = vld [vmem:[%s735_s30 + $0x8] sm:$0xf]  ;;  %s7690_s27 = smov 126   ;;  %s7698_s28 = smov 127  }
  0x1f   : > { %5175 = vrot.lane.b32.xlu1 %v5174_v5, %s7692_s16  ;;  %5165 = vrot.lane.b32.xlu0 %v5164_v6, %s7696_s17  ;;  %v5777_v9 = vunpack.c.l.bf16 %v866_v8  ;;  %v5779_v10 = vunpack.c.h.bf16 %v866_v8  ;;  %v5796_v14 = vunpack.c.l.bf16 %v867_v13  ;;  %s7746_s15 = smov (!%p754_p8, %s751_s15), 17  ;;  %s7713_s2 = sld [smem:[#allocation7_spill]] }
  0x20   : > { %s5103_s29 = smul.u32 3, %s7746_s15  ;;  %s7714_s0 = smov 126  }
  0x21   : > { %v5169_v11 = vpack.i.bf16 %v5777_v9, %v5760_v3  ;;  %v5189_v12 = vpack.i.bf16 %v5779_v10, %v5762_v4  ;;  %v5249_v15 = vpack.i.bf16 %v5777_v9, %v5796_v14  ;;  %v5244_v17 = vpack.i.bf16 %v5796_v14, %v5779_v10  ;;  %s7718_s3 = sld [smem:[#allocation8_spill]]  ;;  %s790_s1 = sadd.s32 5, %s5745_s24 }
  0x22   : > { %s758_s30 = sadd.s32 %s5103_s29, %s5751_s26  ;;  %s7716_s29 = smov 110  }
  0x23   : > { %5180 = vrot.lane.b32.xlu1 %v5174_v5, %s7694_s12  ;;  %5170 = vrot.lane.b32.xlu0 %v5169_v11, %s7696_s17  ;;  %p793_p11 = scmp.lt.s32.totalorder %s790_s1, 17  ;;  %p857_p2 = scmp.lt.s32.totalorder %s5745_s24, 15 }
  0x25   : > { %s7752_s1 = smov (!%p793_p11, %s790_s1), 17 }
  0x27   : > { %5190 = vrot.lane.b32.xlu1 %v5189_v12, %s7694_s12  ;;  %5185 = vrot.lane.b32.xlu0 %v5189_v12, %s7692_s16 }
  0x2b   : > { %5200 = vrot.lane.b32.xlu1 %v5174_v5, %s7688_s13  ;;  %5195 = vrot.lane.b32.xlu0 %v5174_v5, %s7700_s14 }
  0x2f   : > { %5210 = vrot.lane.b32.xlu1 %v5189_v12, %s7688_s13  ;;  %5205 = vrot.lane.b32.xlu0 %v5189_v12, %s7700_s14  ;;  %s764_s13 = sadd.s32 3, %s5745_s24 }
  0x30   : > { %p767_p9 = scmp.lt.s32.totalorder %s764_s13, 17 }
  0x32   : > { %s7748_s13 = smov (!%p767_p9, %s764_s13), 17 }
  0x33   : > { %5220 = vrot.lane.b32.xlu1 %v5174_v5, %s7686_s25  ;;  %5215 = vrot.lane.b32.xlu0 %v5174_v5, %s7690_s27 }
  0x37   : > { %5230 = vrot.lane.b32.xlu1 %v5189_v12, %s7686_s25  ;;  %5225 = vrot.lane.b32.xlu0 %v5189_v12, %s7690_s27  ;;  %s4492_s25 = sshll.u32 %s758_s30, 2  ;;  %s5104_s27 = smul.u32 3, %s7748_s13 }
  0x38   : > { %s760_s15 = scalar_lea.vmem %s7713_s2, %s4492_s25  ;;  %s7717_s25 = smov 92  }
  0x39   : > { %v876_v18 = vld [vmem:[%s760_s15] sm:$0xff]  ;;  %v877_v19 = vld [vmem:[%s760_s15 + $0x8] sm:$0xf]  ;;  %s771_s30 = sadd.s32 %s5104_s27, %s5751_s26  ;;  %s7719_s13 = smov 127  }
  0x3a   : > { %v5819_v20 = vunpack.c.l.bf16 %v876_v18  ;;  %v5821_v21 = vunpack.c.h.bf16 %v876_v18  ;;  %v5823_v22 = vunpack.c.l.bf16 %v877_v19  ;;  %s4494_s15 = sshll.u32 %s771_s30, 2  ;;  %s5106_s2 = smul.u32 3, %s7752_s1 }
  0x3b   : > { %5240 = vrot.lane.b32.xlu1 %v5189_v12, %s7698_s28  ;;  %5235 = vrot.lane.b32.xlu0 %v5174_v5, %s7698_s28  ;;  %s816_s1 = sadd.s32 7, %s5745_s24 }
  0x3c   : > { %v5284_v23 = vpack.i.bf16 %v5821_v21, %v5819_v20  ;;  %v5294_v24 = vpack.i.bf16 %v5823_v22, %v5821_v21  ;;  %p819_p13 = scmp.lt.s32.totalorder %s816_s1, 17 }
  0x3e   : > { %s7756_s1 = smov (!%p819_p13, %s816_s1), 17 }
  0x3f   : > { %5250 = vrot.lane.b32.xlu1 %v5249_v15, %s7692_s16  ;;  %5245 = vrot.lane.b32.xlu0 %v5244_v17, %s7696_s17  ;;  %s7715_s16 = smov 108  }
  0x43   : > { %5260 = vrot.lane.b32.xlu1 %v5249_v15, %s7700_s14  ;;  %5255 = vrot.lane.b32.xlu0 %v5249_v15, %s7694_s12 }
  0x47   : > { %5270 = vrot.lane.b32.xlu1 %v5249_v15, %s7714_s0  ;;  %5265 = vrot.lane.b32.xlu0 %v5249_v15, %s7715_s16 }
  0x4b   : > { %5280 = vrot.lane.b32.xlu1 %v5249_v15, %s7698_s28  ;;  %5275 = vrot.lane.b32.xlu0 %v5249_v15, %s7716_s29  ;;  %s773_s28 = scalar_lea.vmem %s7718_s3, %s4494_s15 }
  0x4c   : > { %v881_v25 = vld [vmem:[%s773_s28] sm:$0xff]  ;;  %v882_v26 = vld [vmem:[%s773_s28 + $0x8] sm:$0xf]  ;;  %s7721_s28 = smov 91  }
  0x4d   : > { %v5858_v27 = vunpack.c.l.bf16 %v881_v25  ;;  %v5860_v28 = vunpack.c.h.bf16 %v881_v25  ;;  %v5862_v29 = vunpack.c.l.bf16 %v882_v26 }
  0x4f   : > { %1411 = vrot.lane.b32.xlu1 %v5823_v22, %s7696_s17  ;;  %5285 = vrot.lane.b32.xlu0 %v5284_v23, %s7696_s17  ;;  %s7720_s17 = smov 90   ;;  %v5324_v30 = vpack.i.bf16 %v5860_v28, %v5858_v27  ;;  %v5334_v31 = vpack.i.bf16 %v5862_v29, %v5860_v28 }
  0x53   : > { %5295 = vrot.lane.b32.xlu1 %v5294_v24, %s7694_s12  ;;  %5290 = vrot.lane.b32.xlu0 %v5294_v24, %s7717_s25 }
  0x57   : > { %1396 = vrot.lane.b32.xlu1 %v5819_v20, %s7694_s12  ;;  %1385 = vrot.lane.b32.xlu0 %v5819_v20, %s7717_s25  ;;  %s777_s12 = sadd.s32 4, %s5745_s24 }
  0x58   : > { %p780_p10 = scmp.lt.s32.totalorder %s777_s12, 17 }
  0x5a   : > { %s7750_s12 = smov (!%p780_p10, %s777_s12), 17 }
  0x5b   : > { %5305 = vrot.lane.b32.xlu1 %v5294_v24, %s7715_s16  ;;  %5300 = vrot.lane.b32.xlu0 %v5294_v24, %s7700_s14  ;;  %s5105_s27 = smul.u32 3, %s7750_s12 }
  0x5d   : > { %s784_s30 = sadd.s32 %s5105_s27, %s5751_s26 }
  0x5e   : > { %s4496_s15 = sshll.u32 %s784_s30, 2 }
  0x5f   : > { %1374 = vrot.lane.b32.xlu1 %v5819_v20, %s7715_s16  ;;  %1363 = vrot.lane.b32.xlu0 %v5819_v20, %s7700_s14  ;;  %s786_s3 = scalar_lea.vmem %s7678_s4, %s4496_s15 }
  0x60   : > { %v886_v32 = vld [vmem:[%s786_s3] sm:$0xff]  ;;  %v887_v33 = vld [vmem:[%s786_s3 + $0x8] sm:$0xf]  ;;  %s797_s3 = sadd.s32 %s5106_s2, %s5751_s26  ;;  %s5108_s2 = smul.u32 3, %s7756_s1 }
  0x61   : > { %v5897_v34 = vunpack.c.l.bf16 %v886_v32  ;;  %v5899_v35 = vunpack.c.h.bf16 %v886_v32  ;;  %v5901_v36 = vunpack.c.l.bf16 %v887_v33  ;;  %s4498_s12 = sshll.u32 %s797_s3, 2  ;;  %s803_s3 = sadd.s32 6, %s5745_s24 }
  0x62   : > { %s799_s15 = scalar_lea.vmem %s7679_s5, %s4498_s12  ;;  %p6079_p12 = scmp.lt.s32.totalorder %s803_s3, 17 }
  0x63   : > { %5315 = vrot.lane.b32.xlu1 %v5294_v24, %s7716_s29  ;;  %5310 = vrot.lane.b32.xlu0 %v5294_v24, %s7714_s0  ;;  %v5364_v37 = vpack.i.bf16 %v5899_v35, %v5897_v34  ;;  %v5910_v38 = vpack.i.bf16 %v5901_v36, %v5899_v35 }
  0x64   : > { %s7754_s3 = smov (!%p6079_p12, %s803_s3), 17 }
  0x65   : > { %s5107_s27 = smul.u32 3, %s7754_s3  ;;  %s823_s3 = sadd.s32 %s5108_s2, %s5751_s26 }
  0x66   : > { %s4502_s12 = sshll.u32 %s823_s3, 2 }
  0x67   : > { %1352 = vrot.lane.b32.xlu1 %v5819_v20, %s7716_s29  ;;  %1341 = vrot.lane.b32.xlu0 %v5819_v20, %s7714_s0  ;;  %s6136_s30 = sadd.s32 %s5107_s27, %s5751_s26 }
  0x6b   : > { %1330 = vrot.lane.b32.xlu1 %v5819_v20, %s7719_s13  ;;  %5320 = vrot.lane.b32.xlu0 %v5294_v24, %s7719_s13 }
  0x6f   : > { %1789 = vrot.lane.b32.xlu1 %v5862_v29, %s7720_s17  ;;  %5325 = vrot.lane.b32.xlu0 %v5324_v30, %s7720_s17 }
  0x73   : > { %5335 = vrot.lane.b32.xlu1 %v5334_v31, %s7721_s28  ;;  %5330 = vrot.lane.b32.xlu0 %v5334_v31, %s7717_s25 }
  0x77   : > { %1774 = vrot.lane.b32.xlu1 %v5858_v27, %s7721_s28  ;;  %1763 = vrot.lane.b32.xlu0 %v5858_v27, %s7717_s25 }
  0x7b   : > { %5345 = vrot.lane.b32.xlu1 %v5334_v31, %s7715_s16  ;;  %5340 = vrot.lane.b32.xlu0 %v5334_v31, %s7700_s14 }
  0x7f   : > { %1752 = vrot.lane.b32.xlu1 %v5858_v27, %s7715_s16  ;;  %1741 = vrot.lane.b32.xlu0 %v5858_v27, %s7700_s14 }
  0x83   : > { %5355 = vrot.lane.b32.xlu1 %v5334_v31, %s7716_s29  ;;  %5350 = vrot.lane.b32.xlu0 %v5334_v31, %s7714_s0 }
  0x87   : > { %1730 = vrot.lane.b32.xlu1 %v5858_v27, %s7716_s29  ;;  %1719 = vrot.lane.b32.xlu0 %v5858_v27, %s7714_s0 }
  0x8b   : > { %1708 = vrot.lane.b32.xlu1 %v5858_v27, %s7719_s13  ;;  %5360 = vrot.lane.b32.xlu0 %v5334_v31, %s7719_s13 }
  0x8f   : > { %2166 = vrot.lane.b32.xlu1 %v5901_v36, %s7720_s17  ;;  %5365 = vrot.lane.b32.xlu0 %v5364_v37, %s7720_s17 }
  0x91   : > { %v5176_v39 = vpop.permute.xlu1 %5175  ;;  %v5166_v40 = vpop.permute.xlu0 %5165 }
  0x92   : > { %v5168_v41 = vunpack.i.h.bf16 %v5166_v40  ;;  %v5167_v42 = vunpack.i.l.bf16 %v5166_v40  ;;  %v5178_v44 = vunpack.i.h.bf16 %v5176_v39  ;;  %v5177_v45 = vunpack.i.l.bf16 %v5176_v39 }
  0x93   : > { %5375 = vrot.lane.b32.xlu1 %v5910_v38, %s7721_s28  ;;  %5370 = vrot.lane.b32.xlu0 %v5910_v38, %s7717_s25 }
  0x94   : > { %v1117_v48 = vsel %vm1009_vm1, %v5167_v42, %v5168_v41  ;;  %v1096_v56 = vsel %vm985_vm2, %v5177_v45, %v5178_v44 }
  0x95   : > { %v5181_v43 = vpop.permute.xlu1 %5180  ;;  %v5921_v49 = vpop.permute.xlu0 %5170  ;;  %v1134_v53 = vpack.c.bf16 %v1117_v48, %v1117_v48  ;;  %v891_v48 = vld [vmem:[%s799_s15] sm:$0xff] }
  0x96   : > { %v5183_v46 = vunpack.i.h.bf16 %v5181_v43  ;;  %v5182_v47 = vunpack.i.l.bf16 %v5181_v43  ;;  %v5172_v51 = vunpack.i.l.bf16 %v5921_v49 }
  0x97   : > { %2151 = vrot.lane.b32.xlu1 %v5897_v34, %s7721_s28  ;;  %2140 = vrot.lane.b32.xlu0 %v5897_v34, %s7717_s25  ;;  %v5950_v1 = vsel %vm1143_vm4, %v1134_v53, 0 }
  0x98   : > { %v1118_v54 = vsel %vm1009_vm1, %v5168_v41, %v5172_v51  ;;  %v1136_v55 = vpack.c.bf16 %v5172_v51, %v5172_v51  ;;  %v1107_v57 = vsel %vm997_vm3, %v5182_v47, %v5183_v46  ;;  %v5958_v12 = vpack.c.bf16 %v5183_v46, %v5178_v44  ;;  %v892_v51 = vld [vmem:[%s799_s15 + $0x8] sm:$0xf]  ;;  %s4500_s15 = sshll.u32 %s6136_s30, 2 }
  0x99   : > { %v5923_v50 = vpop.permute.xlu1 %5190  ;;  %v5936_v58 = vpop.permute.xlu0 %5185  ;;  %v5938_v59 = vpack.c.bf16 %v1118_v54, %v1118_v54  ;;  %v5952_v6 = vpack.c.bf16 %v1107_v57, %v1096_v56  ;;  %v6016_v57 = vunpack.c.l.bf16 %v891_v48  ;;  %s812_s27 = scalar_lea.vmem %s7680_s6, %s4500_s15  ;;  %s825_s15 = scalar_lea.vmem %s7681_s7, %s4502_s12 }
  0x9a   : > { %v5192_v52 = vunpack.i.l.bf16 %v5923_v50  ;;  %v5187_v61 = vunpack.i.l.bf16 %v5936_v58  ;;  %v5943_v62 = vsel %vm1143_vm4, %v1136_v55, 0 }
  0x9b   : > { %5385 = vrot.lane.b32.xlu1 %v5910_v38, %s7715_s16  ;;  %4510 = vmatprep.subr.msk.bf16.mxu0 %vm1143_vm4, %v5938_v59 }
  0x9c   : > { %v1106_v0 = vsel %vm997_vm3, %v5192_v52, %v5182_v47  ;;  %4765 = vmatpush3.bf16.msra.mxu1 %v5943_v62  ;;  %1160 = vmatpush1.bf16.msra.mxu0 %v5950_v1  ;;  %v1095_v8 = vsel %vm985_vm2, %v5187_v61, %v5177_v45 }
  0x9d   : > { %v5201_v60 = vpop.permute.xlu1 %5200  ;;  %4766 = vmatprep.subr.bf16.mxu1 %v5646_v7  ;;  %v5196_v11 = vpop.permute.xlu0 %5195  ;;  %1161 = vmatprep.subr.bf16.mxu0 %v5952_v6  ;;  %v5960_v13 = vpack.c.bf16 %v1106_v0, %v1095_v8  ;;  %v6025_v0 = vunpack.c.l.bf16 %v892_v51 }
  0x9e   : > { %v5203_v63 = vunpack.i.h.bf16 %v5201_v60  ;;  %v5202_v5 = vunpack.i.l.bf16 %v5201_v60  ;;  %5380 = vrot.lane.b32.xlu0 %v5910_v38, %s7700_s14  ;;  %v5198_v17 = vunpack.i.h.bf16 %v5196_v11  ;;  %v5197_v18 = vunpack.i.l.bf16 %v5196_v11 }
  0x9f   : > { %2129 = vrot.lane.b32.xlu1 %v5897_v34, %s7715_s16  ;;  %v6018_v60 = vunpack.c.h.bf16 %v891_v48  ;;  %v5193_v48 = vunpack.i.h.bf16 %v5923_v50 }
  0xa0   : > { %v1085_v23 = vsel %vm973_vm5, %v5202_v5, %v5203_v63  ;;  %4767 = vmatpush3.bf16.msra.mxu1 %v5958_v12  ;;  %1162 = vmatpush1.bf16.msra.mxu0 %v5960_v13  ;;  %v1074_v24 = vsel %vm961_vm6, %v5197_v18, %v5198_v17  ;;  %v5975_v25 = vpack.c.bf16 %v5203_v63, %v5198_v17 }
  0xa1   : > { %v5962_v15 = vpop.permute.xlu1 %5210  ;;  %4768 = vmatprep.subr.bf16.mxu1 %v5646_v7  ;;  %v5977_v26 = vpop.permute.xlu0 %5205  ;;  %v5979_v30 = vpack.c.bf16 %v1085_v23, %v1074_v24 }
  0xa2   : > { %v5212_v19 = vunpack.i.l.bf16 %v5962_v15  ;;  %2118 = vrot.lane.b32.xlu0 %v5897_v34, %s7700_s14  ;;  %v5207_v32 = vunpack.i.l.bf16 %v5977_v26 }
  0xa3   : > { %5395 = vrot.lane.b32.xlu1 %v5910_v38, %s7716_s29  ;;  %1163 = vmatprep.subr.bf16.mxu0 %v5979_v30 }
  0xa4   : > { %v1084_v39 = vsel %vm973_vm5, %v5212_v19, %v5202_v5  ;;  %4769 = vmatpush3.bf16.msra.mxu1 %v5975_v25  ;;  %v1073_v40 = vsel %vm961_vm6, %v5207_v32, %v5197_v18  ;;  %v5404_v19 = vpack.i.bf16 %v6018_v60, %v6016_v57 }
  0xa5   : > { %v5221_v31 = vpop.permute.xlu1 %5220  ;;  %4770 = vmatprep.subr.bf16.mxu1 %v5646_v7  ;;  %v5216_v41 = vpop.permute.xlu0 %5215  ;;  %v5994_v42 = vpack.c.bf16 %v1084_v39, %v1073_v40 }
  0xa6   : > { %v5223_v33 = vunpack.i.h.bf16 %v5221_v31  ;;  %v5222_v37 = vunpack.i.l.bf16 %v5221_v31  ;;  %5390 = vrot.lane.b32.xlu0 %v5910_v38, %s7714_s0  ;;  %v5218_v44 = vunpack.i.h.bf16 %v5216_v41  ;;  %v5217_v45 = vunpack.i.l.bf16 %v5216_v41 }
  0xa7   : > { %2107 = vrot.lane.b32.xlu1 %v5897_v34, %s7716_s29  ;;  %1164 = vmatpush1.bf16.msra.mxu0 %v5994_v42  ;;  %v6041_v31 = vpack.i.bf16 %v6025_v0, %v6018_v60 }
  0xa8   : > { %v1063_v47 = vsel %vm949_vm7, %v5222_v37, %v5223_v33  ;;  %v6005_v52 = vpack.c.bf16 %v5223_v33, %v5218_v44  ;;  %v1052_v53 = vsel %vm937_vm8, %v5217_v45, %v5218_v44  ;;  %v5173_v44 = vunpack.i.h.bf16 %v5921_v49 }
  0xa9   : > { %v5996_v43 = vpop.permute.xlu1 %5230  ;;  %v6008_v54 = vpop.permute.xlu0 %5225  ;;  %v6010_v55 = vpack.c.bf16 %v1063_v47, %v1052_v53 }
  0xaa   : > { %v5232_v46 = vunpack.i.l.bf16 %v5996_v43  ;;  %2096 = vrot.lane.b32.xlu0 %v5897_v34, %s7714_s0  ;;  %v5227_v61 = vunpack.i.l.bf16 %v6008_v54  ;;  %4771 = vmatpush3.bf16.msra.mxu1 %v6005_v52 }
  0xab   : > { %2085 = vrot.lane.b32.xlu1 %v5897_v34, %s7719_s13  ;;  %1165 = vmatprep.subr.bf16.mxu0 %v6010_v55 }
  0xac   : > { %v1062_v63 = vsel %vm949_vm7, %v5232_v46, %v5222_v37  ;;  %4772 = vmatprep.subr.bf16.mxu1 %v5646_v7  ;;  %v1051_v8 = vsel %vm937_vm8, %v5227_v61, %v5217_v45  ;;  %v4509_v46 = vld [vmem:[%s7684_s10 + $0x4] sm:$0xf] }
  0xad   : > { %v6012_v56 = vpop.permute.xlu1 %5240  ;;  %v5236_v11 = vpop.permute.xlu0 %5235  ;;  %v6031_v17 = vpack.c.bf16 %v1062_v63, %v1051_v8  ;;  %v5188_v8 = vunpack.i.h.bf16 %v5936_v58 }
  0xae   : > { %v5242_v5 = vunpack.i.l.bf16 %v6012_v56  ;;  %5400 = vrot.lane.b32.xlu0 %v5910_v38, %s7719_s13  ;;  %v5238_v23 = vunpack.i.h.bf16 %v5236_v11  ;;  %v5237_v24 = vunpack.i.l.bf16 %v5236_v11 }
  0xaf   : > { %2543 = vrot.lane.b32.xlu1 %v6025_v0, %s7720_s17  ;;  %1166 = vmatpush1.bf16.msra.mxu0 %v6031_v17 }
  0xb0   : > { %v6045_v32 = vpack.c.bf16 %v5238_v23, %v5760_v3  ;;  %v1041_v38 = vsel %vm925_vm9, %v5237_v24, %v5238_v23  ;;  %v1040_v33 = vsel %vm925_vm9, %v5242_v5, %v5237_v24 }
  0xb1   : > { %v5251_v18 = vpop.permute.xlu1 %5250  ;;  %v5246_v37 = vpop.permute.xlu0 %5245  ;;  %v6050_v39 = vpack.c.bf16 %v1041_v38, %v5758_v2  ;;  %v6053_v40 = vpack.c.bf16 %v1040_v33, %v5762_v4 }
  0xb2   : > { %5405 = vrot.lane.b32.xlu0 %v5404_v19, %s7720_s17  ;;  %v5248_v45 = vunpack.i.h.bf16 %v5246_v37  ;;  %v5247_v3 = vunpack.i.l.bf16 %v5246_v37  ;;  %4773 = vmatpush3.bf16.msra.mxu1 %v6045_v32  ;;  %v5253_v2 = vunpack.i.h.bf16 %v5251_v18  ;;  %v5252_v51 = vunpack.i.l.bf16 %v5251_v18 }
  0xb3   : > { %5415 = vrot.lane.b32.xlu1 %v6041_v31, %s7721_s28  ;;  %1167 = vmatprep.subr.bf16.mxu0 %v6050_v39  ;;  %v5213_v19 = vunpack.i.h.bf16 %v5962_v15 }
  0xb4   : > { %4778 = vmatprep.subr.bf16.mxu1 %v5646_v7  ;;  %1168 = vmatpush1.bf16.msra.mxu0 %v6053_v40  ;;  %v1011_v4 = vsel %vm1009_vm1, %v5247_v3, %v5248_v45  ;;  %v1029_v49 = vpack.c.bf16 %v5248_v45, %v5248_v45  ;;  %v1010_v47 = vsel %vm1009_vm1, %v5173_v44, %v5247_v3 }
  0xb5   : > { %v6055_v41 = vpop.permute.xlu1 %5260  ;;  %v5256_v53 = vpop.permute.xlu0 %5255  ;;  %4775 = vmatmul.mubr.msk.bf16.vlgmr.msra.gmra.mxu1 %vm1139_vm10, %v4509_v46  ;;  %v1028_v61 = vpack.c.bf16 %v1011_v4, %v1011_v4  ;;  %v1027_v63 = vpack.c.bf16 %v1010_v47, %v1010_v47  ;;  %v986_v58 = vsel %vm985_vm2, %v5253_v2, %v5188_v8  ;;  %v987_v44 = vsel %vm985_vm2, %v5188_v8, %v5252_v51 }
  0xb6   : > { %5410 = vrot.lane.b32.xlu0 %v6041_v31, %s7717_s25  ;;  %v5258_v11 = vunpack.i.h.bf16 %v5256_v53  ;;  %v5257_v50 = vunpack.i.l.bf16 %v5256_v53  ;;  %v1244_v18 = vsel %vm1143_vm4, %v1029_v49, 0  ;;  %4788 = vmatprep.mubr.msk.bf16.mxu1 %vm5652_vm0, %v5646_v7  ;;  %v5263_v24 = vunpack.i.h.bf16 %v6055_v41 }
  0xb7   : > { %2528 = vrot.lane.b32.xlu1 %v6016_v57, %s7721_s28  ;;  %4513 = vmatprep.subr.msk.bf16.mxu0 %vm1143_vm4, %v1028_v61  ;;  %v1238_v23 = vsel %vm1143_vm4, %v1027_v63, 0  ;;  %v5262_v15 = vunpack.i.l.bf16 %v6055_v41 }
  0xb8   : > { %4779 = vmatpush3.bf16.msra.mxu1 %v1244_v18  ;;  %v998_v38 = vsel %vm997_vm3, %v5258_v11, %v5193_v48  ;;  %v1026_v33 = vpack.c.bf16 %v5257_v50, %v5252_v51  ;;  %4511 = vmatmul.mubr.msk.bf16.vlgmr.msra.gmra.mxu0 %vm1139_vm10, %v4509_v46  ;;  %v999_v45 = vsel %vm997_vm3, %v5193_v48, %v5257_v50  ;;  %v5208_v46 = vunpack.i.h.bf16 %v5977_v26 }
  0xb9   : > { %v6073_v5 = vpop.permute.xlu1 %5270  ;;  %4780 = vmatprep.subr.bf16.mxu1 %v5646_v7  ;;  %1253 = vmatpush1.bf16.msra.mxu0 %v1238_v23  ;;  %v5266_v37 = vpop.permute.xlu0 %5265  ;;  %v1024_v3 = vpack.c.bf16 %v998_v38, %v986_v58  ;;  %v1025_v47 = vpack.c.bf16 %v999_v45, %v987_v44  ;;  %v5228_v51 = vunpack.i.h.bf16 %v6008_v54  ;;  %v5233_v54 = vunpack.i.h.bf16 %v5996_v43 }
  0xba   : > { %1278 = vmatprep.mubr.bf16.mxu0 %v7702_v16  ;;  %v5268_v2 = vunpack.i.h.bf16 %v5266_v37  ;;  %v5267_v49 = vunpack.i.l.bf16 %v5266_v37  ;;  %2517 = vrot.lane.b32.xlu0 %v6016_v57, %s7717_s25  ;;  %v5273_v41 = vunpack.i.h.bf16 %v6073_v5  ;;  %v5272_v48 = vunpack.i.l.bf16 %v6073_v5 }
  0xbb   : > { %5425 = vrot.lane.b32.xlu1 %v6041_v31, %s7715_s16  ;;  %v962_v53 = vsel %vm961_vm6, %v5263_v24, %v5208_v46  ;;  %1254 = vmatprep.subr.bf16.mxu0 %v1025_v47  ;;  %v963_v11 = vsel %vm961_vm6, %v5208_v46, %v5262_v15  ;;  %v5243_v38 = vunpack.i.h.bf16 %v6012_v56 }
  0xbc   : > { %4781 = vmatpush3.bf16.msra.mxu1 %v1026_v33  ;;  %v974_v26 = vsel %vm973_vm5, %v5268_v2, %v5213_v19  ;;  %v1023_v61 = vpack.c.bf16 %v5267_v49, %v5262_v15  ;;  %v975_v50 = vsel %vm973_vm5, %v5213_v19, %v5267_v49  ;;  %v938_v19 = vsel %vm937_vm8, %v5273_v41, %v5228_v51 }
  0xbd   : > { %v5281_v4 = vpop.permute.xlu1 %5280  ;;  %4782 = vmatprep.subr.bf16.mxu1 %v5646_v7  ;;  %1255 = vmatpush1.bf16.msra.mxu0 %v1024_v3  ;;  %v5276_v8 = vpop.permute.xlu0 %5275  ;;  %v1021_v18 = vpack.c.bf16 %v974_v26, %v962_v53  ;;  %v1022_v24 = vpack.c.bf16 %v975_v50, %v963_v11  ;;  %v939_v33 = vsel %vm937_vm8, %v5228_v51, %v5272_v48 }
  0xbe   : > { %v5282_v63 = vunpack.i.l.bf16 %v5281_v4  ;;  %v5278_v23 = vunpack.i.h.bf16 %v5276_v8  ;;  %v5277_v58 = vunpack.i.l.bf16 %v5276_v8  ;;  %5420 = vrot.lane.b32.xlu0 %v6041_v31, %s7700_s14  ;;  %v5283_v15 = vunpack.i.h.bf16 %v5281_v4 }
  0xbf   : > { %2506 = vrot.lane.b32.xlu1 %v6016_v57, %s7715_s16  ;;  %1256 = vmatprep.subr.bf16.mxu0 %v1022_v24 }
  0xc0   : > { %4783 = vmatpush3.bf16.msra.mxu1 %v1023_v61  ;;  %v950_v43 = vsel %vm949_vm7, %v5278_v23, %v5233_v54  ;;  %v1020_v37 = vpack.c.bf16 %v5277_v58, %v5272_v48  ;;  %v951_v44 = vsel %vm949_vm7, %v5233_v54, %v5277_v58  ;;  %v927_v2 = vsel %vm925_vm9, %v5243_v38, %v5282_v63 }
  0xc1   : > { %v6120_v5 = vpop.permute.xlu1 %1411  ;;  %4784 = vmatprep.subr.bf16.mxu1 %v5646_v7  ;;  %1257 = vmatpush1.bf16.msra.mxu0 %v1021_v18  ;;  %v5286_v45 = vpop.permute.xlu0 %5285  ;;  %v1019_v3 = vpack.c.bf16 %v951_v44, %v939_v33  ;;  %v1018_v46 = vpack.c.bf16 %v950_v43, %v938_v19  ;;  %v926_v47 = vsel %vm925_vm9, %v5283_v15, %v5243_v38  ;;  %v896_v15 = vld [vmem:[%s812_s27] sm:$0xff] }
  0xc2   : > { %v5288_v49 = vunpack.i.h.bf16 %v5286_v45  ;;  %v5287_v4 = vunpack.i.l.bf16 %v5286_v45  ;;  %2495 = vrot.lane.b32.xlu0 %v6016_v57, %s7700_s14  ;;  %v1017_v41 = vpack.c.bf16 %v5282_v63, %v5796_v14  ;;  %v1016_v48 = vpack.c.bf16 %v927_v2, %v5779_v10  ;;  %v1030_v63 = vld [vmem:[%s7684_s10] sm:$0xf]  ;;  %v897_v2 = vld [vmem:[%s812_s27 + $0x8] sm:$0xf] }
  0xc3   : > { %5435 = vrot.lane.b32.xlu1 %v6041_v31, %s7716_s29  ;;  %1258 = vmatprep.subr.bf16.mxu0 %v1019_v3  ;;  %v1432_v50 = vpack.c.bf16 %v6120_v5, %v6120_v5  ;;  %v1015_v10 = vpack.c.bf16 %v926_v47, %v5777_v9 }
  0xc4   : > { %4785 = vmatpush3.bf16.msra.mxu1 %v1020_v37  ;;  %v1414_v8 = vsel %vm1009_vm1, %v5288_v49, %v6120_v5  ;;  %v1413_v11 = vsel %vm1009_vm1, %v5287_v4, %v5288_v49  ;;  %v6190_v49 = vunpack.c.l.bf16 %v896_v15 }
  0xc5   : > { %v5296_v56 = vpop.permute.xlu1 %5295  ;;  %4786 = vmatprep.subr.bf16.mxu1 %v5646_v7  ;;  %1259 = vmatpush1.bf16.msra.mxu0 %v1018_v46  ;;  %v5291_v26 = vpop.permute.xlu0 %5290  ;;  %v6163_v5 = vpack.c.bf16 %v1414_v8, %v1414_v8  ;;  %v1430_v54 = vpack.c.bf16 %v1413_v11, %v1413_v11  ;;  %v6172_v38 = vsel %vm1143_vm4, %v1432_v50, 0  ;;  %v6208_v8 = vunpack.c.l.bf16 %v897_v2 }
  0xc6   : > { %v5298_v51 = vunpack.i.h.bf16 %v5296_v56  ;;  %v5297_v53 = vunpack.i.l.bf16 %v5296_v56  ;;  %v5293_v18 = vunpack.i.h.bf16 %v5291_v26  ;;  %v5292_v14 = vunpack.i.l.bf16 %v5291_v26  ;;  %1260 = vmatprep.subr.bf16.mxu0 %v1016_v48  ;;  %5430 = vrot.lane.b32.xlu0 %v6041_v31, %s7714_s0 }
  0xc7   : > { %2484 = vrot.lane.b32.xlu1 %v6016_v57, %s7716_s29  ;;  %v6181_v44 = vsel %vm1143_vm4, %v1430_v54, 0  ;;  %v6196_v48 = vunpack.c.h.bf16 %v896_v15 }
  0xc8   : > { %4787 = vmatpush3.bf16.msra.mxu1 %v1017_v41  ;;  %v1392_v9 = vsel %vm985_vm2, %v5292_v14, %v5293_v18  ;;  %v1403_v24 = vsel %vm997_vm3, %v5297_v53, %v5298_v51  ;;  %v6186_v3 = vpack.c.bf16 %v5298_v51, %v5293_v18 }
  0xc9   : > { %v1397_v61 = vpop.permute.xlu1 %1396  ;;  %4792 = vmatprep.subr.bf16.mxu1 %v5646_v7  ;;  %1261 = vmatpush1.bf16.msra.mxu0 %v1015_v10  ;;  %v1386_v23 = vpop.permute.xlu0 %1385  ;;  %v6183_v45 = vpack.c.bf16 %v1403_v24, %v1392_v9  ;;  %v5444_v54 = vpack.i.bf16 %v6196_v48, %v6190_v49 }
  0xca   : > { %4517 = vmatprep.subr.msk.bf16.mxu0 %vm1143_vm4, %v6163_v5  ;;  %v1402_v43 = vsel %vm997_vm3, %v1397_v61, %v5297_v53  ;;  %v1391_v37 = vsel %vm985_vm2, %v1386_v23, %v5292_v14  ;;  %2473 = vrot.lane.b32.xlu0 %v6016_v57, %s7714_s0 }
  0xcb   : > { %4789 = vmatmul.mubr.msk.bf16.vlgmr.msra.gmra.mxu1 %vm1139_vm10, %v1030_v63  ;;  %v6198_v51 = vpack.c.bf16 %v1402_v43, %v1391_v37  ;;  %2462 = vrot.lane.b32.xlu1 %v6016_v57, %s7719_s13 }
  0xcc   : > { %4793 = vmatpush3.bf16.msra.mxu1 %v6172_v38  ;;  %4802 = vmatprep.mubr.msk.bf16.mxu1 %vm5652_vm0, %v5646_v7 }
  0xcd   : > { %v5306_v58 = vpop.permute.xlu1 %5305  ;;  %4514 = vmatmul.mubr.msk.bf16.vlgmr.msra.gmra.mxu0 %vm1139_vm10, %v1030_v63  ;;  %4794 = vmatprep.subr.bf16.mxu1 %v5646_v7  ;;  %v5301_v46 = vpop.permute.xlu0 %5300 }
  0xce   : > { %v5308_v19 = vunpack.i.h.bf16 %v5306_v58  ;;  %v5307_v33 = vunpack.i.l.bf16 %v5306_v58  ;;  %1454 = vmatpush1.bf16.msra.mxu0 %v6181_v44  ;;  %1479 = vmatprep.mubr.bf16.mxu0 %v7702_v16  ;;  %v5303_v4 = vunpack.i.h.bf16 %v5301_v46  ;;  %v5302_v47 = vunpack.i.l.bf16 %v5301_v46 }
  0xcf   : > { %1455 = vmatprep.subr.bf16.mxu0 %v6183_v45  ;;  %5440 = vrot.lane.b32.xlu0 %v6041_v31, %s7719_s13  ;;  %v6227_v58 = vpack.i.bf16 %v6208_v8, %v6196_v48 }
  0xd0   : > { %v1381_v41 = vsel %vm973_vm5, %v5307_v33, %v5308_v19  ;;  %4795 = vmatpush3.bf16.msra.mxu1 %v6186_v3  ;;  %v6203_v53 = vpack.c.bf16 %v5308_v19, %v5303_v4  ;;  %v1370_v61 = vsel %vm961_vm6, %v5302_v47, %v5303_v4  ;;  %2920 = vrot.lane.b32.xlu1 %v6208_v8, %s7720_s17 }
  0xd1   : > { %v1375_v56 = vpop.permute.xlu1 %1374  ;;  %4796 = vmatprep.subr.bf16.mxu1 %v5646_v7  ;;  %v1364_v11 = vpop.permute.xlu0 %1363  ;;  %v6211_v50 = vpack.c.bf16 %v1381_v41, %v1370_v61 }
  0xd2   : > { %v1380_v26 = vsel %vm973_vm5, %v1375_v56, %v5307_v33  ;;  %1456 = vmatpush1.bf16.msra.mxu0 %v6198_v51  ;;  %v1369_v14 = vsel %vm961_vm6, %v1364_v11, %v5302_v47 }
  0xd3   : > { %v6218_v23 = vpack.c.bf16 %v1380_v26, %v1369_v14  ;;  %1457 = vmatprep.subr.bf16.mxu0 %v6211_v50  ;;  %5445 = vrot.lane.b32.xlu0 %v5444_v54, %s7720_s17 }
  0xd4   : > { %4797 = vmatpush3.bf16.msra.mxu1 %v6203_v53  ;;  %5455 = vrot.lane.b32.xlu1 %v6227_v58, %s7721_s28 }
  0xd5   : > { %v5316_v18 = vpop.permute.xlu1 %5315  ;;  %4798 = vmatprep.subr.bf16.mxu1 %v5646_v7  ;;  %v5311_v9 = vpop.permute.xlu0 %5310 }
  0xd6   : > { %v5318_v10 = vunpack.i.h.bf16 %v5316_v18  ;;  %v5317_v63 = vunpack.i.l.bf16 %v5316_v18  ;;  %1458 = vmatpush1.bf16.msra.mxu0 %v6218_v23  ;;  %v5313_v24 = vunpack.i.h.bf16 %v5311_v9  ;;  %v5312_v19 = vunpack.i.l.bf16 %v5311_v9 }
  0xd7   : > { %5450 = vrot.lane.b32.xlu0 %v6227_v58, %s7717_s25 }
  0xd8   : > { %v1359_v33 = vsel %vm949_vm7, %v5317_v63, %v5318_v10  ;;  %v6232_v15 = vpack.c.bf16 %v5318_v10, %v5313_v24  ;;  %v1348_v37 = vsel %vm937_vm8, %v5312_v19, %v5313_v24  ;;  %2905 = vrot.lane.b32.xlu1 %v6190_v49, %s7721_s28  ;;  %v901_v24 = vld [vmem:[%s825_s15] sm:$0xff] }
  0xd9   : > { %v1353_v31 = vpop.permute.xlu1 %1352  ;;  %v1342_v46 = vpop.permute.xlu0 %1341  ;;  %v6238_v56 = vpack.c.bf16 %v1359_v33, %v1348_v37  ;;  %v6333_v33 = vunpack.c.l.bf16 %v901_v24  ;;  %v6336_v37 = vunpack.c.h.bf16 %v901_v24 }
  0xda   : > { %v1358_v43 = vsel %vm949_vm7, %v1353_v31, %v5317_v63  ;;  %v1347_v2 = vsel %vm937_vm8, %v1342_v46, %v5312_v19  ;;  %4799 = vmatpush3.bf16.msra.mxu1 %v6232_v15  ;;  %v4520_v19 = vld [vmem:[%s7684_s10 + $0x4] sm:$0xf] }
  0xdb   : > { %v6244_v4 = vpack.c.bf16 %v1358_v43, %v1347_v2  ;;  %1459 = vmatprep.subr.bf16.mxu0 %v6238_v56  ;;  %4800 = vmatprep.subr.bf16.mxu1 %v5646_v7  ;;  %v902_v43 = vld [vmem:[%s825_s15 + $0x8] sm:$0xf]  ;;  %s829_s15 = sadd.s32 8, %s5745_s24 }
  0xdc   : > { %2894 = vrot.lane.b32.xlu0 %v6190_v49, %s7717_s25  ;;  %5465 = vrot.lane.b32.xlu1 %v6227_v58, %s7715_s16  ;;  %v6344_v46 = vunpack.c.l.bf16 %v902_v43  ;;  %p832_p0 = scmp.lt.s32.totalorder %s829_s15, 17 }
  0xdd   : > { %v5321_v47 = vpop.permute.xlu0 %5320  ;;  %1460 = vmatpush1.bf16.msra.mxu0 %v6244_v4  ;;  %v1331_v41 = vpop.permute.xlu1 %1330 }
  0xde   : > { %v5323_v26 = vunpack.i.h.bf16 %v5321_v47  ;;  %v5322_v61 = vunpack.i.l.bf16 %v5321_v47  ;;  %v5484_v47 = vpack.i.bf16 %v6336_v37, %v6333_v33  ;;  %s7758_s15 = smov (!%p832_p0, %s829_s15), 17 }
  0xdf   : > { %s5109_s1 = smul.u32 3, %s7758_s15 }
  0xe0   : > { %v6254_v11 = vpack.c.bf16 %v5323_v26, %v5823_v22  ;;  %v1336_v18 = vsel %vm925_vm9, %v1331_v41, %v5322_v61  ;;  %v1337_v14 = vsel %vm925_vm9, %v5322_v61, %v5323_v26  ;;  %v4516_v22 = vld [vmem:[%s7684_s10 + $0x8] sm:$0xf]  ;;  %5460 = vrot.lane.b32.xlu0 %v6227_v58, %s7700_s14  ;;  %2883 = vrot.lane.b32.xlu1 %v6190_v49, %s7715_s16 }
  0xe1   : > { %v6261_v10 = vpack.c.bf16 %v1336_v18, %v5819_v20  ;;  %v6264_v63 = vpack.c.bf16 %v1337_v14, %v5821_v21  ;;  %v6285_v20 = vpop.permute.xlu0 %5325  ;;  %v6304_v54 = vpop.permute.xlu1 %1789  ;;  %v1535_v14 = vld [vmem:[%s7684_s10] sm:$0xf]  ;;  %s836_s2 = sadd.s32 %s5109_s1, %s5751_s26 }
  0xe2   : > { %4801 = vmatpush3.bf16.msra.mxu1 %v6254_v11  ;;  %v1810_v18 = vpack.c.bf16 %v6304_v54, %v6304_v54  ;;  %s4504_s3 = sshll.u32 %s836_s2, 2 }
  0xe3   : > { %1461 = vmatprep.subr.bf16.mxu0 %v6264_v63  ;;  %4806 = vmatprep.subr.bf16.mxu1 %v5646_v7  ;;  %s838_s30 = scalar_lea.vmem %s7682_s8, %s4504_s3 }
  0xe4   : > { %1462 = vmatpush1.bf16.msra.mxu0 %v6261_v10  ;;  %2872 = vrot.lane.b32.xlu0 %v6190_v49, %s7700_s14 }
  0xe5   : > { %4803 = vmatmul.mubr.msk.bf16.vlgmr.msra.gmra.mxu1 %vm1139_vm10, %v4516_v22  ;;  %4521 = vmatprep.subr.msk.bf16.mxu0 %vm1143_vm4, %v6163_v5  ;;  %v6299_v21 = vpop.permute.xlu0 %5330  ;;  %v6321_v31 = vpop.permute.xlu1 %5335 }
  0xe6   : > { %4807 = vmatpush3.bf16.msra.mxu1 %v6172_v38  ;;  %4816 = vmatprep.mubr.msk.bf16.mxu1 %vm5652_vm0, %v5646_v7  ;;  %v5332_v26 = vunpack.i.l.bf16 %v6299_v21 }
  0xe7   : > { %4518 = vmatmul.mubr.msk.bf16.vlgmr.msra.gmra.mxu0 %vm1139_vm10, %v4516_v22  ;;  %4808 = vmatprep.subr.bf16.mxu1 %v5646_v7 }
  0xe8   : > { %1547 = vmatpush1.bf16.msra.mxu0 %v6181_v44  ;;  %1572 = vmatprep.mubr.bf16.mxu0 %v7702_v16 }
  0xe9   : > { %1548 = vmatprep.subr.bf16.mxu0 %v6183_v45  ;;  %5475 = vrot.lane.b32.xlu1 %v6227_v58, %s7716_s29  ;;  %v6318_v9 = vpop.permute.xlu0 %1763  ;;  %v1775_v2 = vpop.permute.xlu1 %1774 }
  0xea   : > { %4809 = vmatpush3.bf16.msra.mxu1 %v6186_v3  ;;  %5470 = vrot.lane.b32.xlu0 %v6227_v58, %s7714_s0 }
  0xeb   : > { %4810 = vmatprep.subr.bf16.mxu1 %v5646_v7 }
  0xec   : > { %1549 = vmatpush1.bf16.msra.mxu0 %v6198_v51 }
  0xed   : > { %1550 = vmatprep.subr.bf16.mxu0 %v6211_v50  ;;  %2861 = vrot.lane.b32.xlu1 %v6190_v49, %s7716_s29 }
  0xee   : > { %4811 = vmatpush3.bf16.msra.mxu1 %v6203_v53  ;;  %2850 = vrot.lane.b32.xlu0 %v6190_v49, %s7714_s0 }
  0xef   : > { %4812 = vmatprep.subr.bf16.mxu1 %v5646_v7 }
  0xf0   : > { %1551 = vmatpush1.bf16.msra.mxu0 %v6218_v23 }
  0xf1   : > { %1552 = vmatprep.subr.bf16.mxu0 %v6238_v56  ;;  %2839 = vrot.lane.b32.xlu1 %v6190_v49, %s7719_s13 }
  0xf2   : > { %4813 = vmatpush3.bf16.msra.mxu1 %v6232_v15  ;;  %5480 = vrot.lane.b32.xlu0 %v6227_v58, %s7719_s13  ;;  %v6342_v58 = vpop.permute.xlu0 %5340 }
  0xf3   : > { %4814 = vmatprep.subr.bf16.mxu1 %v5646_v7 }
  0xf4   : > { %1553 = vmatpush1.bf16.msra.mxu0 %v6244_v4 }
  0xf5   : > { %1554 = vmatprep.subr.bf16.mxu0 %v6264_v63  ;;  %3297 = vrot.lane.b32.xlu1 %v6344_v46, %s7720_s17 }
  0xf6   : > { %4815 = vmatpush3.bf16.msra.mxu1 %v6254_v11  ;;  %5485 = vrot.lane.b32.xlu0 %v5484_v47, %s7720_s17 }
  0xf7   : > { %4820 = vmatprep.subr.bf16.mxu1 %v5646_v7 }
  0xf8   : > { %1555 = vmatpush1.bf16.msra.mxu0 %v6261_v10 }
  0xf9   : > { %4817 = vmatmul.mubr.msk.bf16.vlgmr.msra.gmra.mxu1 %vm1139_vm10, %v4520_v19  ;;  %4524 = vmatprep.subr.msk.bf16.mxu0 %vm1143_vm4, %v5938_v59  ;;  %v6360_v59 = vpack.i.bf16 %v6344_v46, %v6336_v37 }
  0xfa   : > { %4821 = vmatpush3.bf16.msra.mxu1 %v5943_v62  ;;  %4830 = vmatprep.mubr.msk.bf16.mxu1 %vm5652_vm0, %v5646_v7  ;;  %v6365_v62 = vpop.permute.xlu0 %1741 }
  0xfb   : > { %4522 = vmatmul.mubr.msk.bf16.vlgmr.msra.gmra.mxu0 %vm1139_vm10, %v4520_v19  ;;  %4822 = vmatprep.subr.bf16.mxu1 %v5646_v7  ;;  %v6422_v19 = vsel %vm1143_vm4, %v1810_v18, 0 }
  0xfc   : > { %1631 = vmatpush1.bf16.msra.mxu0 %v5950_v1  ;;  %1656 = vmatprep.mubr.bf16.mxu0 %v7702_v16  ;;  %v6368_v1 = vpop.permute.xlu1 %5345 }
  0xfd   : > { %1632 = vmatprep.subr.bf16.mxu0 %v5952_v6  ;;  %5495 = vrot.lane.b32.xlu1 %v6360_v59, %s7721_s28  ;;  %v5328_v6 = vunpack.i.h.bf16 %v6285_v20 }
  0xfe   : > { %4823 = vmatpush3.bf16.msra.mxu1 %v5958_v12  ;;  %5490 = vrot.lane.b32.xlu0 %v6360_v59, %s7717_s25  ;;  %v5327_v12 = vunpack.i.l.bf16 %v6285_v20  ;;  %v6383_v41 = vpop.permute.xlu0 %5350 }
  0xff   : > { %4824 = vmatprep.subr.bf16.mxu1 %v5646_v7 }
 0x100   : > { %1633 = vmatpush1.bf16.msra.mxu0 %v5960_v13  ;;  %v5338_v13 = vunpack.i.h.bf16 %v6321_v31  ;;  %v1753_v61 = vpop.permute.xlu1 %1752 }
 0x101   : > { %1634 = vmatprep.subr.bf16.mxu0 %v5979_v30  ;;  %v5337_v30 = vunpack.i.l.bf16 %v6321_v31  ;;  %3282 = vrot.lane.b32.xlu1 %v6333_v33, %s7721_s28 }
 0x102   : > { %4825 = vmatpush3.bf16.msra.mxu1 %v5975_v25  ;;  %v5333_v25 = vunpack.i.h.bf16 %v6299_v21  ;;  %3271 = vrot.lane.b32.xlu0 %v6333_v33, %s7717_s25  ;;  %v5347_v21 = vunpack.i.l.bf16 %v6368_v1  ;;  %v1720_v31 = vpop.permute.xlu0 %1719 }
 0x103   : > { %4826 = vmatprep.subr.bf16.mxu1 %v5646_v7  ;;  %v1780_v47 = vsel %vm997_vm3, %v1775_v2, %v5337_v30 }
 0x104   : > { %1635 = vmatpush1.bf16.msra.mxu0 %v5994_v42  ;;  %v1792_v42 = vsel %vm1009_vm1, %v5328_v6, %v6304_v54  ;;  %v5343_v54 = vunpack.i.h.bf16 %v6342_v58  ;;  %v5356_v24 = vpop.permute.xlu1 %5355  ;;  %v6424_v43 = vpack.c.bf16 %v5338_v13, %v5333_v25 }
 0x105   : > { %1636 = vmatprep.subr.bf16.mxu0 %v6010_v55  ;;  %v1791_v55 = vsel %vm1009_vm1, %v5327_v12, %v5328_v6  ;;  %5505 = vrot.lane.b32.xlu1 %v6360_v59, %s7715_s16  ;;  %v6407_v22 = vpack.c.bf16 %v1792_v42, %v1792_v42  ;;  %v5352_v42 = vunpack.i.l.bf16 %v6383_v41 }
 0x106   : > { %4827 = vmatpush3.bf16.msra.mxu1 %v6005_v52  ;;  %v1781_v52 = vsel %vm997_vm3, %v5337_v30, %v5338_v13  ;;  %v1808_v20 = vpack.c.bf16 %v1791_v55, %v1791_v55  ;;  %5500 = vrot.lane.b32.xlu0 %v6360_v59, %s7700_s14  ;;  %v5361_v12 = vpop.permute.xlu0 %5360  ;;  %v5358_v13 = vunpack.i.h.bf16 %v5356_v24  ;;  %v5357_v30 = vunpack.i.l.bf16 %v5356_v24 }
 0x107   : > { %4828 = vmatprep.subr.bf16.mxu1 %v5646_v7  ;;  %v5363_v55 = vunpack.i.h.bf16 %v5361_v12  ;;  %v5362_v18 = vunpack.i.l.bf16 %v5361_v12 }
 0x108   : > { %1637 = vmatpush1.bf16.msra.mxu0 %v6031_v17  ;;  %v1770_v17 = vsel %vm985_vm2, %v5332_v26, %v5333_v25  ;;  %v5353_v25 = vunpack.i.h.bf16 %v6383_v41  ;;  %v1758_v41 = vsel %vm973_vm5, %v1753_v61, %v5347_v21  ;;  %v1737_v24 = vsel %vm949_vm7, %v5357_v30, %v5358_v13 }
 0x109   : > { %1638 = vmatprep.subr.bf16.mxu0 %v6050_v39  ;;  %v5348_v39 = vunpack.i.h.bf16 %v6368_v1  ;;  %v6436_v1 = vsel %vm1143_vm4, %v1808_v20, 0  ;;  %3260 = vrot.lane.b32.xlu1 %v6333_v33, %s7715_s16 }
 0x10a   : > { %4829 = vmatpush3.bf16.msra.mxu1 %v6045_v32  ;;  %v5342_v32 = vunpack.i.l.bf16 %v6342_v58  ;;  %v6428_v58 = vpack.c.bf16 %v1781_v52, %v1770_v17  ;;  %3249 = vrot.lane.b32.xlu0 %v6333_v33, %s7700_s14  ;;  %v1726_v17 = vsel %vm937_vm8, %v5352_v42, %v5353_v25 }
 0x10b   : > { %4834 = vmatprep.subr.bf16.mxu1 %v5646_v7  ;;  %v1759_v2 = vsel %vm973_vm5, %v5347_v21, %v5348_v39  ;;  %v6459_v20 = vpack.c.bf16 %v5348_v39, %v5343_v54  ;;  %v1715_v21 = vsel %vm925_vm9, %v5362_v18, %v5363_v55 }
 0x10c   : > { %1639 = vmatpush1.bf16.msra.mxu0 %v6053_v40  ;;  %v1769_v40 = vsel %vm985_vm2, %v6318_v9, %v5332_v26  ;;  %v1748_v6 = vsel %vm961_vm6, %v5342_v32, %v5343_v54  ;;  %v1731_v26 = vpop.permute.xlu1 %1730  ;;  %v1747_v52 = vsel %vm961_vm6, %v6365_v62, %v5342_v32  ;;  %v1725_v54 = vsel %vm937_vm8, %v1720_v31, %v5352_v42  ;;  %v4534_v42 = vld [vmem:[%s7684_s10 + $0x4] sm:$0xf] }
 0x10d   : > { %4831 = vmatmul.mubr.msk.bf16.vlgmr.msra.gmra.mxu1 %vm1139_vm10, %v1535_v14  ;;  %4528 = vmatprep.subr.msk.bf16.mxu0 %vm1143_vm4, %v6407_v22  ;;  %v6448_v9 = vpack.c.bf16 %v1780_v47, %v1769_v40  ;;  %v6467_v61 = vpack.c.bf16 %v1758_v41, %v1747_v52  ;;  %v1736_v39 = vsel %vm949_vm7, %v1731_v26, %v5357_v30 }
 0x10e   : > { %4835 = vmatpush3.bf16.msra.mxu1 %v6422_v19  ;;  %4844 = vmatprep.mubr.msk.bf16.mxu1 %vm5652_vm0, %v5646_v7  ;;  %v6475_v32 = vpack.c.bf16 %v1737_v24, %v1726_v17  ;;  %v6478_v47 = vpack.c.bf16 %v5358_v13, %v5353_v25  ;;  %v6491_v31 = vpack.c.bf16 %v5363_v55, %v5862_v29  ;;  %v906_v25 = vld [vmem:[%s838_s30] sm:$0xff] }
 0x10f   : > { %4525 = vmatmul.mubr.msk.bf16.vlgmr.msra.gmra.mxu0 %vm1139_vm10, %v1535_v14  ;;  %4836 = vmatprep.subr.bf16.mxu1 %v5646_v7  ;;  %v6456_v14 = vpack.c.bf16 %v1759_v2, %v1748_v6  ;;  %v6484_v6 = vpack.c.bf16 %v1715_v21, %v5860_v28  ;;  %v6488_v2 = vpack.c.bf16 %v1736_v39, %v1725_v54  ;;  %v4527_v28 = vld [vmem:[%s7684_s10 + $0x8] sm:$0xf]  ;;  %v6554_v26 = vunpack.c.l.bf16 %v906_v25 }
 0x110   : > { %1831 = vmatpush1.bf16.msra.mxu0 %v6436_v1  ;;  %1856 = vmatprep.mubr.bf16.mxu0 %v7702_v16  ;;  %v1709_v62 = vpop.permute.xlu1 %1708  ;;  %v6556_v55 = vunpack.c.h.bf16 %v906_v25 }
 0x111   : > { %1832 = vmatprep.subr.bf16.mxu0 %v6428_v58  ;;  %5515 = vrot.lane.b32.xlu1 %v6360_v59, %s7716_s29  ;;  %v1714_v40 = vsel %vm925_vm9, %v1709_v62, %v5362_v18  ;;  %7723 = vst [vmem:[#allocation2_spill] sm:$0xff] %v6554_v26  ;;  %v907_v18 = vld [vmem:[%s838_s30 + $0x8] sm:$0xf]  ;;  %s842_s30 = sadd.s32 9, %s5745_s24  ;;  %s7762_s24 = smov (!%p857_p2, %s5745_s24), 15 }
 0x112   : > { %4837 = vmatpush3.bf16.msra.mxu1 %v6424_v43  ;;  %5510 = vrot.lane.b32.xlu0 %v6360_v59, %s7714_s0  ;;  %v6498_v12 = vpack.c.bf16 %v1714_v40, %v5858_v27  ;;  %v6520_v27 = vpop.permute.xlu0 %5365  ;;  %v6565_v52 = vunpack.c.l.bf16 %v907_v18  ;;  %v5524_v24 = vpack.i.bf16 %v6556_v55, %v6554_v26  ;;  %p845_p1 = scmp.lt.s32.totalorder %s842_s30, 17 }
 0x113   : > { %4838 = vmatprep.subr.bf16.mxu1 %v5646_v7 }
 0x114   : > { %1833 = vmatpush1.bf16.msra.mxu0 %v6448_v9  ;;  %s7760_s30 = smov (!%p845_p1, %s842_s30), 17 }
 0x115   : > { %1834 = vmatprep.subr.bf16.mxu0 %v6456_v14  ;;  %3238 = vrot.lane.b32.xlu1 %v6333_v33, %s7716_s29  ;;  %s5110_s15 = smul.u32 3, %s7760_s30 }
 0x116   : > { %4839 = vmatpush3.bf16.msra.mxu1 %v6459_v20  ;;  %3227 = vrot.lane.b32.xlu0 %v6333_v33, %s7714_s0  ;;  %v6530_v29 = vpop.permute.xlu0 %5370 }
 0x117   : > { %4840 = vmatprep.subr.bf16.mxu1 %v5646_v7  ;;  %v5372_v21 = vunpack.i.l.bf16 %v6530_v29  ;;  %s849_s1 = sadd.s32 %s5110_s15, %s5751_s26 }
 0x118   : > { %1835 = vmatpush1.bf16.msra.mxu0 %v6467_v61  ;;  %s4506_s2 = sshll.u32 %s849_s1, 2 }
 0x119   : > { %1836 = vmatprep.subr.bf16.mxu0 %v6475_v32  ;;  %3216 = vrot.lane.b32.xlu1 %v6333_v33, %s7719_s13  ;;  %s851_s27 = scalar_lea.vmem %s7683_s9, %s4506_s2 }
 0x11a   : > { %4841 = vmatpush3.bf16.msra.mxu1 %v6478_v47  ;;  %5520 = vrot.lane.b32.xlu0 %v6360_v59, %s7719_s13  ;;  %v6533_v59 = vpop.permute.xlu1 %2166  ;;  %v6541_v13 = vpop.permute.xlu0 %2140 }
 0x11b   : > { %4842 = vmatprep.subr.bf16.mxu1 %v5646_v7  ;;  %v2187_v54 = vpack.c.bf16 %v6533_v59, %v6533_v59 }
 0x11c   : > { %1837 = vmatpush1.bf16.msra.mxu0 %v6488_v2 }
 0x11d   : > { %1838 = vmatprep.subr.bf16.mxu0 %v6484_v6  ;;  %3674 = vrot.lane.b32.xlu1 %v6565_v52, %s7720_s17 }
 0x11e   : > { %4843 = vmatpush3.bf16.msra.mxu1 %v6491_v31  ;;  %v6544_v30 = vpop.permute.xlu1 %5375  ;;  %v6563_v41 = vpop.permute.xlu0 %5380  ;;  %5525 = vrot.lane.b32.xlu0 %v5524_v24, %s7720_s17 }
 0x11f   : > { %4848 = vmatprep.subr.bf16.mxu1 %v5646_v7 }
 0x120   : > { %1839 = vmatpush1.bf16.msra.mxu0 %v6498_v12 }
 0x121   : > { %4845 = vmatmul.mubr.msk.bf16.vlgmr.msra.gmra.mxu1 %vm1139_vm10, %v4527_v28  ;;  %4535 = vmatprep.subr.msk.bf16.mxu0 %vm1143_vm4, %v6407_v22 }
 0x122   : > { %4849 = vmatpush3.bf16.msra.mxu1 %v6422_v19  ;;  %4858 = vmatprep.mubr.msk.bf16.mxu1 %vm5652_vm0, %v5646_v7  ;;  %v2152_v17 = vpop.permute.xlu1 %2151 }
 0x123   : > { %4529 = vmatmul.mubr.msk.bf16.vlgmr.msra.gmra.mxu0 %vm1139_vm10, %v4527_v28  ;;  %4850 = vmatprep.subr.bf16.mxu1 %v5646_v7  ;;  %v1912_v28 = vld [vmem:[%s7684_s10] sm:$0xf] }
 0x124   : > { %1924 = vmatpush1.bf16.msra.mxu0 %v6436_v1  ;;  %1949 = vmatprep.mubr.bf16.mxu0 %v7702_v16 }
 0x125   : > { %1925 = vmatprep.subr.bf16.mxu0 %v6428_v58 }
 0x126   : > { %4851 = vmatpush3.bf16.msra.mxu1 %v6424_v43 }
 0x127   : > { %4852 = vmatprep.subr.bf16.mxu1 %v5646_v7 }
 0x128   : > { %1926 = vmatpush1.bf16.msra.mxu0 %v6448_v9 }
 0x129   : > { %1927 = vmatprep.subr.bf16.mxu0 %v6456_v14 }
 0x12a   : > { %4853 = vmatpush3.bf16.msra.mxu1 %v6459_v20 }
 0x12b   : > { %4854 = vmatprep.subr.bf16.mxu1 %v5646_v7 }
 0x12c   : > { %1928 = vmatpush1.bf16.msra.mxu0 %v6467_v61 }
 0x12d   : > { %1929 = vmatprep.subr.bf16.mxu0 %v6475_v32 }
 0x12e   : > { %4855 = vmatpush3.bf16.msra.mxu1 %v6478_v47 }
 0x12f   : > { %4856 = vmatprep.subr.bf16.mxu1 %v5646_v7 }
 0x130   : > { %1930 = vmatpush1.bf16.msra.mxu0 %v6488_v2 }
 0x131   : > { %1931 = vmatprep.subr.bf16.mxu0 %v6484_v6 }
 0x132   : > { %4857 = vmatpush3.bf16.msra.mxu1 %v6491_v31 }
 0x133   : > { %4862 = vmatprep.subr.bf16.mxu1 %v5646_v7 }
 0x134   : > { %1932 = vmatpush1.bf16.msra.mxu0 %v6498_v12 }
 0x135   : > { %4859 = vmatmul.mubr.msk.bf16.vlgmr.msra.gmra.mxu1 %vm1139_vm10, %v4534_v42  ;;  %4538 = vmatprep.subr.msk.bf16.mxu0 %vm1143_vm4, %v6163_v5  ;;  %v6581_v5 = vpack.i.bf16 %v6565_v52, %v6556_v55 }
 0x136   : > { %4863 = vmatpush3.bf16.msra.mxu1 %v6172_v38  ;;  %4872 = vmatprep.mubr.msk.bf16.mxu1 %vm5652_vm0, %v5646_v7  ;;  %v6586_v38 = vpop.permute.xlu0 %2118 }
 0x137   : > { %4536 = vmatmul.mubr.msk.bf16.vlgmr.msra.gmra.mxu0 %vm1139_vm10, %v4534_v42  ;;  %4864 = vmatprep.subr.bf16.mxu1 %v5646_v7  ;;  %v6643_v42 = vsel %vm1143_vm4, %v2187_v54, 0 }
 0x138   : > { %2008 = vmatpush1.bf16.msra.mxu0 %v6181_v44  ;;  %2033 = vmatprep.mubr.bf16.mxu0 %v7702_v16  ;;  %v6589_v44 = vpop.permute.xlu1 %5385 }
 0x139   : > { %2009 = vmatprep.subr.bf16.mxu0 %v6183_v45  ;;  %5535 = vrot.lane.b32.xlu1 %v6581_v5, %s7721_s28  ;;  %v5368_v45 = vunpack.i.h.bf16 %v6520_v27 }
 0x13a   : > { %4865 = vmatpush3.bf16.msra.mxu1 %v6186_v3  ;;  %5530 = vrot.lane.b32.xlu0 %v6581_v5, %s7717_s25  ;;  %v5367_v3 = vunpack.i.l.bf16 %v6520_v27  ;;  %v6604_v62 = vpop.permute.xlu0 %5390 }
 0x13b   : > { %4866 = vmatprep.subr.bf16.mxu1 %v5646_v7 }
 0x13c   : > { %2010 = vmatpush1.bf16.msra.mxu0 %v6198_v51  ;;  %v5378_v51 = vunpack.i.h.bf16 %v6544_v30  ;;  %v2130_v39 = vpop.permute.xlu1 %2129 }
 0x13d   : > { %2011 = vmatprep.subr.bf16.mxu0 %v6211_v50  ;;  %v5377_v50 = vunpack.i.l.bf16 %v6544_v30  ;;  %3659 = vrot.lane.b32.xlu1 %v6554_v26, %s7721_s28  ;;  %v5382_v30 = vunpack.i.l.bf16 %v6563_v41 }
 0x13e   : > { %4867 = vmatpush3.bf16.msra.mxu1 %v6203_v53  ;;  %v5373_v53 = vunpack.i.h.bf16 %v6530_v29  ;;  %3648 = vrot.lane.b32.xlu0 %v6554_v26, %s7717_s25  ;;  %v5387_v29 = vunpack.i.l.bf16 %v6589_v44 }
 0x13f   : > { %4868 = vmatprep.subr.bf16.mxu1 %v5646_v7  ;;  %v2157_v24 = vsel %vm997_vm3, %v2152_v17, %v5377_v50 }
 0x140   : > { %2012 = vmatpush1.bf16.msra.mxu0 %v6218_v23  ;;  %v2169_v23 = vsel %vm1009_vm1, %v5368_v45, %v6533_v59  ;;  %v5383_v59 = vunpack.i.h.bf16 %v6563_v41  ;;  %v5396_v25 = vpop.permute.xlu1 %5395  ;;  %v6645_v18 = vpack.c.bf16 %v5378_v51, %v5373_v53 }
 0x141   : > { %2013 = vmatprep.subr.bf16.mxu0 %v6238_v56  ;;  %v2168_v56 = vsel %vm1009_vm1, %v5367_v3, %v5368_v45  ;;  %5545 = vrot.lane.b32.xlu1 %v6581_v5, %s7715_s16  ;;  %v6624_v40 = vpack.c.bf16 %v2169_v23, %v2169_v23  ;;  %v5392_v23 = vunpack.i.l.bf16 %v6604_v62 }
 0x142   : > { %4869 = vmatpush3.bf16.msra.mxu1 %v6232_v15  ;;  %v2158_v15 = vsel %vm997_vm3, %v5377_v50, %v5378_v51  ;;  %v2185_v27 = vpack.c.bf16 %v2168_v56, %v2168_v56  ;;  %5540 = vrot.lane.b32.xlu0 %v6581_v5, %s7700_s14  ;;  %v2125_v45 = vsel %vm961_vm6, %v5382_v30, %v5383_v59  ;;  %v5398_v51 = vunpack.i.h.bf16 %v5396_v25 }
 0x143   : > { %4870 = vmatprep.subr.bf16.mxu1 %v5646_v7  ;;  %v5397_v50 = vunpack.i.l.bf16 %v5396_v25 }
 0x144   : > { %2014 = vmatpush1.bf16.msra.mxu0 %v6244_v4  ;;  %v2147_v4 = vsel %vm985_vm2, %v5372_v21, %v5373_v53  ;;  %v5393_v53 = vunpack.i.h.bf16 %v6604_v62  ;;  %v2135_v62 = vsel %vm973_vm5, %v2130_v39, %v5387_v29 }
 0x145   : > { %2015 = vmatprep.subr.bf16.mxu0 %v6264_v63  ;;  %v5388_v63 = vunpack.i.h.bf16 %v6589_v44  ;;  %v6649_v41 = vpack.c.bf16 %v2158_v15, %v2147_v4  ;;  %v6657_v44 = vsel %vm1143_vm4, %v2185_v27, 0  ;;  %3637 = vrot.lane.b32.xlu1 %v6554_v26, %s7715_s16  ;;  %v2124_v15 = vsel %vm961_vm6, %v6586_v38, %v5382_v30 }
 0x146   : > { %4871 = vmatpush3.bf16.msra.mxu1 %v6254_v11  ;;  %v2097_v11 = vpop.permute.xlu0 %2096  ;;  %3626 = vrot.lane.b32.xlu0 %v6554_v26, %s7700_s14  ;;  %v2103_v4 = vsel %vm937_vm8, %v5392_v23, %v5393_v53  ;;  %v2114_v25 = vsel %vm949_vm7, %v5397_v50, %v5398_v51  ;;  %v6688_v39 = vpack.c.bf16 %v2135_v62, %v2124_v15 }
 0x147   : > { %4876 = vmatprep.subr.bf16.mxu1 %v5646_v7  ;;  %v2136_v17 = vsel %vm973_vm5, %v5387_v29, %v5388_v63  ;;  %v6680_v27 = vpack.c.bf16 %v5388_v63, %v5383_v59  ;;  %v2102_v59 = vsel %vm937_vm8, %v2097_v11, %v5392_v23  ;;  %v6696_v30 = vpack.c.bf16 %v2114_v25, %v2103_v4  ;;  %v4548_v23 = vld [vmem:[%s7684_s10 + $0x4] sm:$0xf] }
 0x148   : > { %2016 = vmatpush1.bf16.msra.mxu0 %v6261_v10  ;;  %v2146_v10 = vsel %vm985_vm2, %v6541_v13, %v5372_v21  ;;  %v2108_v21 = vpop.permute.xlu1 %2107 }
 0x149   : > { %4873 = vmatmul.mubr.msk.bf16.vlgmr.msra.gmra.mxu1 %vm1139_vm10, %v1912_v28  ;;  %4542 = vmatprep.subr.msk.bf16.mxu0 %vm1143_vm4, %v6624_v40  ;;  %v6669_v13 = vpack.c.bf16 %v2157_v24, %v2146_v10  ;;  %v2113_v63 = vsel %vm949_vm7, %v2108_v21, %v5397_v50  ;;  %v6699_v24 = vpack.c.bf16 %v5398_v51, %v5393_v53  ;;  %v911_v53 = vld [vmem:[%s851_s27] sm:$0xff] }
 0x14a   : > { %4877 = vmatpush3.bf16.msra.mxu1 %v6643_v42  ;;  %4886 = vmatprep.mubr.msk.bf16.mxu1 %vm5652_vm0, %v5646_v7  ;;  %v5401_v3 = vpop.permute.xlu0 %5400  ;;  %v6775_v21 = vunpack.c.l.bf16 %v911_v53 }
 0x14b   : > { %4539 = vmatmul.mubr.msk.bf16.vlgmr.msra.gmra.mxu0 %vm1139_vm10, %v1912_v28  ;;  %4878 = vmatprep.subr.bf16.mxu1 %v5646_v7  ;;  %v5403_v56 = vunpack.i.h.bf16 %v5401_v3  ;;  %v5402_v54 = vunpack.i.l.bf16 %v5401_v3  ;;  %v6677_v28 = vpack.c.bf16 %v2136_v17, %v2125_v45  ;;  %v6709_v17 = vpack.c.bf16 %v2113_v63, %v2102_v59 }
 0x14c   : > { %2208 = vmatpush1.bf16.msra.mxu0 %v6657_v44  ;;  %2233 = vmatprep.mubr.bf16.mxu0 %v7702_v16  ;;  %v2086_v38 = vpop.permute.xlu1 %2085 }
 0x14d   : > { %2209 = vmatprep.subr.bf16.mxu0 %v6649_v41  ;;  %5555 = vrot.lane.b32.xlu1 %v6581_v5, %s7716_s29  ;;  %v2092_v29 = vsel %vm925_vm9, %v5402_v54, %v5403_v56  ;;  %v2091_v10 = vsel %vm925_vm9, %v2086_v38, %v5402_v54  ;;  %v6712_v11 = vpack.c.bf16 %v5403_v56, %v5901_v36  ;;  %v6777_v56 = vunpack.c.h.bf16 %v911_v53  ;;  %v912_v54 = vld [vmem:[%s851_s27 + $0x8] sm:$0xf] }
 0x14e   : > { %4879 = vmatpush3.bf16.msra.mxu1 %v6645_v18  ;;  %5550 = vrot.lane.b32.xlu0 %v6581_v5, %s7714_s0  ;;  %v6705_v45 = vpack.c.bf16 %v2092_v29, %v5899_v35  ;;  %v6719_v3 = vpack.c.bf16 %v2091_v10, %v5897_v34  ;;  %v4541_v35 = vld [vmem:[%s7684_s10 + $0x8] sm:$0xf]  ;;  %v6741_v34 = vpop.permute.xlu0 %5405  ;;  %v6788_v4 = vunpack.c.l.bf16 %v912_v54 }
 0x14f   : > { %4880 = vmatprep.subr.bf16.mxu1 %v5646_v7  ;;  %7724 = vst [vmem:[#allocation3_spill] sm:$0xff] %v6777_v56  ;;  %v5564_v25 = vpack.i.bf16 %v6777_v56, %v6775_v21  ;;  %v5407_v10 = vunpack.i.l.bf16 %v6741_v34 }
 0x150   : > { %2210 = vmatpush1.bf16.msra.mxu0 %v6669_v13  ;;  %v6750_v36 = vpop.permute.xlu1 %2543  ;;  %7725 = vst [vmem:[#allocation4_spill] sm:$0xff] %v6788_v4 }
 0x151   : > { %2211 = vmatprep.subr.bf16.mxu0 %v6677_v28  ;;  %3615 = vrot.lane.b32.xlu1 %v6554_v26, %s7716_s29 }
 0x152   : > { %4881 = vmatpush3.bf16.msra.mxu1 %v6680_v27  ;;  %3604 = vrot.lane.b32.xlu0 %v6554_v26, %s7714_s0 }
 0x153   : > { %4882 = vmatprep.subr.bf16.mxu1 %v5646_v7 }
 0x154   : > { %2212 = vmatpush1.bf16.msra.mxu0 %v6688_v39  ;;  %v6760_v51 = vpop.permute.xlu1 %5415 }
 0x155   : > { %2213 = vmatprep.subr.bf16.mxu0 %v6696_v30  ;;  %3593 = vrot.lane.b32.xlu1 %v6554_v26, %s7719_s13  ;;  %v5417_v53 = vunpack.i.l.bf16 %v6760_v51 }
 0x156   : > { %4883 = vmatpush3.bf16.msra.mxu1 %v6699_v24  ;;  %5560 = vrot.lane.b32.xlu0 %v6581_v5, %s7719_s13  ;;  %v6753_v5 = vpop.permute.xlu0 %5410 }
 0x157   : > { %4884 = vmatprep.subr.bf16.mxu1 %v5646_v7  ;;  %v5413_v54 = vunpack.i.h.bf16 %v6753_v5 }
 0x158   : > { %2214 = vmatpush1.bf16.msra.mxu0 %v6709_v17  ;;  %v6781_v62 = vpop.permute.xlu1 %2528 }
 0x159   : > { %2215 = vmatprep.subr.bf16.mxu0 %v6705_v45  ;;  %4051 = vrot.lane.b32.xlu1 %v6788_v4, %s7720_s17 }
 0x15a   : > { %4885 = vmatpush3.bf16.msra.mxu1 %v6712_v11  ;;  %v6764_v50 = vpop.permute.xlu0 %2517  ;;  %5565 = vrot.lane.b32.xlu0 %v5564_v25, %s7720_s17  ;;  %s5112_s17 = smul.u32 48, %s7742_s18 }
 0x15b   : > { %4890 = vmatprep.subr.bf16.mxu1 %v5646_v7 }
 0x15c   : > { %2216 = vmatpush1.bf16.msra.mxu0 %v6719_v3  ;;  %v6809_v38 = vpop.permute.xlu1 %5425 }
 0x15d   : > { %4887 = vmatmul.mubr.msk.bf16.vlgmr.msra.gmra.mxu1 %vm1139_vm10, %v4541_v35  ;;  %4549 = vmatprep.subr.msk.bf16.mxu0 %vm1143_vm4, %v6624_v40 }
 0x15e   : > { %4891 = vmatpush3.bf16.msra.mxu1 %v6643_v42  ;;  %4900 = vmatprep.mubr.msk.bf16.mxu1 %vm5652_vm0, %v5646_v7  ;;  %v6786_v15 = vpop.permute.xlu0 %5420 }
 0x15f   : > { %4543 = vmatmul.mubr.msk.bf16.vlgmr.msra.gmra.mxu0 %vm1139_vm10, %v4541_v35  ;;  %4892 = vmatprep.subr.bf16.mxu1 %v5646_v7  ;;  %v5418_v35 = vunpack.i.h.bf16 %v6760_v51  ;;  %v2564_v51 = vpack.c.bf16 %v6750_v36, %v6750_v36 }
 0x160   : > { %2301 = vmatpush1.bf16.msra.mxu0 %v6657_v44  ;;  %2326 = vmatprep.mubr.bf16.mxu0 %v7702_v16 }
 0x161   : > { %2302 = vmatprep.subr.bf16.mxu0 %v6649_v41 }
 0x162   : > { %4893 = vmatpush3.bf16.msra.mxu1 %v6645_v18  ;;  %v6813_v29 = vpop.permute.xlu0 %2495 }
 0x163   : > { %4894 = vmatprep.subr.bf16.mxu1 %v5646_v7 }
 0x164   : > { %2303 = vmatpush1.bf16.msra.mxu0 %v6669_v13 }
 0x165   : > { %2304 = vmatprep.subr.bf16.mxu0 %v6677_v28 }
 0x166   : > { %4895 = vmatpush3.bf16.msra.mxu1 %v6680_v27 }
 0x167   : > { %4896 = vmatprep.subr.bf16.mxu1 %v5646_v7 }
 0x168   : > { %2305 = vmatpush1.bf16.msra.mxu0 %v6688_v39 }
 0x169   : > { %2306 = vmatprep.subr.bf16.mxu0 %v6696_v30 }
 0x16a   : > { %4897 = vmatpush3.bf16.msra.mxu1 %v6699_v24 }
 0x16b   : > { %4898 = vmatprep.subr.bf16.mxu1 %v5646_v7 }
 0x16c   : > { %2307 = vmatpush1.bf16.msra.mxu0 %v6709_v17 }
 0x16d   : > { %2308 = vmatprep.subr.bf16.mxu0 %v6705_v45 }
 0x16e   : > { %4899 = vmatpush3.bf16.msra.mxu1 %v6712_v11 }
 0x16f   : > { %4904 = vmatprep.subr.bf16.mxu1 %v5646_v7 }
 0x170   : > { %2309 = vmatpush1.bf16.msra.mxu0 %v6719_v3 }
 0x171   : > { %4901 = vmatmul.mubr.msk.bf16.vlgmr.msra.gmra.mxu1 %vm1139_vm10, %v4548_v23  ;;  %4552 = vmatprep.subr.msk.bf16.mxu0 %vm1143_vm4, %v6407_v22 }
 0x172   : > { %4905 = vmatpush3.bf16.msra.mxu1 %v6422_v19  ;;  %4914 = vmatprep.mubr.msk.bf16.mxu1 %vm5652_vm0, %v5646_v7  ;;  %v6806_v19 = vpack.i.bf16 %v6788_v4, %v6777_v56 }
 0x173   : > { %4550 = vmatmul.mubr.msk.bf16.vlgmr.msra.gmra.mxu0 %vm1139_vm10, %v4548_v23  ;;  %4906 = vmatprep.subr.bf16.mxu1 %v5646_v7  ;;  %v6833_v23 = vpop.permute.xlu0 %5430 }
 0x174   : > { %2385 = vmatpush1.bf16.msra.mxu0 %v6436_v1  ;;  %2410 = vmatprep.mubr.bf16.mxu0 %v7702_v16 }
 0x175   : > { %2386 = vmatprep.subr.bf16.mxu0 %v6428_v58  ;;  %v6800_v22 = vpop.f32.mrf.mxu1  ;;  %5575 = vrot.lane.b32.xlu1 %v6806_v19, %s7721_s28 }
 0x176   : > { %4907 = vmatpush3.bf16.msra.mxu1 %v6424_v43  ;;  %v5408_v43 = vunpack.i.h.bf16 %v6741_v34  ;;  %5570 = vrot.lane.b32.xlu0 %v6806_v19, %s7717_s25 }
 0x177   : > { %4908 = vmatprep.subr.bf16.mxu1 %v5646_v7  ;;  %v4776_v1 = vpop.f32.mrf.mxu1 }
 0x178   : > { %2387 = vmatpush1.bf16.msra.mxu0 %v6448_v9  ;;  %v6816_v58 = vpop.f32.mrf.mxu0  ;;  %v2546_v34 = vsel %vm1009_vm1, %v5408_v43, %v6750_v36  ;;  %v5428_v36 = vunpack.i.h.bf16 %v6809_v38 }
 0x179   : > { %2388 = vmatprep.subr.bf16.mxu0 %v6456_v14  ;;  %v1231_v63 = vpop.f32.mrf.mxu1  ;;  %4036 = vrot.lane.b32.xlu1 %v6775_v21, %s7721_s28  ;;  %v6849_v1 = vpack.c.bf16 %v2546_v34, %v2546_v34  ;;  %v6874_v34 = vpack.c.bf16 %v5418_v35, %v5413_v54 }
 0x17a   : > { %4909 = vmatpush3.bf16.msra.mxu1 %v6459_v20  ;;  %v6823_v59 = vpop.f32.mrf.mxu0  ;;  %v2507_v20 = vpop.permute.xlu1 %2506  ;;  %4025 = vrot.lane.b32.xlu0 %v6775_v21, %s7717_s25  ;;  %s7726_s25 = smov 109  }
 0x17b   : > { %4910 = vmatprep.subr.bf16.mxu1 %v5646_v7  ;;  %v4777_v9 = vpop.f32.mrf.mxu1 }
 0x17c   : > { %2389 = vmatpush1.bf16.msra.mxu0 %v6467_v61  ;;  %v1191_v14 = vpop.f32.mrf.mxu0  ;;  %v5412_v61 = vunpack.i.l.bf16 %v6753_v5  ;;  %v2474_v9 = vpop.permute.xlu0 %2473 }
 0x17d   : > { %2390 = vmatprep.subr.bf16.mxu0 %v6475_v32  ;;  %v2545_v32 = vsel %vm1009_vm1, %v5407_v10, %v5408_v43  ;;  %5585 = vrot.lane.b32.xlu1 %v6806_v19, %s7715_s16  ;;  %v5423_v43 = vunpack.i.h.bf16 %v6786_v15  ;;  %v6872_v14 = vsel %vm1143_vm4, %v2564_v51, 0  ;;  %v5433_v51 = vunpack.i.h.bf16 %v6833_v23 }
 0x17e   : > { %4911 = vmatpush3.bf16.msra.mxu1 %v6478_v47  ;;  %v1192_v25 = vpop.f32.mrf.mxu0  ;;  %v2289_v47 = vld [vmem:[%s7684_s10] sm:$0xf]  ;;  %v2562_v5 = vpack.c.bf16 %v2545_v32, %v2545_v32  ;;  %v2524_v63 = vsel %vm985_vm2, %v5412_v61, %v5413_v54  ;;  %5580 = vrot.lane.b32.xlu0 %v6806_v19, %s7726_s25  ;;  %v5436_v10 = vpop.permute.xlu1 %5435 }
 0x17f   : > { %4912 = vmatprep.subr.bf16.mxu1 %v5646_v7  ;;  %v5438_v54 = vunpack.i.h.bf16 %v5436_v10  ;;  %v5437_v32 = vunpack.i.l.bf16 %v5436_v10 }
 0x180   : > { %2391 = vmatpush1.bf16.msra.mxu0 %v6488_v2  ;;  %v2535_v2 = vsel %vm997_vm3, %v5417_v53, %v5418_v35  ;;  %v6887_v25 = vsel %vm1143_vm4, %v2562_v5, 0 }
 0x181   : > { %2392 = vmatprep.subr.bf16.mxu0 %v6484_v6  ;;  %v5427_v6 = vunpack.i.l.bf16 %v6809_v38  ;;  %v2534_v38 = vsel %vm997_vm3, %v6781_v62, %v5417_v53  ;;  %v5441_v53 = vpop.permute.xlu0 %5440  ;;  %4014 = vrot.lane.b32.xlu1 %v6775_v21, %s7715_s16  ;;  %v2491_v56 = vsel %vm949_vm7, %v5437_v32, %v5438_v54 }
 0x182   : > { %4913 = vmatpush3.bf16.msra.mxu1 %v6491_v31  ;;  %v5422_v31 = vunpack.i.l.bf16 %v6786_v15  ;;  %v6879_v15 = vpack.c.bf16 %v2535_v2, %v2524_v63  ;;  %v5432_v63 = vunpack.i.l.bf16 %v6833_v23  ;;  %v5443_v5 = vunpack.i.h.bf16 %v5441_v53  ;;  %4003 = vrot.lane.b32.xlu0 %v6775_v21, %s7726_s25 }
 0x183   : > { %4918 = vmatprep.subr.bf16.mxu1 %v5646_v7  ;;  %v2513_v62 = vsel %vm973_vm5, %v5427_v6, %v5428_v36  ;;  %v5442_v2 = vunpack.i.l.bf16 %v5441_v53  ;;  %v2512_v23 = vsel %vm973_vm5, %v2507_v20, %v5427_v6 }
 0x184   : > { %2393 = vmatpush1.bf16.msra.mxu0 %v6498_v12  ;;  %v2523_v12 = vsel %vm985_vm2, %v6764_v50, %v5412_v61  ;;  %v2502_v35 = vsel %vm961_vm6, %v5422_v31, %v5423_v43  ;;  %v2485_v50 = vpop.permute.xlu1 %2484  ;;  %v2501_v10 = vsel %vm961_vm6, %v6813_v29, %v5422_v31  ;;  %v2480_v53 = vsel %vm937_vm8, %v5432_v63, %v5433_v51 }
 0x185   : > { %4915 = vmatmul.mubr.msk.bf16.vlgmr.msra.gmra.mxu1 %vm1139_vm10, %v2289_v47  ;;  %4556 = vmatprep.subr.msk.bf16.mxu0 %vm1143_vm4, %v6849_v1  ;;  %v6899_v61 = vpack.c.bf16 %v2534_v38, %v2523_v12  ;;  %v6912_v38 = vpack.c.bf16 %v5428_v36, %v5423_v43  ;;  %v6922_v29 = vpack.c.bf16 %v2512_v23, %v2501_v10 }
 0x186   : > { %4919 = vmatpush3.bf16.msra.mxu1 %v6872_v14  ;;  %4928 = vmatprep.mubr.msk.bf16.mxu1 %vm5652_vm0, %v5646_v7  ;;  %v2490_v43 = vsel %vm949_vm7, %v2485_v50, %v5437_v32  ;;  %v2479_v31 = vsel %vm937_vm8, %v2474_v9, %v5432_v63  ;;  %v6949_v9 = vpack.c.bf16 %v5443_v5, %v6025_v0  ;;  %v4555_v0 = vld [vmem:[%s7684_s10 + $0x8] sm:$0xf] }
 0x187   : > { %4553 = vmatmul.mubr.msk.bf16.vlgmr.msra.gmra.mxu0 %vm1139_vm10, %v2289_v47  ;;  %4920 = vmatprep.subr.bf16.mxu1 %v5646_v7 }
 0x188   : > { %2585 = vmatpush1.bf16.msra.mxu0 %v6887_v25  ;;  %2610 = vmatprep.mubr.bf16.mxu0 %v7702_v16  ;;  %v6909_v16 = vpack.c.bf16 %v2513_v62, %v2502_v35  ;;  %v2463_v20 = vpop.permute.xlu1 %2462  ;;  %v6932_v35 = vpack.c.bf16 %v2491_v56, %v2480_v53  ;;  %v6935_v62 = vpack.c.bf16 %v5438_v54, %v5433_v51 }
 0x189   : > { %2586 = vmatprep.subr.bf16.mxu0 %v6879_v15  ;;  %5595 = vrot.lane.b32.xlu1 %v6806_v19, %s7716_s29  ;;  %v6946_v56 = vpack.c.bf16 %v2490_v43, %v2479_v31 }
 0x18a   : > { %4921 = vmatpush3.bf16.msra.mxu1 %v6874_v34  ;;  %5590 = vrot.lane.b32.xlu0 %v6806_v19, %s7714_s0 }
 0x18b   : > { %v6901_v47 = vpop.f32.mrf.mxu1  ;;  %4922 = vmatprep.subr.bf16.mxu1 %v5646_v7 }
 0x18c   : > { %2587 = vmatpush1.bf16.msra.mxu0 %v6899_v61  ;;  %v6992_v51 = vpop.permute.xlu1 %2920  ;;  %v1322_v63 = vadd.f32 %v6901_v47, %v6800_v22 }
 0x18d   : > { %v6914_v12 = vpop.f32.mrf.mxu0  ;;  %v4790_v4 = vpop.f32.mrf.mxu1  ;;  %2588 = vmatprep.subr.bf16.mxu0 %v6909_v16  ;;  %3992 = vrot.lane.b32.xlu1 %v6775_v21, %s7716_s29 }
 0x18e   : > { %4923 = vmatpush3.bf16.msra.mxu1 %v6912_v38  ;;  %v2469_v4 = vsel %vm925_vm9, %v5442_v2, %v5443_v5  ;;  %3981 = vrot.lane.b32.xlu0 %v6775_v21, %s7714_s0  ;;  %s5111_s0 = smul.u32 3, %s7762_s24  ;;  %v1281_v5 = vadd.f32 %v6914_v12, %v6816_v58 }
 0x18f   : > { %v6924_v6 = vpop.f32.mrf.mxu0  ;;  %v1324_v36 = vpop.f32.mrf.mxu1  ;;  %4924 = vmatprep.subr.bf16.mxu1 %v5646_v7  ;;  %v6941_v26 = vpack.c.bf16 %v2469_v4, %v6018_v60 }
 0x190   : > { %2589 = vmatpush1.bf16.msra.mxu0 %v6922_v29  ;;  %v2468_v36 = vsel %vm925_vm9, %v2463_v20, %v5442_v2  ;;  %s861_s24 = sadd.s32 %s5112_s17, %s5111_s0  ;;  %v1283_v20 = vadd.f32 %v6924_v6, %v6823_v59  ;;  %v7015_v43 = vpop.permute.xlu1 %5455 }
 0x191   : > { %v1284_v23 = vpop.f32.mrf.mxu0  ;;  %v4791_v10 = vpop.f32.mrf.mxu1  ;;  %2590 = vmatprep.subr.bf16.mxu0 %v6932_v35  ;;  %v6956_v60 = vpack.c.bf16 %v2468_v36, %v6016_v57  ;;  %3970 = vrot.lane.b32.xlu1 %v6775_v21, %s7719_s13  ;;  %s4508_s18 = sshll.u32 %s861_s24, 3 }
 0x192   : > { %4925 = vmatpush3.bf16.msra.mxu1 %v6935_v62  ;;  %5600 = vrot.lane.b32.xlu0 %v6806_v19, %s7719_s13  ;;  %v6977_v57 = vpop.permute.xlu0 %5445  ;;  %v7727_v19 = vmov 0   ;;  %s7001_s15 = scalar_lea.vmem %s7685_s11, %s4508_s18  ;;  %v4562_v23 = vld [vmem:[%s7684_s10 + $0x4] sm:$0xf] }
 0x193   : > { %v1285_v54 = vpop.f32.mrf.mxu0  ;;  %4926 = vmatprep.subr.bf16.mxu1 %v5646_v7 }
 0x194   : > { %2591 = vmatpush1.bf16.msra.mxu0 %v6946_v56  ;;  %v2906_v54 = vpop.permute.xlu1 %2905 }
 0x195   : > { %2592 = vmatprep.subr.bf16.mxu0 %v6941_v26 }
 0x196   : > { %4927 = vmatpush3.bf16.msra.mxu1 %v6949_v9  ;;  %v6988_v32 = vpop.permute.xlu0 %5450 }
 0x197   : > { %4932 = vmatprep.subr.bf16.mxu1 %v5646_v7 }
 0x198   : > { %2593 = vmatpush1.bf16.msra.mxu0 %v6956_v60 }
 0x199   : > { %4929 = vmatmul.mubr.msk.bf16.vlgmr.msra.gmra.mxu1 %vm1139_vm10, %v4555_v0  ;;  %4563 = vmatprep.subr.msk.bf16.mxu0 %vm1143_vm4, %v6849_v1 }
 0x19a   : > { %4933 = vmatpush3.bf16.msra.mxu1 %v6872_v14  ;;  %4942 = vmatprep.mubr.msk.bf16.mxu1 %vm5652_vm0, %v5646_v7  ;;  %v7007_v22 = vpop.permute.xlu0 %2894 }
 0x19b   : > { %4557 = vmatmul.mubr.msk.bf16.vlgmr.msra.gmra.mxu0 %vm1139_vm10, %v4555_v0  ;;  %4934 = vmatprep.subr.bf16.mxu1 %v5646_v7 }
 0x19c   : > { %2678 = vmatpush1.bf16.msra.mxu0 %v6887_v25  ;;  %2703 = vmatprep.mubr.bf16.mxu0 %v7727_v19 }
 0x19d   : > { %2679 = vmatprep.subr.bf16.mxu0 %v6879_v15 }
 0x19e   : > { %4935 = vmatpush3.bf16.msra.mxu1 %v6874_v34  ;;  %v7026_v10 = vpop.permute.xlu0 %5460 }
 0x19f   : > { %4936 = vmatprep.subr.bf16.mxu1 %v5646_v7 }
 0x1a0   : > { %2680 = vmatpush1.bf16.msra.mxu0 %v6899_v61 }
 0x1a1   : > { %2681 = vmatprep.subr.bf16.mxu0 %v6909_v16 }
 0x1a2   : > { %4937 = vmatpush3.bf16.msra.mxu1 %v6912_v38  ;;  %v7040_v0 = vpop.permute.xlu0 %2872 }
 0x1a3   : > { %4938 = vmatprep.subr.bf16.mxu1 %v5646_v7 }
 0x1a4   : > { %2682 = vmatpush1.bf16.msra.mxu0 %v6922_v29 }
 0x1a5   : > { %v1522_v50 = vpop.f32.mrf.mxu1  ;;  %2683 = vmatprep.subr.bf16.mxu0 %v6932_v35 }
 0x1a6   : > { %v1530_v2 = vadd.f32 %v1522_v50, %v1322_v63  ;;  %4939 = vmatpush3.bf16.msra.mxu1 %v6935_v62  ;;  %v5452_v63 = vunpack.i.l.bf16 %v6988_v32 }
 0x1a7   : > { %v1481_v47 = vpop.f32.mrf.mxu0  ;;  %v4804_v53 = vpop.f32.mrf.mxu1  ;;  %4940 = vmatprep.subr.bf16.mxu1 %v5646_v7 }
 0x1a8   : > { %1534 = vst.msk [vmem:[%s7001_s15 + $0x10] sm:$0xff] %vm1533_vm11, %v1530_v2  ;;  %v1528_v4 = vadd.f32 %v1481_v47, %v1281_v5  ;;  %2684 = vmatpush1.bf16.msra.mxu0 %v6946_v56  ;;  %v2941_v2 = vpack.c.bf16 %v6992_v51, %v6992_v51  ;;  %v2666_v53 = vld [vmem:[%s7684_s10] sm:$0xf] }
 0x1a9   : > { %v1483_v58 = vpop.f32.mrf.mxu0  ;;  %v1525_v12 = vpop.f32.mrf.mxu1  ;;  %2685 = vmatprep.subr.bf16.mxu0 %v6941_v26 }
 0x1aa   : > { %1531 = vst [vmem:[%s7001_s15] sm:$0xff] %v1528_v4  ;;  %v1529_v31 = vadd.f32 %v1483_v58, %v1283_v20  ;;  %4941 = vmatpush3.bf16.msra.mxu1 %v6949_v9  ;;  %v5462_v12 = vunpack.i.l.bf16 %v7026_v10 }
 0x1ab   : > { %v1485_v59 = vpop.f32.mrf.mxu0  ;;  %v4805_v6 = vpop.f32.mrf.mxu1  ;;  %4946 = vmatprep.subr.bf16.mxu1 %v5646_v7 }
 0x1ac   : > { %1532 = vst [vmem:[%s7001_s15 + $0x8] sm:$0xff] %v1529_v31  ;;  %2686 = vmatpush1.bf16.msra.mxu0 %v6956_v60  ;;  %v7092_v6 = vsel %vm1143_vm4, %v2941_v2, 0 }
 0x1ad   : > { %v1486_v36 = vpop.f32.mrf.mxu0  ;;  %4943 = vmatmul.mubr.msk.bf16.vlgmr.msra.gmra.mxu1 %vm1139_vm10, %v4562_v23  ;;  %4566 = vmatprep.subr.msk.bf16.mxu0 %vm1143_vm4, %v6624_v40  ;;  %v7044_v40 = vpop.permute.xlu1 %5465 }
 0x1ae   : > { %4947 = vmatpush3.bf16.msra.mxu1 %v6643_v42  ;;  %4956 = vmatprep.mubr.msk.bf16.mxu1 %vm5652_vm0, %v5646_v7  ;;  %v5448_v42 = vunpack.i.h.bf16 %v6977_v57  ;;  %v5467_v58 = vunpack.i.l.bf16 %v7044_v40 }
 0x1af   : > { %4564 = vmatmul.mubr.msk.bf16.vlgmr.msra.gmra.mxu0 %vm1139_vm10, %v4562_v23  ;;  %4948 = vmatprep.subr.bf16.mxu1 %v5646_v7 }
 0x1b0   : > { %2762 = vmatpush1.bf16.msra.mxu0 %v6657_v44  ;;  %2787 = vmatprep.mubr.bf16.mxu0 %v7727_v19  ;;  %v5447_v44 = vunpack.i.l.bf16 %v6977_v57 }
 0x1b1   : > { %2763 = vmatprep.subr.bf16.mxu0 %v6649_v41  ;;  %v2884_v57 = vpop.permute.xlu1 %2883 }
 0x1b2   : > { %4949 = vmatpush3.bf16.msra.mxu1 %v6645_v18  ;;  %v7052_v18 = vpop.permute.xlu0 %5470 }
 0x1b3   : > { %4950 = vmatprep.subr.bf16.mxu1 %v5646_v7 }
 0x1b4   : > { %2764 = vmatpush1.bf16.msra.mxu0 %v6669_v13  ;;  %v5458_v13 = vunpack.i.h.bf16 %v7015_v43 }
 0x1b5   : > { %2765 = vmatprep.subr.bf16.mxu0 %v6677_v28  ;;  %v5457_v28 = vunpack.i.l.bf16 %v7015_v43  ;;  %v5476_v23 = vpop.permute.xlu1 %5475 }
 0x1b6   : > { %4951 = vmatpush3.bf16.msra.mxu1 %v6680_v27  ;;  %v5453_v27 = vunpack.i.h.bf16 %v6988_v32  ;;  %v2851_v43 = vpop.permute.xlu0 %2850 }
 0x1b7   : > { %4952 = vmatprep.subr.bf16.mxu1 %v5646_v7 }
 0x1b8   : > { %2766 = vmatpush1.bf16.msra.mxu0 %v6688_v39  ;;  %v2923_v39 = vsel %vm1009_vm1, %v5448_v42, %v6992_v51  ;;  %v2901_v4 = vsel %vm985_vm2, %v5452_v63, %v5453_v27  ;;  %v5468_v51 = vunpack.i.h.bf16 %v7044_v40  ;;  %v7094_v36 = vpack.c.bf16 %v5458_v13, %v5453_v27 }
 0x1b9   : > { %v7054_v41 = vpop.f32.mrf.mxu1  ;;  %2767 = vmatprep.subr.bf16.mxu0 %v6696_v30  ;;  %v2922_v30 = vsel %vm1009_vm1, %v5447_v44, %v5448_v42  ;;  %v5477_v27 = vunpack.i.l.bf16 %v5476_v23 }
 0x1ba   : > { %4953 = vmatpush3.bf16.msra.mxu1 %v6699_v24  ;;  %v7074_v24 = vpack.c.bf16 %v2923_v39, %v2923_v39  ;;  %v2939_v20 = vpack.c.bf16 %v2922_v30, %v2922_v30  ;;  %v5473_v39 = vunpack.i.h.bf16 %v7052_v18 }
 0x1bb   : > { %v7064_v50 = vpop.f32.mrf.mxu0  ;;  %v4818_v5 = vpop.f32.mrf.mxu1  ;;  %4954 = vmatprep.subr.bf16.mxu1 %v5646_v7 }
 0x1bc   : > { %2768 = vmatpush1.bf16.msra.mxu0 %v6709_v17  ;;  %v2912_v17 = vsel %vm997_vm3, %v5457_v28, %v5458_v13  ;;  %v7106_v42 = vsel %vm1143_vm4, %v2939_v20, 0  ;;  %v5481_v13 = vpop.permute.xlu0 %5480  ;;  %v5472_v5 = vunpack.i.l.bf16 %v7052_v18 }
 0x1bd   : > { %v7071_v47 = vpop.f32.mrf.mxu0  ;;  %v1618_v32 = vpop.f32.mrf.mxu1  ;;  %2769 = vmatprep.subr.bf16.mxu0 %v6705_v45  ;;  %v5463_v45 = vunpack.i.h.bf16 %v7026_v10  ;;  %v2911_v10 = vsel %vm997_vm3, %v2906_v54, %v5457_v28  ;;  %v7098_v40 = vpack.c.bf16 %v2912_v17, %v2901_v4  ;;  %v2890_v54 = vsel %vm973_vm5, %v5467_v58, %v5468_v51 }
 0x1be   : > { %4955 = vmatpush3.bf16.msra.mxu1 %v6712_v11  ;;  %v5478_v28 = vunpack.i.h.bf16 %v5476_v23  ;;  %v5483_v30 = vunpack.i.h.bf16 %v5481_v13  ;;  %v5482_v2 = vunpack.i.l.bf16 %v5481_v13  ;;  %v2889_v32 = vsel %vm973_vm5, %v2884_v57, %v5467_v58 }
 0x1bf   : > { %v1578_v31 = vpop.f32.mrf.mxu0  ;;  %v4819_v11 = vpop.f32.mrf.mxu1  ;;  %4960 = vmatprep.subr.bf16.mxu1 %v5646_v7  ;;  %v2879_v44 = vsel %vm961_vm6, %v5462_v12, %v5463_v45  ;;  %v7125_v18 = vpack.c.bf16 %v5468_v51, %v5463_v45  ;;  %v2857_v4 = vsel %vm937_vm8, %v5472_v5, %v5473_v39  ;;  %v2856_v51 = vsel %vm937_vm8, %v2851_v43, %v5472_v5 }
 0x1c0   : > { %2770 = vmatpush1.bf16.msra.mxu0 %v6719_v3  ;;  %v2900_v3 = vsel %vm985_vm2, %v7007_v22, %v5452_v63  ;;  %v2862_v63 = vpop.permute.xlu1 %2861  ;;  %v7122_v20 = vpack.c.bf16 %v2890_v54, %v2879_v44  ;;  %v2868_v17 = vsel %vm949_vm7, %v5477_v27, %v5478_v28  ;;  %v7151_v43 = vpack.c.bf16 %v5483_v30, %v6208_v8 }
 0x1c1   : > { %v1579_v59 = vpop.f32.mrf.mxu0  ;;  %4957 = vmatmul.mubr.msk.bf16.vlgmr.msra.gmra.mxu1 %vm1139_vm10, %v2666_v53  ;;  %4570 = vmatprep.subr.msk.bf16.mxu0 %vm1143_vm4, %v7074_v24  ;;  %v7116_v22 = vpack.c.bf16 %v2911_v10, %v2900_v3  ;;  %v2867_v58 = vsel %vm949_vm7, %v2862_v63, %v5477_v27  ;;  %v7137_v45 = vpack.c.bf16 %v2868_v17, %v2857_v4 }
 0x1c2   : > { %4961 = vmatpush3.bf16.msra.mxu1 %v7092_v6  ;;  %4970 = vmatprep.mubr.msk.bf16.mxu1 %vm5652_vm0, %v5646_v7  ;;  %v7148_v10 = vpack.c.bf16 %v2867_v58, %v2856_v51 }
 0x1c3   : > { %4567 = vmatmul.mubr.msk.bf16.vlgmr.msra.gmra.mxu0 %vm1139_vm10, %v2666_v53  ;;  %4962 = vmatprep.subr.bf16.mxu1 %v5646_v7  ;;  %v2878_v53 = vsel %vm961_vm6, %v7040_v0, %v5462_v12  ;;  %v2846_v0 = vsel %vm925_vm9, %v5482_v2, %v5483_v30  ;;  %v7140_v12 = vpack.c.bf16 %v5478_v28, %v5473_v39  ;;  %v7172_v39 = vpop.permute.xlu0 %5485 }
 0x1c4   : > { %2962 = vmatpush1.bf16.msra.mxu0 %v7106_v42  ;;  %2987 = vmatprep.mubr.bf16.mxu0 %v7727_v19  ;;  %v7131_v31 = vpack.c.bf16 %v2889_v32, %v2878_v53  ;;  %v2840_v57 = vpop.permute.xlu1 %2839  ;;  %v7146_v59 = vpack.c.bf16 %v2846_v0, %v6196_v48  ;;  %v4569_v48 = vld [vmem:[%s7684_s10 + $0x8] sm:$0xf] }
 0x1c5   : > { %2963 = vmatprep.subr.bf16.mxu0 %v7098_v40  ;;  %v2845_v23 = vsel %vm925_vm9, %v2840_v57, %v5482_v2 }
 0x1c6   : > { %4963 = vmatpush3.bf16.msra.mxu1 %v7094_v36  ;;  %v7156_v54 = vpack.c.bf16 %v2845_v23, %v6190_v49  ;;  %v4576_v23 = vld [vmem:[%s7684_s10 + $0x4] sm:$0xf] }
 0x1c7   : > { %4964 = vmatprep.subr.bf16.mxu1 %v5646_v7  ;;  %v7182_v5 = vpop.permute.xlu0 %5490 }
 0x1c8   : > { %2964 = vmatpush1.bf16.msra.mxu0 %v7116_v22  ;;  %v7186_v63 = vpop.permute.xlu1 %3297 }
 0x1c9   : > { %2965 = vmatprep.subr.bf16.mxu0 %v7122_v20 }
 0x1ca   : > { %4965 = vmatpush3.bf16.msra.mxu1 %v7125_v18 }
 0x1cb   : > { %4966 = vmatprep.subr.bf16.mxu1 %v5646_v7  ;;  %v7194_v4 = vpop.permute.xlu0 %3271 }
 0x1cc   : > { %2966 = vmatpush1.bf16.msra.mxu0 %v7131_v31  ;;  %v7201_v58 = vpop.permute.xlu1 %5495 }
 0x1cd   : > { %v1699_v11 = vpop.f32.mrf.mxu1  ;;  %2967 = vmatprep.subr.bf16.mxu0 %v7137_v45 }
 0x1ce   : > { %4967 = vmatpush3.bf16.msra.mxu1 %v7140_v12  ;;  %v1700_v30 = vadd.f32 %v1699_v11, %v7054_v41 }
 0x1cf   : > { %v1658_v3 = vpop.f32.mrf.mxu0  ;;  %v4832_v44 = vpop.f32.mrf.mxu1  ;;  %4968 = vmatprep.subr.bf16.mxu1 %v5646_v7 }
 0x1d0   : > { %2968 = vmatpush1.bf16.msra.mxu0 %v7148_v10  ;;  %v1659_v32 = vadd.f32 %v1658_v3, %v7064_v50  ;;  %v7212_v44 = vpop.permute.xlu0 %5500 }
 0x1d1   : > { %v1660_v13 = vpop.f32.mrf.mxu0  ;;  %v1702_v28 = vpop.f32.mrf.mxu1  ;;  %2969 = vmatprep.subr.bf16.mxu0 %v7146_v59 }
 0x1d2   : > { %4969 = vmatpush3.bf16.msra.mxu1 %v7151_v43  ;;  %v1661_v41 = vadd.f32 %v1660_v13, %v7071_v47  ;;  %v3283_v28 = vpop.permute.xlu1 %3282 }
 0x1d3   : > { %v1662_v8 = vpop.f32.mrf.mxu0  ;;  %v4833_v27 = vpop.f32.mrf.mxu1  ;;  %4974 = vmatprep.subr.bf16.mxu1 %v5646_v7 }
 0x1d4   : > { %2970 = vmatpush1.bf16.msra.mxu0 %v7156_v54  ;;  %v5492_v8 = vunpack.i.l.bf16 %v7182_v5 }
 0x1d5   : > { %v1663_v49 = vpop.f32.mrf.mxu0  ;;  %4971 = vmatmul.mubr.msk.bf16.vlgmr.msra.gmra.mxu1 %vm1139_vm10, %v4569_v48  ;;  %4577 = vmatprep.subr.msk.bf16.mxu0 %vm1143_vm4, %v7074_v24 }
 0x1d6   : > { %4975 = vmatpush3.bf16.msra.mxu1 %v7092_v6  ;;  %4984 = vmatprep.mubr.msk.bf16.mxu1 %vm5652_vm0, %v5646_v7 }
 0x1d7   : > { %4571 = vmatmul.mubr.msk.bf16.vlgmr.msra.gmra.mxu0 %vm1139_vm10, %v4569_v48  ;;  %4976 = vmatprep.subr.bf16.mxu1 %v5646_v7  ;;  %v7226_v48 = vpop.permute.xlu0 %3249 }
 0x1d8   : > { %3055 = vmatpush1.bf16.msra.mxu0 %v7106_v42  ;;  %3080 = vmatprep.mubr.bf16.mxu0 %v7727_v19 }
 0x1d9   : > { %3056 = vmatprep.subr.bf16.mxu0 %v7098_v40 }
 0x1da   : > { %4977 = vmatpush3.bf16.msra.mxu1 %v7094_v36 }
 0x1db   : > { %4978 = vmatprep.subr.bf16.mxu1 %v5646_v7 }
 0x1dc   : > { %3057 = vmatpush1.bf16.msra.mxu0 %v7116_v22 }
 0x1dd   : > { %3058 = vmatprep.subr.bf16.mxu0 %v7122_v20 }
 0x1de   : > { %4979 = vmatpush3.bf16.msra.mxu1 %v7125_v18 }
 0x1df   : > { %4980 = vmatprep.subr.bf16.mxu1 %v5646_v7 }
 0x1e0   : > { %3059 = vmatpush1.bf16.msra.mxu0 %v7131_v31 }
 0x1e1   : > { %v1899_v2 = vpop.f32.mrf.mxu1  ;;  %3060 = vmatprep.subr.bf16.mxu0 %v7137_v45 }
 0x1e2   : > { %v1907_v53 = vadd.f32 %v1899_v2, %v1700_v30  ;;  %4981 = vmatpush3.bf16.msra.mxu1 %v7140_v12  ;;  %v3318_v30 = vpack.c.bf16 %v7186_v63, %v7186_v63 }
 0x1e3   : > { %v1858_v17 = vpop.f32.mrf.mxu0  ;;  %v4846_v57 = vpop.f32.mrf.mxu1  ;;  %4982 = vmatprep.subr.bf16.mxu1 %v5646_v7 }
 0x1e4   : > { %4533 = vst.msk [vmem:[%s7001_s15 + $0x28] sm:$0xff] %vm1533_vm11, %v1907_v53  ;;  %v1905_v0 = vadd.f32 %v1858_v17, %v1659_v32  ;;  %3061 = vmatpush1.bf16.msra.mxu0 %v7148_v10  ;;  %v3043_v32 = vld [vmem:[%s7684_s10] sm:$0xf] }
 0x1e5   : > { %v1860_v50 = vpop.f32.mrf.mxu0  ;;  %v1902_v51 = vpop.f32.mrf.mxu1  ;;  %3062 = vmatprep.subr.bf16.mxu0 %v7146_v59 }
 0x1e6   : > { %4531 = vst [vmem:[%s7001_s15 + $0x18] sm:$0xff] %v1905_v0  ;;  %v1906_v11 = vadd.f32 %v1860_v50, %v1661_v41  ;;  %4983 = vmatpush3.bf16.msra.mxu1 %v7151_v43  ;;  %v5502_v0 = vunpack.i.l.bf16 %v7212_v44 }
 0x1e7   : > { %v1862_v47 = vpop.f32.mrf.mxu0  ;;  %v4847_v3 = vpop.f32.mrf.mxu1  ;;  %4988 = vmatprep.subr.bf16.mxu1 %v5646_v7 }
 0x1e8   : > { %4532 = vst [vmem:[%s7001_s15 + $0x20] sm:$0xff] %v1906_v11  ;;  %3063 = vmatpush1.bf16.msra.mxu0 %v7156_v54  ;;  %v7278_v11 = vsel %vm1143_vm4, %v3318_v30, 0 }
 0x1e9   : > { %v1863_v13 = vpop.f32.mrf.mxu0  ;;  %4985 = vmatmul.mubr.msk.bf16.vlgmr.msra.gmra.mxu1 %vm1139_vm10, %v4576_v23  ;;  %4580 = vmatprep.subr.msk.bf16.mxu0 %vm1143_vm4, %v6849_v1  ;;  %v7230_v1 = vpop.permute.xlu1 %5505 }
 0x1ea   : > { %4989 = vmatpush3.bf16.msra.mxu1 %v6872_v14  ;;  %4998 = vmatprep.mubr.msk.bf16.mxu1 %vm5652_vm0, %v5646_v7  ;;  %v5488_v14 = vunpack.i.h.bf16 %v7172_v39  ;;  %v5507_v41 = vunpack.i.l.bf16 %v7230_v1 }
 0x1eb   : > { %4578 = vmatmul.mubr.msk.bf16.vlgmr.msra.gmra.mxu0 %vm1139_vm10, %v4576_v23  ;;  %4990 = vmatprep.subr.bf16.mxu1 %v5646_v7 }
 0x1ec   : > { %3139 = vmatpush1.bf16.msra.mxu0 %v6887_v25  ;;  %3164 = vmatprep.mubr.bf16.mxu0 %v7727_v19  ;;  %v5487_v25 = vunpack.i.l.bf16 %v7172_v39 }
 0x1ed   : > { %3140 = vmatprep.subr.bf16.mxu0 %v6879_v15  ;;  %v3261_v27 = vpop.permute.xlu1 %3260 }
 0x1ee   : > { %4991 = vmatpush3.bf16.msra.mxu1 %v6874_v34  ;;  %v7238_v34 = vpop.permute.xlu0 %5510 }
 0x1ef   : > { %4992 = vmatprep.subr.bf16.mxu1 %v5646_v7 }
 0x1f0   : > { %3141 = vmatpush1.bf16.msra.mxu0 %v6899_v61  ;;  %v5498_v61 = vunpack.i.h.bf16 %v7201_v58 }
 0x1f1   : > { %3142 = vmatprep.subr.bf16.mxu0 %v6909_v16  ;;  %v5497_v16 = vunpack.i.l.bf16 %v7201_v58  ;;  %v5516_v50 = vpop.permute.xlu1 %5515 }
 0x1f2   : > { %4993 = vmatpush3.bf16.msra.mxu1 %v6912_v38  ;;  %v5493_v38 = vunpack.i.h.bf16 %v7182_v5  ;;  %v3228_v57 = vpop.permute.xlu0 %3227 }
 0x1f3   : > { %4994 = vmatprep.subr.bf16.mxu1 %v5646_v7  ;;  %v3288_v47 = vsel %vm997_vm3, %v3283_v28, %v5497_v16 }
 0x1f4   : > { %3143 = vmatpush1.bf16.msra.mxu0 %v6922_v29  ;;  %v3300_v29 = vsel %vm1009_vm1, %v5488_v14, %v7186_v63  ;;  %v3278_v17 = vsel %vm985_vm2, %v5492_v8, %v5493_v38  ;;  %v5508_v63 = vunpack.i.h.bf16 %v7230_v1  ;;  %v7280_v23 = vpack.c.bf16 %v5498_v61, %v5493_v38 }
 0x1f5   : > { %v7240_v15 = vpop.f32.mrf.mxu1  ;;  %3144 = vmatprep.subr.bf16.mxu0 %v6932_v35  ;;  %v3299_v35 = vsel %vm1009_vm1, %v5487_v25, %v5488_v14  ;;  %v5518_v14 = vunpack.i.h.bf16 %v5516_v50  ;;  %v5517_v25 = vunpack.i.l.bf16 %v5516_v50  ;;  %v3239_v38 = vpop.permute.xlu1 %3238 }
 0x1f6   : > { %4995 = vmatpush3.bf16.msra.mxu1 %v6935_v62  ;;  %v7260_v62 = vpack.c.bf16 %v3300_v29, %v3300_v29  ;;  %v3316_v53 = vpack.c.bf16 %v3299_v35, %v3299_v35  ;;  %v3267_v28 = vsel %vm973_vm5, %v5507_v41, %v5508_v63  ;;  %v5521_v1 = vpop.permute.xlu0 %5520  ;;  %v3255_v35 = vsel %vm961_vm6, %v7226_v48, %v5502_v0 }
 0x1f7   : > { %v7250_v49 = vpop.f32.mrf.mxu0  ;;  %v4860_v39 = vpop.f32.mrf.mxu1  ;;  %4996 = vmatprep.subr.bf16.mxu1 %v5646_v7  ;;  %v5522_v29 = vunpack.i.l.bf16 %v5521_v1 }
 0x1f8   : > { %3145 = vmatpush1.bf16.msra.mxu0 %v6946_v56  ;;  %v3289_v56 = vsel %vm997_vm3, %v5497_v16, %v5498_v61  ;;  %v5513_v61 = vunpack.i.h.bf16 %v7238_v34  ;;  %v5512_v16 = vunpack.i.l.bf16 %v7238_v34  ;;  %v3266_v39 = vsel %vm973_vm5, %v3261_v27, %v5507_v41 }
 0x1f9   : > { %v7257_v2 = vpop.f32.mrf.mxu0  ;;  %v1995_v5 = vpop.f32.mrf.mxu1  ;;  %3146 = vmatprep.subr.bf16.mxu0 %v6941_v26  ;;  %v5503_v26 = vunpack.i.h.bf16 %v7212_v44  ;;  %v7284_v3 = vpack.c.bf16 %v3289_v56, %v3278_v17  ;;  %v7292_v44 = vsel %vm1143_vm4, %v3316_v53, 0  ;;  %v7317_v53 = vpack.c.bf16 %v3266_v39, %v3255_v35 }
 0x1fa   : > { %4997 = vmatpush3.bf16.msra.mxu1 %v6949_v9  ;;  %v3234_v5 = vsel %vm937_vm8, %v5512_v16, %v5513_v61  ;;  %v3217_v27 = vpop.permute.xlu1 %3216  ;;  %v3244_v17 = vsel %vm949_vm7, %v3239_v38, %v5517_v25  ;;  %v3233_v56 = vsel %vm937_vm8, %v3228_v57, %v5512_v16  ;;  %v7326_v41 = vpack.c.bf16 %v5518_v14, %v5513_v61 }
 0x1fb   : > { %v1955_v58 = vpop.f32.mrf.mxu0  ;;  %v4861_v9 = vpop.f32.mrf.mxu1  ;;  %5002 = vmatprep.subr.bf16.mxu1 %v5646_v7  ;;  %v3256_v13 = vsel %vm961_vm6, %v5502_v0, %v5503_v26  ;;  %v7311_v34 = vpack.c.bf16 %v5508_v63, %v5503_v26  ;;  %v3222_v0 = vsel %vm925_vm9, %v3217_v27, %v5522_v29 }
 0x1fc   : > { %3147 = vmatpush1.bf16.msra.mxu0 %v6956_v60  ;;  %v3277_v60 = vsel %vm985_vm2, %v7194_v4, %v5492_v8  ;;  %v5523_v8 = vunpack.i.h.bf16 %v5521_v1  ;;  %v7308_v30 = vpack.c.bf16 %v3267_v28, %v3256_v13  ;;  %v7334_v9 = vpack.c.bf16 %v3244_v17, %v3233_v56  ;;  %v7358_v1 = vpop.permute.xlu0 %5525  ;;  %v4590_v17 = vld [vmem:[%s7684_s10 + $0x4] sm:$0xf] }
 0x1fd   : > { %v1956_v51 = vpop.f32.mrf.mxu0  ;;  %4999 = vmatmul.mubr.msk.bf16.vlgmr.msra.gmra.mxu1 %vm1139_vm10, %v3043_v32  ;;  %4584 = vmatprep.subr.msk.bf16.mxu0 %vm1143_vm4, %v7260_v62  ;;  %v7302_v4 = vpack.c.bf16 %v3288_v47, %v3277_v60  ;;  %v7342_v47 = vpack.c.bf16 %v3222_v0, %v6333_v33 }
 0x1fe   : > { %5003 = vmatpush3.bf16.msra.mxu1 %v7278_v11  ;;  %5012 = vmatprep.mubr.msk.bf16.mxu1 %vm5652_vm0, %v5646_v7  ;;  %v3223_v48 = vsel %vm925_vm9, %v5522_v29, %v5523_v8  ;;  %v7337_v57 = vpack.c.bf16 %v5523_v8, %v6344_v46 }
 0x1ff   : > { %4581 = vmatmul.mubr.msk.bf16.vlgmr.msra.gmra.mxu0 %vm1139_vm10, %v3043_v32  ;;  %5004 = vmatprep.subr.bf16.mxu1 %v5646_v7  ;;  %v3245_v32 = vsel %vm949_vm7, %v5517_v25, %v5518_v14  ;;  %v7332_v58 = vpack.c.bf16 %v3223_v48, %v6336_v37  ;;  %v4583_v37 = vld [vmem:[%s7684_s10 + $0x8] sm:$0xf]  ;;  %v7372_v25 = vpop.permute.xlu1 %3674 }
 0x200   : > { %3339 = vmatpush1.bf16.msra.mxu0 %v7292_v44  ;;  %3364 = vmatprep.mubr.bf16.mxu0 %v7727_v19  ;;  %v7323_v63 = vpack.c.bf16 %v3245_v32, %v3234_v5  ;;  %v7368_v14 = vpop.permute.xlu0 %5530 }
 0x201   : > { %3340 = vmatprep.subr.bf16.mxu0 %v7284_v3 }
 0x202   : > { %5005 = vmatpush3.bf16.msra.mxu1 %v7280_v23 }
 0x203   : > { %5006 = vmatprep.subr.bf16.mxu1 %v5646_v7  ;;  %v7387_v32 = vpop.permute.xlu1 %5535 }
 0x204   : > { %3341 = vmatpush1.bf16.msra.mxu0 %v7302_v4  ;;  %v7380_v29 = vpop.permute.xlu0 %3648 }
 0x205   : > { %3342 = vmatprep.subr.bf16.mxu0 %v7308_v30 }
 0x206   : > { %5007 = vmatpush3.bf16.msra.mxu1 %v7311_v34 }
 0x207   : > { %5008 = vmatprep.subr.bf16.mxu1 %v5646_v7 }
 0x208   : > { %3343 = vmatpush1.bf16.msra.mxu0 %v7317_v53 }
 0x209   : > { %v2076_v26 = vpop.f32.mrf.mxu1  ;;  %3344 = vmatprep.subr.bf16.mxu0 %v7323_v63 }
 0x20a   : > { %5009 = vmatpush3.bf16.msra.mxu1 %v7326_v41  ;;  %v2077_v61 = vadd.f32 %v2076_v26, %v7240_v15  ;;  %v7398_v26 = vpop.permute.xlu0 %5540 }
 0x20b   : > { %v2035_v50 = vpop.f32.mrf.mxu0  ;;  %v4874_v51 = vpop.f32.mrf.mxu1  ;;  %5010 = vmatprep.subr.bf16.mxu1 %v5646_v7 }
 0x20c   : > { %3345 = vmatpush1.bf16.msra.mxu0 %v7334_v9  ;;  %v2036_v38 = vadd.f32 %v2035_v50, %v7250_v49  ;;  %v3660_v50 = vpop.permute.xlu1 %3659 }
 0x20d   : > { %v2037_v60 = vpop.f32.mrf.mxu0  ;;  %v2079_v13 = vpop.f32.mrf.mxu1  ;;  %3346 = vmatprep.subr.bf16.mxu0 %v7332_v58 }
 0x20e   : > { %5011 = vmatpush3.bf16.msra.mxu1 %v7337_v57  ;;  %v2038_v15 = vadd.f32 %v2037_v60, %v7257_v2  ;;  %v7412_v51 = vpop.permute.xlu0 %3626  ;;  %v5532_v60 = vunpack.i.l.bf16 %v7368_v14 }
 0x20f   : > { %v2039_v46 = vpop.f32.mrf.mxu0  ;;  %v4875_v28 = vpop.f32.mrf.mxu1  ;;  %5016 = vmatprep.subr.bf16.mxu1 %v5646_v7 }
 0x210   : > { %3347 = vmatpush1.bf16.msra.mxu0 %v7342_v47  ;;  %v3695_v28 = vpack.c.bf16 %v7372_v25, %v7372_v25 }
 0x211   : > { %v2040_v33 = vpop.f32.mrf.mxu0  ;;  %5013 = vmatmul.mubr.msk.bf16.vlgmr.msra.gmra.mxu1 %vm1139_vm10, %v4583_v37  ;;  %4591 = vmatprep.subr.msk.bf16.mxu0 %vm1143_vm4, %v7260_v62 }
 0x212   : > { %5017 = vmatpush3.bf16.msra.mxu1 %v7278_v11  ;;  %5026 = vmatprep.mubr.msk.bf16.mxu1 %vm5652_vm0, %v5646_v7 }
 0x213   : > { %4585 = vmatmul.mubr.msk.bf16.vlgmr.msra.gmra.mxu0 %vm1139_vm10, %v4583_v37  ;;  %5018 = vmatprep.subr.bf16.mxu1 %v5646_v7 }
 0x214   : > { %3432 = vmatpush1.bf16.msra.mxu0 %v7292_v44  ;;  %3457 = vmatprep.mubr.bf16.mxu0 %v7727_v19 }
 0x215   : > { %3433 = vmatprep.subr.bf16.mxu0 %v7284_v3 }
 0x216   : > { %5019 = vmatpush3.bf16.msra.mxu1 %v7280_v23 }
 0x217   : > { %5020 = vmatprep.subr.bf16.mxu1 %v5646_v7 }
 0x218   : > { %3434 = vmatpush1.bf16.msra.mxu0 %v7302_v4 }
 0x219   : > { %3435 = vmatprep.subr.bf16.mxu0 %v7308_v30 }
 0x21a   : > { %5021 = vmatpush3.bf16.msra.mxu1 %v7311_v34 }
 0x21b   : > { %5022 = vmatprep.subr.bf16.mxu1 %v5646_v7 }
 0x21c   : > { %3436 = vmatpush1.bf16.msra.mxu0 %v7317_v53 }
 0x21d   : > { %v2276_v16 = vpop.f32.mrf.mxu1  ;;  %3437 = vmatprep.subr.bf16.mxu0 %v7323_v63 }
 0x21e   : > { %v2284_v8 = vadd.f32 %v2276_v16, %v2077_v61  ;;  %5023 = vmatpush3.bf16.msra.mxu1 %v7326_v41 }
 0x21f   : > { %v2235_v39 = vpop.f32.mrf.mxu0  ;;  %v4888_v35 = vpop.f32.mrf.mxu1  ;;  %5024 = vmatprep.subr.bf16.mxu1 %v5646_v7 }
 0x220   : > { %4547 = vst.msk [vmem:[%s7001_s15 + $0x40] sm:$0xff] %vm1533_vm11, %v2284_v8  ;;  %v2282_v5 = vadd.f32 %v2235_v39, %v2036_v38  ;;  %3438 = vmatpush1.bf16.msra.mxu0 %v7334_v9  ;;  %v5542_v39 = vunpack.i.l.bf16 %v7398_v26 }
 0x221   : > { %v2237_v49 = vpop.f32.mrf.mxu0  ;;  %v2279_v27 = vpop.f32.mrf.mxu1  ;;  %3439 = vmatprep.subr.bf16.mxu0 %v7332_v58 }
 0x222   : > { %4545 = vst [vmem:[%s7001_s15 + $0x30] sm:$0xff] %v2282_v5  ;;  %v2283_v48 = vadd.f32 %v2237_v49, %v2038_v15  ;;  %5025 = vmatpush3.bf16.msra.mxu1 %v7337_v57 }
 0x223   : > { %v2239_v2 = vpop.f32.mrf.mxu0  ;;  %v4889_v56 = vpop.f32.mrf.mxu1  ;;  %5030 = vmatprep.subr.bf16.mxu1 %v5646_v7 }
 0x224   : > { %4546 = vst [vmem:[%s7001_s15 + $0x38] sm:$0xff] %v2283_v48  ;;  %3440 = vmatpush1.bf16.msra.mxu0 %v7342_v47 }
 0x225   : > { %v2240_v0 = vpop.f32.mrf.mxu0  ;;  %5027 = vmatmul.mubr.msk.bf16.vlgmr.msra.gmra.mxu1 %vm1139_vm10, %v4590_v17  ;;  %4594 = vmatprep.subr.msk.bf16.mxu0 %vm1143_vm4, %v7074_v24  ;;  %v7416_v24 = vpop.permute.xlu1 %5545 }
 0x226   : > { %5031 = vmatpush3.bf16.msra.mxu1 %v7092_v6  ;;  %5040 = vmatprep.mubr.msk.bf16.mxu1 %vm5652_vm0, %v5646_v7  ;;  %v5528_v6 = vunpack.i.h.bf16 %v7358_v1  ;;  %v5547_v8 = vunpack.i.l.bf16 %v7416_v24 }
 0x227   : > { %4592 = vmatmul.mubr.msk.bf16.vlgmr.msra.gmra.mxu0 %vm1139_vm10, %v4590_v17  ;;  %5032 = vmatprep.subr.bf16.mxu1 %v5646_v7 }
 0x228   : > { %3516 = vmatpush1.bf16.msra.mxu0 %v7106_v42  ;;  %3541 = vmatprep.mubr.bf16.mxu0 %v7727_v19  ;;  %v5527_v42 = vunpack.i.l.bf16 %v7358_v1 }
 0x229   : > { %3517 = vmatprep.subr.bf16.mxu0 %v7098_v40  ;;  %v3638_v13 = vpop.permute.xlu1 %3637 }
 0x22a   : > { %5033 = vmatpush3.bf16.msra.mxu1 %v7094_v36  ;;  %v7424_v36 = vpop.permute.xlu0 %5550 }
 0x22b   : > { %5034 = vmatprep.subr.bf16.mxu1 %v5646_v7 }
 0x22c   : > { %3518 = vmatpush1.bf16.msra.mxu0 %v7116_v22  ;;  %v5538_v22 = vunpack.i.h.bf16 %v7387_v32 }
 0x22d   : > { %3519 = vmatprep.subr.bf16.mxu0 %v7122_v20  ;;  %v5537_v20 = vunpack.i.l.bf16 %v7387_v32  ;;  %v5556_v15 = vpop.permute.xlu1 %5555  ;;  %v7464_v32 = vsel %vm1143_vm4, %v3695_v28, 0 }
 0x22e   : > { %5035 = vmatpush3.bf16.msra.mxu1 %v7125_v18  ;;  %v5533_v18 = vunpack.i.h.bf16 %v7368_v14  ;;  %v3420_v14 = vld [vmem:[%s7684_s10] sm:$0xf]  ;;  %v3605_v38 = vpop.permute.xlu0 %3604  ;;  %v5558_v0 = vunpack.i.h.bf16 %v5556_v15 }
 0x22f   : > { %5036 = vmatprep.subr.bf16.mxu1 %v5646_v7  ;;  %v3665_v27 = vsel %vm997_vm3, %v3660_v50, %v5537_v20  ;;  %v5557_v50 = vunpack.i.l.bf16 %v5556_v15 }
 0x230   : > { %3520 = vmatpush1.bf16.msra.mxu0 %v7131_v31  ;;  %v3677_v31 = vsel %vm1009_vm1, %v5528_v6, %v7372_v25  ;;  %v3655_v16 = vsel %vm985_vm2, %v5532_v60, %v5533_v18  ;;  %v5548_v25 = vunpack.i.h.bf16 %v7416_v24  ;;  %v7466_v49 = vpack.c.bf16 %v5538_v22, %v5533_v18 }
 0x231   : > { %v7426_v40 = vpop.f32.mrf.mxu1  ;;  %3521 = vmatprep.subr.bf16.mxu0 %v7137_v45  ;;  %v3676_v45 = vsel %vm1009_vm1, %v5527_v42, %v5528_v6  ;;  %v5553_v24 = vunpack.i.h.bf16 %v7424_v36  ;;  %v5552_v6 = vunpack.i.l.bf16 %v7424_v36  ;;  %v3616_v42 = vpop.permute.xlu1 %3615  ;;  %v3643_v18 = vsel %vm973_vm5, %v3638_v13, %v5547_v8 }
 0x232   : > { %5037 = vmatpush3.bf16.msra.mxu1 %v7140_v12  ;;  %v7446_v12 = vpack.c.bf16 %v3677_v31, %v3677_v31  ;;  %v3693_v61 = vpack.c.bf16 %v3676_v45, %v3676_v45  ;;  %v3644_v56 = vsel %vm973_vm5, %v5547_v8, %v5548_v25  ;;  %v3622_v45 = vsel %vm949_vm7, %v5557_v50, %v5558_v0 }
 0x233   : > { %v7436_v37 = vpop.f32.mrf.mxu0  ;;  %v4902_v46 = vpop.f32.mrf.mxu1  ;;  %5038 = vmatprep.subr.bf16.mxu1 %v5646_v7  ;;  %v3621_v13 = vsel %vm949_vm7, %v3616_v42, %v5557_v50 }
 0x234   : > { %3522 = vmatpush1.bf16.msra.mxu0 %v7148_v10  ;;  %v3666_v10 = vsel %vm997_vm3, %v5537_v20, %v5538_v22  ;;  %v7478_v17 = vsel %vm1143_vm4, %v3693_v61, 0  ;;  %v3611_v46 = vsel %vm937_vm8, %v5552_v6, %v5553_v24  ;;  %v3610_v61 = vsel %vm937_vm8, %v3605_v38, %v5552_v6  ;;  %v7728_v38 = vld [vmem:[#allocation2_spill] sm:$0xff] }
 0x235   : > { %v7443_v33 = vpop.f32.mrf.mxu0  ;;  %v2372_v1 = vpop.f32.mrf.mxu1  ;;  %3523 = vmatprep.subr.bf16.mxu0 %v7146_v59  ;;  %v5543_v59 = vunpack.i.h.bf16 %v7398_v26  ;;  %v7470_v48 = vpack.c.bf16 %v3666_v10, %v3655_v16  ;;  %v3686_v16 = vpack.c.bf16 %v5558_v0, %v5553_v24 }
 0x236   : > { %5039 = vmatpush3.bf16.msra.mxu1 %v7151_v43  ;;  %v5561_v26 = vpop.permute.xlu0 %5560  ;;  %v3594_v1 = vpop.permute.xlu1 %3593 }
 0x237   : > { %v2332_v35 = vpop.f32.mrf.mxu0  ;;  %v4903_v43 = vpop.f32.mrf.mxu1  ;;  %5044 = vmatprep.subr.bf16.mxu1 %v5646_v7  ;;  %v3633_v2 = vsel %vm961_vm6, %v5542_v39, %v5543_v59  ;;  %v5563_v22 = vunpack.i.h.bf16 %v5561_v26  ;;  %v5562_v20 = vunpack.i.l.bf16 %v5561_v26  ;;  %v3689_v36 = vpack.c.bf16 %v5548_v25, %v5543_v59 }
 0x238   : > { %3524 = vmatpush1.bf16.msra.mxu0 %v7156_v54  ;;  %v3654_v54 = vsel %vm985_vm2, %v7380_v29, %v5532_v60  ;;  %v3632_v60 = vsel %vm961_vm6, %v7412_v51, %v5542_v39  ;;  %v3688_v31 = vpack.c.bf16 %v3644_v56, %v3633_v2  ;;  %v3685_v51 = vpack.c.bf16 %v3622_v45, %v3611_v46 }
 0x239   : > { %v2333_v5 = vpop.f32.mrf.mxu0  ;;  %5041 = vmatmul.mubr.msk.bf16.vlgmr.msra.gmra.mxu1 %vm1139_vm10, %v3420_v14  ;;  %4598 = vmatprep.subr.msk.bf16.mxu0 %vm1143_vm4, %v7446_v12  ;;  %v3690_v29 = vpack.c.bf16 %v3665_v27, %v3654_v54  ;;  %v3687_v28 = vpack.c.bf16 %v3643_v18, %v3632_v60  ;;  %v3599_v25 = vsel %vm925_vm9, %v3594_v1, %v5562_v20  ;;  %v4597_v54 = vld [vmem:[%s7684_s10 + $0x8] sm:$0xf] }
 0x23a   : > { %5045 = vmatpush3.bf16.msra.mxu1 %v7464_v32  ;;  %5054 = vmatprep.mubr.msk.bf16.mxu1 %vm5652_vm0, %v5646_v7  ;;  %v3684_v59 = vpack.c.bf16 %v3621_v13, %v3610_v61  ;;  %v3683_v39 = vpack.c.bf16 %v5563_v22, %v6565_v52  ;;  %v3681_v15 = vpack.c.bf16 %v3599_v25, %v7728_v38  ;;  %v7514_v56 = vpop.permute.xlu0 %5565 }
 0x23b   : > { %4595 = vmatmul.mubr.msk.bf16.vlgmr.msra.gmra.mxu0 %vm1139_vm10, %v3420_v14  ;;  %5046 = vmatprep.subr.bf16.mxu1 %v5646_v7  ;;  %v3600_v14 = vsel %vm925_vm9, %v5562_v20, %v5563_v22  ;;  %v4604_v20 = vld [vmem:[%s7684_s10 + $0x4] sm:$0xf] }
 0x23c   : > { %3716 = vmatpush1.bf16.msra.mxu0 %v7478_v17  ;;  %3741 = vmatprep.mubr.bf16.mxu0 %v7727_v19  ;;  %v3682_v8 = vpack.c.bf16 %v3600_v14, %v6556_v55 }
 0x23d   : > { %3717 = vmatprep.subr.bf16.mxu0 %v7470_v48 }
 0x23e   : > { %5047 = vmatpush3.bf16.msra.mxu1 %v7466_v49 }
 0x23f   : > { %5048 = vmatprep.subr.bf16.mxu1 %v5646_v7 }
 0x240   : > { %3718 = vmatpush1.bf16.msra.mxu0 %v3690_v29 }
 0x241   : > { %3719 = vmatprep.subr.bf16.mxu0 %v3688_v31 }
 0x242   : > { %5049 = vmatpush3.bf16.msra.mxu1 %v3689_v36 }
 0x243   : > { %5050 = vmatprep.subr.bf16.mxu1 %v5646_v7 }
 0x244   : > { %3720 = vmatpush1.bf16.msra.mxu0 %v3687_v28 }
 0x245   : > { %v2453_v10 = vpop.f32.mrf.mxu1  ;;  %3721 = vmatprep.subr.bf16.mxu0 %v3685_v51 }
 0x246   : > { %5051 = vmatpush3.bf16.msra.mxu1 %v3686_v16 }
 0x247   : > { %v2412_v35 = vpop.f32.mrf.mxu0  ;;  %v4916_v43 = vpop.f32.mrf.mxu1  ;;  %5052 = vmatprep.subr.bf16.mxu1 %v5646_v7 }
 0x248   : > { %3722 = vmatpush1.bf16.msra.mxu0 %v3684_v59 }
 0x249   : > { %v2414_v5 = vpop.f32.mrf.mxu0  ;;  %v2456_v27 = vpop.f32.mrf.mxu1  ;;  %3723 = vmatprep.subr.bf16.mxu0 %v3682_v8 }
 0x24a   : > { %5053 = vmatpush3.bf16.msra.mxu1 %v3683_v39  ;;  %v2415_v6 = vadd.f32 %v2414_v5, %v7443_v33 }
 0x24b   : > { %v2416_v55 = vpop.f32.mrf.mxu0  ;;  %v4917_v2 = vpop.f32.mrf.mxu1  ;;  %5058 = vmatprep.subr.bf16.mxu1 %v5646_v7 }
 0x24c   : > { %3724 = vmatpush1.bf16.msra.mxu0 %v3681_v15 }
 0x24d   : > { %v2417_v52 = vpop.f32.mrf.mxu0  ;;  %5055 = vmatmul.mubr.msk.bf16.vlgmr.msra.gmra.mxu1 %vm1139_vm10, %v4597_v54  ;;  %4605 = vmatprep.subr.msk.bf16.mxu0 %vm1143_vm4, %v7446_v12  ;;  %v7523_v12 = vpop.permute.xlu0 %5570 }
 0x24e   : > { %5059 = vmatpush3.bf16.msra.mxu1 %v7464_v32  ;;  %5068 = vmatprep.mubr.msk.bf16.mxu1 %vm5652_vm0, %v5646_v7  ;;  %v7525_v32 = vpop.permute.xlu1 %4051  ;;  %v5572_v45 = vunpack.i.l.bf16 %v7523_v12 }
 0x24f   : > { %4599 = vmatmul.mubr.msk.bf16.vlgmr.msra.gmra.mxu0 %vm1139_vm10, %v4597_v54  ;;  %5060 = vmatprep.subr.bf16.mxu1 %v5646_v7  ;;  %v4072_v13 = vpack.c.bf16 %v7525_v32, %v7525_v32 }
 0x250   : > { %3809 = vmatpush1.bf16.msra.mxu0 %v7478_v17  ;;  %3834 = vmatprep.mubr.bf16.mxu0 %v7727_v19  ;;  %v2454_v17 = vadd.f32 %v2453_v10, %v7426_v40 }
 0x251   : > { %3810 = vmatprep.subr.bf16.mxu0 %v7470_v48  ;;  %v7530_v0 = vpop.permute.xlu0 %4025  ;;  %v4084_v5 = vsel %vm1143_vm4, %v4072_v13, 0 }
 0x252   : > { %5061 = vmatpush3.bf16.msra.mxu1 %v7466_v49  ;;  %v2413_v49 = vadd.f32 %v2412_v35, %v7436_v37  ;;  %v4031_v2 = vsel %vm985_vm2, %v7530_v0, %v5572_v45 }
 0x253   : > { %5062 = vmatprep.subr.bf16.mxu1 %v5646_v7 }
 0x254   : > { %3811 = vmatpush1.bf16.msra.mxu0 %v3690_v29  ;;  %v7536_v29 = vpop.permute.xlu1 %5575 }
 0x255   : > { %3812 = vmatprep.subr.bf16.mxu0 %v3688_v31  ;;  %v7544_v33 = vpop.permute.xlu0 %5580 }
 0x256   : > { %5063 = vmatpush3.bf16.msra.mxu1 %v3689_v36  ;;  %v5583_v35 = vunpack.i.h.bf16 %v7544_v33 }
 0x257   : > { %5064 = vmatprep.subr.bf16.mxu1 %v5646_v7 }
 0x258   : > { %3813 = vmatpush1.bf16.msra.mxu0 %v3687_v28  ;;  %v4037_v36 = vpop.permute.xlu1 %4036 }
 0x259   : > { %v2653_v26 = vpop.f32.mrf.mxu1  ;;  %3814 = vmatprep.subr.bf16.mxu0 %v3685_v51  ;;  %v7558_v46 = vpop.permute.xlu0 %4003 }
 0x25a   : > { %v2661_v48 = vadd.f32 %v2653_v26, %v2454_v17  ;;  %5065 = vmatpush3.bf16.msra.mxu1 %v3686_v16  ;;  %v3797_v16 = vld [vmem:[%s7684_s10] sm:$0xf] }
 0x25b   : > { %v2612_v50 = vpop.f32.mrf.mxu0  ;;  %v4930_v24 = vpop.f32.mrf.mxu1  ;;  %5066 = vmatprep.subr.bf16.mxu1 %v5646_v7 }
 0x25c   : > { %4561 = vst.msk [vmem:[%s7001_s15 + $0x58] sm:$0xff] %vm1533_vm11, %v2661_v48  ;;  %v2659_v40 = vadd.f32 %v2612_v50, %v2413_v49  ;;  %3815 = vmatpush1.bf16.msra.mxu0 %v3684_v59 }
 0x25d   : > { %v2614_v42 = vpop.f32.mrf.mxu0  ;;  %v2656_v22 = vpop.f32.mrf.mxu1  ;;  %3816 = vmatprep.subr.bf16.mxu0 %v3682_v8 }
 0x25e   : > { %4559 = vst [vmem:[%s7001_s15 + $0x48] sm:$0xff] %v2659_v40  ;;  %v2660_v37 = vadd.f32 %v2614_v42, %v2415_v6  ;;  %5067 = vmatpush3.bf16.msra.mxu1 %v3683_v39 }
 0x25f   : > { %v2616_v18 = vpop.f32.mrf.mxu0  ;;  %v4931_v60 = vpop.f32.mrf.mxu1  ;;  %5072 = vmatprep.subr.bf16.mxu1 %v5646_v7 }
 0x260   : > { %4560 = vst [vmem:[%s7001_s15 + $0x50] sm:$0xff] %v2660_v37  ;;  %3817 = vmatpush1.bf16.msra.mxu0 %v3681_v15 }
 0x261   : > { %v2617_v31 = vpop.f32.mrf.mxu0  ;;  %5069 = vmatmul.mubr.msk.bf16.vlgmr.msra.gmra.mxu1 %vm1139_vm10, %v4604_v20  ;;  %4608 = vmatprep.subr.msk.bf16.mxu0 %vm1143_vm4, %v7260_v62  ;;  %v7562_v62 = vpop.permute.xlu1 %5585 }
 0x262   : > { %5073 = vmatpush3.bf16.msra.mxu1 %v7278_v11  ;;  %5082 = vmatprep.mubr.msk.bf16.mxu1 %vm5652_vm0, %v5646_v7  ;;  %v5568_v11 = vunpack.i.h.bf16 %v7514_v56  ;;  %v5588_v59 = vunpack.i.h.bf16 %v7562_v62  ;;  %v5587_v39 = vunpack.i.l.bf16 %v7562_v62 }
 0x263   : > { %4606 = vmatmul.mubr.msk.bf16.vlgmr.msra.gmra.mxu0 %vm1139_vm10, %v4604_v20  ;;  %5074 = vmatprep.subr.bf16.mxu1 %v5646_v7 }
 0x264   : > { %3893 = vmatpush1.bf16.msra.mxu0 %v7292_v44  ;;  %3918 = vmatprep.mubr.bf16.mxu0 %v7727_v19  ;;  %v5567_v44 = vunpack.i.l.bf16 %v7514_v56  ;;  %v4021_v56 = vsel %vm973_vm5, %v5587_v39, %v5588_v59  ;;  %v4066_v42 = vpack.c.bf16 %v5588_v59, %v5583_v35 }
 0x265   : > { %3894 = vmatprep.subr.bf16.mxu0 %v7284_v3  ;;  %v4015_v28 = vpop.permute.xlu1 %4014 }
 0x266   : > { %5075 = vmatpush3.bf16.msra.mxu1 %v7280_v23  ;;  %v7570_v23 = vpop.permute.xlu0 %5590  ;;  %v4020_v6 = vsel %vm973_vm5, %v4015_v28, %v5587_v39 }
 0x267   : > { %5076 = vmatprep.subr.bf16.mxu1 %v5646_v7  ;;  %v5593_v26 = vunpack.i.h.bf16 %v7570_v23  ;;  %v5592_v49 = vunpack.i.l.bf16 %v7570_v23 }
 0x268   : > { %3895 = vmatpush1.bf16.msra.mxu0 %v7302_v4  ;;  %v5578_v4 = vunpack.i.h.bf16 %v7536_v29 }
 0x269   : > { %3896 = vmatprep.subr.bf16.mxu0 %v7308_v30  ;;  %v5577_v30 = vunpack.i.l.bf16 %v7536_v29  ;;  %v5596_v38 = vpop.permute.xlu1 %5595  ;;  %v3988_v22 = vsel %vm937_vm8, %v5592_v49, %v5593_v26 }
 0x26a   : > { %5077 = vmatpush3.bf16.msra.mxu1 %v7311_v34  ;;  %v5573_v34 = vunpack.i.h.bf16 %v7523_v12  ;;  %v3982_v8 = vpop.permute.xlu0 %3981  ;;  %v5597_v17 = vunpack.i.l.bf16 %v5596_v38 }
 0x26b   : > { %5078 = vmatprep.subr.bf16.mxu1 %v5646_v7  ;;  %v4042_v54 = vsel %vm997_vm3, %v4037_v36, %v5577_v30 }
 0x26c   : > { %3897 = vmatpush1.bf16.msra.mxu0 %v7317_v53  ;;  %v4054_v53 = vsel %vm1009_vm1, %v5568_v11, %v7525_v32  ;;  %v4032_v25 = vsel %vm985_vm2, %v5572_v45, %v5573_v34  ;;  %v4069_v27 = vpack.c.bf16 %v5578_v4, %v5573_v34  ;;  %v5598_v32 = vunpack.i.h.bf16 %v5596_v38 }
 0x26d   : > { %v7572_v3 = vpop.f32.mrf.mxu1  ;;  %3898 = vmatprep.subr.bf16.mxu0 %v7323_v63  ;;  %v4053_v63 = vsel %vm1009_vm1, %v5567_v44, %v5568_v11  ;;  %v4067_v48 = vpack.c.bf16 %v4042_v54, %v4031_v2  ;;  %v3993_v0 = vpop.permute.xlu1 %3992  ;;  %v7729_v11 = vld [vmem:[#allocation3_spill] sm:$0xff] }
 0x26e   : > { %5079 = vmatpush3.bf16.msra.mxu1 %v7326_v41  ;;  %v4071_v41 = vpack.c.bf16 %v4054_v53, %v4054_v53  ;;  %v4070_v10 = vpack.c.bf16 %v4053_v63, %v4053_v63  ;;  %v5601_v12 = vpop.permute.xlu0 %5600  ;;  %v3998_v60 = vsel %vm949_vm7, %v3993_v0, %v5597_v17  ;;  %v4063_v36 = vpack.c.bf16 %v5598_v32, %v5593_v26  ;;  %v4611_v63 = vld [vmem:[%s7684_s10 + $0x8] sm:$0xf] }
 0x26f   : > { %v7582_v1 = vpop.f32.mrf.mxu0  ;;  %v4944_v14 = vpop.f32.mrf.mxu1  ;;  %5080 = vmatprep.subr.bf16.mxu1 %v5646_v7  ;;  %v5603_v50 = vunpack.i.h.bf16 %v5601_v12  ;;  %v5602_v24 = vunpack.i.l.bf16 %v5601_v12 }
 0x270   : > { %3899 = vmatpush1.bf16.msra.mxu0 %v7334_v9  ;;  %v4043_v9 = vsel %vm997_vm3, %v5577_v30, %v5578_v4  ;;  %v7730_v4 = vld [vmem:[#allocation4_spill] sm:$0xff] }
 0x271   : > { %v7589_v61 = vpop.f32.mrf.mxu0  ;;  %v2749_v51 = vpop.f32.mrf.mxu1  ;;  %3900 = vmatprep.subr.bf16.mxu0 %v7332_v58  ;;  %v5582_v58 = vunpack.i.l.bf16 %v7544_v33  ;;  %v4068_v55 = vpack.c.bf16 %v4043_v9, %v4032_v25  ;;  %v3977_v18 = vsel %vm925_vm9, %v5602_v24, %v5603_v50  ;;  %v3987_v33 = vsel %vm937_vm8, %v3982_v8, %v5592_v49 }
 0x272   : > { %5081 = vmatpush3.bf16.msra.mxu1 %v7337_v57  ;;  %v3971_v20 = vpop.permute.xlu1 %3970  ;;  %v4059_v44 = vpack.c.bf16 %v3977_v18, %v7729_v11  ;;  %v4061_v23 = vpack.c.bf16 %v3998_v60, %v3987_v33  ;;  %v4060_v30 = vpack.c.bf16 %v5603_v50, %v7730_v4 }
 0x273   : > { %v2709_v43 = vpop.f32.mrf.mxu0  ;;  %v4945_v57 = vpop.f32.mrf.mxu1  ;;  %5086 = vmatprep.subr.bf16.mxu1 %v5646_v7  ;;  %v4010_v52 = vsel %vm961_vm6, %v5582_v58, %v5583_v35  ;;  %v4009_v40 = vsel %vm961_vm6, %v7558_v46, %v5582_v58  ;;  %v3976_v62 = vsel %vm925_vm9, %v3971_v20, %v5602_v24 }
 0x274   : > { %3901 = vmatpush1.bf16.msra.mxu0 %v7342_v47  ;;  %v4078_v47 = vsel %vm1143_vm4, %v4070_v10, 0  ;;  %v4065_v29 = vpack.c.bf16 %v4021_v56, %v4010_v52  ;;  %v4064_v37 = vpack.c.bf16 %v4020_v6, %v4009_v40  ;;  %v4058_v28 = vpack.c.bf16 %v3976_v62, %v6775_v21 }
 0x275   : > { %v2710_v15 = vpop.f32.mrf.mxu0  ;;  %5083 = vmatmul.mubr.msk.bf16.vlgmr.msra.gmra.mxu1 %vm1139_vm10, %v3797_v16  ;;  %4612 = vmatprep.subr.msk.bf16.mxu0 %vm1143_vm4, %v4071_v41 }
 0x276   : > { %5087 = vmatpush3.bf16.msra.mxu1 %v4084_v5  ;;  %5096 = vmatprep.mubr.msk.bf16.mxu1 %vm5652_vm0, %v5646_v7 }
 0x277   : > { %4609 = vmatmul.mubr.msk.bf16.vlgmr.msra.gmra.mxu0 %vm1139_vm10, %v3797_v16  ;;  %5088 = vmatprep.subr.bf16.mxu1 %v5646_v7 }
 0x278   : > { %4093 = vmatpush1.bf16.msra.mxu0 %v4078_v47  ;;  %4118 = vmatprep.mubr.bf16.mxu0 %v7727_v19  ;;  %v3999_v19 = vsel %vm949_vm7, %v5597_v17, %v5598_v32 }
 0x279   : > { %4094 = vmatprep.subr.bf16.mxu0 %v4068_v55  ;;  %v4062_v31 = vpack.c.bf16 %v3999_v19, %v3988_v22 }
 0x27a   : > { %5089 = vmatpush3.bf16.msra.mxu1 %v4069_v27 }
 0x27b   : > { %5090 = vmatprep.subr.bf16.mxu1 %v5646_v7 }
 0x27c   : > { %4095 = vmatpush1.bf16.msra.mxu0 %v4067_v48 }
 0x27d   : > { %4096 = vmatprep.subr.bf16.mxu0 %v4065_v29 }
 0x27e   : > { %5091 = vmatpush3.bf16.msra.mxu1 %v4066_v42 }
 0x27f   : > { %5092 = vmatprep.subr.bf16.mxu1 %v5646_v7 }
 0x280   : > { %4097 = vmatpush1.bf16.msra.mxu0 %v4064_v37 }
 0x281   : > { %v2830_v46 = vpop.f32.mrf.mxu1  ;;  %4098 = vmatprep.subr.bf16.mxu0 %v4062_v31 }
 0x282   : > { %5093 = vmatpush3.bf16.msra.mxu1 %v4063_v36 }
 0x283   : > { %v2789_v34 = vpop.f32.mrf.mxu0  ;;  %v4958_v45 = vpop.f32.mrf.mxu1  ;;  %5094 = vmatprep.subr.bf16.mxu1 %v5646_v7  ;;  %v2831_v7 = vadd.f32 %v2830_v46, %v7572_v3 }
 0x284   : > { %4099 = vmatpush1.bf16.msra.mxu0 %v4061_v23  ;;  %v2790_v16 = vadd.f32 %v2789_v34, %v7582_v1 }
 0x285   : > { %v2791_v53 = vpop.f32.mrf.mxu0  ;;  %v2833_v14 = vpop.f32.mrf.mxu1  ;;  %4100 = vmatprep.subr.bf16.mxu0 %v4059_v44 }
 0x286   : > { %5095 = vmatpush3.bf16.msra.mxu1 %v4060_v30  ;;  %v2792_v8 = vadd.f32 %v2791_v53, %v7589_v61 }
 0x287   : > { %v2793_v13 = vpop.f32.mrf.mxu0  ;;  %v4959_v51 = vpop.f32.mrf.mxu1 }
 0x288   : > { %4101 = vmatpush1.bf16.msra.mxu0 %v4058_v28 }
 0x289   : > { %v2794_v41 = vpop.f32.mrf.mxu0  ;;  %5097 = vmatmul.mubr.msk.bf16.vlgmr.msra.gmra.mxu1 %vm1139_vm10, %v4611_v63 }
 0x28b   : > { %4613 = vmatmul.mubr.msk.bf16.vlgmr.msra.gmra.mxu0 %vm1139_vm10, %v4611_v63 }
 0x295   : > { %v3030_v21 = vpop.f32.mrf.mxu1 }
 0x296   : > { %v3038_v10 = vadd.f32 %v3030_v21, %v2831_v7 }
 0x297   : > { %v2989_v25 = vpop.f32.mrf.mxu0  ;;  %v4972_v9 = vpop.f32.mrf.mxu1 }
 0x298   : > { %4575 = vst.msk [vmem:[%s7001_s15 + $0x70] sm:$0xff] %vm1533_vm11, %v3038_v10  ;;  %v3036_v59 = vadd.f32 %v2989_v25, %v2790_v16 }
 0x299   : > { %v2991_v39 = vpop.f32.mrf.mxu0  ;;  %v3033_v35 = vpop.f32.mrf.mxu1 }
 0x29a   : > { %4573 = vst [vmem:[%s7001_s15 + $0x60] sm:$0xff] %v3036_v59  ;;  %v3037_v58 = vadd.f32 %v2991_v39, %v2792_v8 }
 0x29b   : > { %v2993_v43 = vpop.f32.mrf.mxu0  ;;  %v4973_v57 = vpop.f32.mrf.mxu1 }
 0x29c   : > { %4574 = vst [vmem:[%s7001_s15 + $0x68] sm:$0xff] %v3037_v58 }
 0x29d   : > { %v2994_v38 = vpop.f32.mrf.mxu0 }
 0x2a9   : > { %v3123_v3 = vpop.f32.mrf.mxu1 }
 0x2ab   : > { %v3082_v15 = vpop.f32.mrf.mxu0  ;;  %v4986_v5 = vpop.f32.mrf.mxu1 }
 0x2ad   : > { %v3084_v1 = vpop.f32.mrf.mxu0  ;;  %v3126_v27 = vpop.f32.mrf.mxu1 }
 0x2af   : > { %v3086_v54 = vpop.f32.mrf.mxu0  ;;  %v4987_v55 = vpop.f32.mrf.mxu1 }
 0x2b1   : > { %v3087_v2 = vpop.f32.mrf.mxu0 }
 0x2bd   : > { %v3207_v61 = vpop.f32.mrf.mxu1 }
 0x2be   : > { %v3208_v49 = vadd.f32 %v3207_v61, %v3123_v3 }
 0x2bf   : > { %v3166_v47 = vpop.f32.mrf.mxu0  ;;  %v5000_v52 = vpop.f32.mrf.mxu1 }
 0x2c0   : > { %v3167_v0 = vadd.f32 %v3166_v47, %v3082_v15 }
 0x2c1   : > { %v3168_v56 = vpop.f32.mrf.mxu0  ;;  %v3210_v12 = vpop.f32.mrf.mxu1 }
 0x2c2   : > { %v3169_v40 = vadd.f32 %v3168_v56, %v3084_v1 }
 0x2c3   : > { %v3170_v32 = vpop.f32.mrf.mxu0  ;;  %v5001_v17 = vpop.f32.mrf.mxu1 }
 0x2c5   : > { %v3171_v26 = vpop.f32.mrf.mxu0 }
 0x2d1   : > { %v3407_v48 = vpop.f32.mrf.mxu1 }
 0x2d2   : > { %v3415_v50 = vadd.f32 %v3407_v48, %v3208_v49 }
 0x2d3   : > { %v3366_v24 = vpop.f32.mrf.mxu0  ;;  %v5014_v6 = vpop.f32.mrf.mxu1 }
 0x2d4   : > { %4589 = vst.msk [vmem:[%s7001_s15 + $0x88] sm:$0xff] %vm1533_vm11, %v3415_v50  ;;  %v3413_v29 = vadd.f32 %v3366_v24, %v3167_v0 }
 0x2d5   : > { %v3368_v42 = vpop.f32.mrf.mxu0  ;;  %v3410_v22 = vpop.f32.mrf.mxu1 }
 0x2d6   : > { %4587 = vst [vmem:[%s7001_s15 + $0x78] sm:$0xff] %v3413_v29  ;;  %v3414_v19 = vadd.f32 %v3368_v42, %v3169_v40 }
 0x2d7   : > { %v3370_v37 = vpop.f32.mrf.mxu0  ;;  %v5015_v20 = vpop.f32.mrf.mxu1 }
 0x2d8   : > { %4588 = vst [vmem:[%s7001_s15 + $0x80] sm:$0xff] %v3414_v19 }
 0x2d9   : > { %v3371_v18 = vpop.f32.mrf.mxu0 }
 0x2e5   : > { %v3500_v60 = vpop.f32.mrf.mxu1 }
 0x2e7   : > { %v3459_v33 = vpop.f32.mrf.mxu0  ;;  %v5028_v31 = vpop.f32.mrf.mxu1 }
 0x2e9   : > { %v3461_v36 = vpop.f32.mrf.mxu0  ;;  %v3503_v46 = vpop.f32.mrf.mxu1 }
 0x2eb   : > { %v3463_v62 = vpop.f32.mrf.mxu0  ;;  %v5029_v11 = vpop.f32.mrf.mxu1 }
 0x2ed   : > { %v3464_v44 = vpop.f32.mrf.mxu0 }
 0x2f9   : > { %v3584_v23 = vpop.f32.mrf.mxu1 }
 0x2fa   : > { %v3585_v63 = vadd.f32 %v3584_v23, %v3500_v60 }
 0x2fb   : > { %v3543_v4 = vpop.f32.mrf.mxu0  ;;  %v5042_v30 = vpop.f32.mrf.mxu1 }
 0x2fc   : > { %v3544_v51 = vadd.f32 %v3543_v4, %v3459_v33 }
 0x2fd   : > { %v3545_v34 = vpop.f32.mrf.mxu0  ;;  %v3587_v45 = vpop.f32.mrf.mxu1 }
 0x2fe   : > { %v3546_v16 = vadd.f32 %v3545_v34, %v3461_v36 }
 0x2ff   : > { %v3547_v28 = vpop.f32.mrf.mxu0  ;;  %v5043_v53 = vpop.f32.mrf.mxu1 }
 0x301   : > { %v3548_v14 = vpop.f32.mrf.mxu0 }
 0x30d   : > { %v3784_v13 = vpop.f32.mrf.mxu1 }
 0x30e   : > { %v3792_v41 = vadd.f32 %v3784_v13, %v3585_v63 }
 0x30f   : > { %v3743_v7 = vpop.f32.mrf.mxu0  ;;  %v5056_v21 = vpop.f32.mrf.mxu1 }
 0x310   : > { %4603 = vst.msk [vmem:[%s7001_s15 + $0xa0] sm:$0xff] %vm1533_vm11, %v3792_v41  ;;  %v3790_v10 = vadd.f32 %v3743_v7, %v3544_v51 }
 0x311   : > { %v3745_v25 = vpop.f32.mrf.mxu0  ;;  %v3787_v9 = vpop.f32.mrf.mxu1 }
 0x312   : > { %4601 = vst [vmem:[%s7001_s15 + $0x90] sm:$0xff] %v3790_v10  ;;  %v3791_v8 = vadd.f32 %v3745_v25, %v3546_v16 }
 0x313   : > { %v3747_v59 = vpop.f32.mrf.mxu0  ;;  %v5057_v39 = vpop.f32.mrf.mxu1 }
 0x314   : > { %4602 = vst [vmem:[%s7001_s15 + $0x98] sm:$0xff] %v3791_v8 }
 0x315   : > { %v3748_v35 = vpop.f32.mrf.mxu0 }
 0x321   : > { %v3877_v58 = vpop.f32.mrf.mxu1 }
 0x323   : > { %v3836_v43 = vpop.f32.mrf.mxu0  ;;  %v5070_v57 = vpop.f32.mrf.mxu1 }
 0x325   : > { %v3838_v38 = vpop.f32.mrf.mxu0  ;;  %v3880_v3 = vpop.f32.mrf.mxu1 }
 0x327   : > { %v3840_v15 = vpop.f32.mrf.mxu0  ;;  %v5071_v5 = vpop.f32.mrf.mxu1 }
 0x329   : > { %v3841_v1 = vpop.f32.mrf.mxu0 }
 0x335   : > { %v3961_v27 = vpop.f32.mrf.mxu1 }
 0x336   : > { %v3962_v12 = vadd.f32 %v3961_v27, %v3877_v58 }
 0x337   : > { %v3920_v54 = vpop.f32.mrf.mxu0  ;;  %v5084_v55 = vpop.f32.mrf.mxu1 }
 0x338   : > { %v3921_v17 = vadd.f32 %v3920_v54, %v3836_v43 }
 0x339   : > { %v3922_v2 = vpop.f32.mrf.mxu0  ;;  %v3964_v61 = vpop.f32.mrf.mxu1 }
 0x33a   : > { %v3923_v0 = vadd.f32 %v3922_v2, %v3838_v38 }
 0x33b   : > { %v3924_v47 = vpop.f32.mrf.mxu0  ;;  %v5085_v52 = vpop.f32.mrf.mxu1 }
 0x33d   : > { %v3925_v56 = vpop.f32.mrf.mxu0 }
 0x349   : > { %v4161_v32 = vpop.f32.mrf.mxu1 }
 0x34a   : > { %v4169_v26 = vadd.f32 %v4161_v32, %v3962_v12 }
 0x34b   : > { %v4120_v49 = vpop.f32.mrf.mxu0  ;;  %v5098_v48 = vpop.f32.mrf.mxu1 }
 0x34c   : > { %4617 = vst.msk [vmem:[%s7001_s15 + $0xb8] sm:$0xff] %vm1533_vm11, %v4169_v26  ;;  %v4167_v50 = vadd.f32 %v4120_v49, %v3921_v17 }
 0x34d   : > { %v4122_v24 = vpop.f32.mrf.mxu0  ;;  %v4164_v6 = vpop.f32.mrf.mxu1 }
 0x34e   : > { %4615 = vst [vmem:[%s7001_s15 + $0xa8] sm:$0xff] %v4167_v50  ;;  %v4168_v40 = vadd.f32 %v4122_v24, %v3923_v0 }
 0x34f   : > { %v4124_v29 = vpop.f32.mrf.mxu0  ;;  %v5099_v42 = vpop.f32.mrf.mxu1 }
 0x350   : > { %4616 = vst [vmem:[%s7001_s15 + $0xb0] sm:$0xff] %v4168_v40 }
 0x351   : > { %v4125_v22 = vpop.f32.mrf.mxu0 }
 0x352 PF: > { %s21_s21 = sadd.s32 1, %s5642_s21   ;;  %s7731_s17 = smov %s5634_s19 }
 0x353   : > { %p18_p3 = scmp.ge.s32.totalorder %s21_s21, 6   ;;  %s7732_s18 = smov %s5638_s20 }
 0x354   : > { %s7733_s19 = smov %s7736_s22  ;;  %s7734_s20 = smov %s7740_s23 }
 0x355   :  { %20 = sbr.rel (!%p18_p3) target bundleno = 5 (0x5), region = 130 }

</bundles_post_ra>
